<compile_context>
chip_gen: v7x
topology: tpu7x:2x2x1
jax: 0.10.0
libtpu: 0.0.40
codegen_flags: <defaults>
</compile_context>

<pallas_src>
import math
import numpy as np
import jax
import jax.numpy as jnp
from jax.experimental import pallas as pl
from jax.experimental.pallas import tpu as pltpu

# --- module config (TransLayer(dim=64, head=8, attn='rmsa', region_size=4)) ---
DIM = 64
HEADS = 8
HEAD_DIM = DIM // HEADS          # 8
INNER = HEADS * HEAD_DIM         # 64  (== DIM, since head_dim = dim // head)
REGION_SIZE = 4
SCALE = HEAD_DIM ** (-0.5)
LN_EPS = 1e-5


# ---------------------------------------------------------------------------
# Fused Pallas kernel: LN -> region MHSA -> proj -> residual, R regions / step
# ---------------------------------------------------------------------------
def make_fused_kernel(R, N, C):
    RN = R * N

    def kernel(x_ref, m_ref, g_ref, b_ref,
               wqkv_ref, bqkv_ref, wproj_ref, bproj_ref, o_ref):
        # x_ref block: (R, N, C) raw (zero-padded) tokens of R regions.
        x_raw = x_ref[...].reshape(RN, C).astype(jnp.float32)       # (RN, C)
        mask = m_ref[...].reshape(RN, 1).astype(jnp.float32)        # 1=real, 0=pad

        # LayerNorm over C (f32), then zero padded rows (reference pads zeros AFTER LN).
        mu = jnp.mean(x_raw, axis=-1, keepdims=True)
        xc = x_raw - mu
        var = jnp.mean(xc * xc, axis=-1, keepdims=True)
        xn = (xc * jax.lax.rsqrt(var + LN_EPS)) * g_ref[...] + b_ref[...]
        xn = xn * mask

        # QKV projection for all R*N tokens at once: (RN, C) @ (C, 3*INNER) + bias
        qkv = jnp.dot(xn, wqkv_ref[...], preferred_element_type=jnp.float32) + bqkv_ref[...]
        qkv = qkv.reshape(R, N, 3 * INNER)

        # Per-head attention, batched over the R regions in this block.
        # Column layout of qkv matches torch reshape(B_,N,3,nh,hd): q|k|v blocks of
        # INNER columns each, head-major / head_dim-minor inside each block.
        head_outs = []
        for h in range(HEADS):
            off = h * HEAD_DIM
            qh = qkv[:, :, off:off + HEAD_DIM] * SCALE                       # (R, N, hd)
            kh = qkv[:, :, INNER + off:INNER + off + HEAD_DIM]               # (R, N, hd)
            vh = qkv[:, :, 2 * INNER + off:2 * INNER + off + HEAD_DIM]       # (R, N, hd)
            s = jnp.einsum("rnd,rmd->rnm", qh, kh,
                           preferred_element_type=jnp.float32)               # (R, N, N)
            a = jax.nn.softmax(s, axis=-1)
            head_outs.append(jnp.einsum("rnm,rmd->rnd", a, vh,
                                        preferred_element_type=jnp.float32))  # (R, N, hd)
        attn_out = jnp.concatenate(head_outs, axis=-1).reshape(RN, INNER)

        # Output projection + fused residual (residual uses raw padded x; padded
        # rows are sliced off after region_reverse, so their values don't matter).
        y = jnp.dot(attn_out, wproj_ref[...], preferred_element_type=jnp.float32) + bproj_ref[...]
        o_ref[...] = (x_raw + y).reshape(R, N, C).astype(o_ref.dtype)

    return kernel


# ---------------------------------------------------------------------------
# JAX glue (same math as the PyTorch helpers)
# ---------------------------------------------------------------------------
def region_partition(x, rs):
    B, H, W, C = x.shape
    x = x.reshape(B, H // rs, rs, W // rs, rs, C)
    return x.transpose(0, 1, 3, 2, 4, 5).reshape(-1, rs, rs, C)


def region_reverse(regions, rs, H, W):
    B = regions.shape[0] // (H * W // rs // rs)
    x = regions.reshape(B, H // rs, W // rs, rs, rs, -1)
    return x.transpose(0, 1, 3, 2, 4, 5).reshape(B, H, W, -1)


def compute_padding(L):
    # RegionAttntion.padding with region_size=REGION_SIZE, min_region_num=0, min_region_ratio=0
    H = W = int(np.ceil(np.sqrt(L)))
    _n = (-H) % REGION_SIZE
    H, W = H + _n, W + _n
    add_length = H * W - L
    return H, W, add_length, REGION_SIZE


def choose_region_block(nr, target=32):
    # Largest divisor of nr <= target, preferring configs that keep >= 2 grid steps
    # (so both v7x TensorCores get work).  VMEM per step stays tiny for any choice.
    divisors = [d for d in range(1, min(nr, target) + 1) if nr % d == 0]
    multi_step = [d for d in divisors if nr // d >= 2]
    return max(multi_step) if multi_step else max(divisors)


def trans_layer_forward(x, params):
    B, L, C = x.shape
    H, W, add_length, rs = compute_padding(L)
    N = rs * rs

    # --- pad (pre-kernel) + region partition ---
    xp = x
    if add_length > 0:
        xp = jnp.concatenate([x, jnp.zeros((B, add_length, C), x.dtype)], axis=1)
    x_regions = region_partition(xp.reshape(B, H, W, C), rs).reshape(-1, N, C)   # (NR, N, C)
    NR = x_regions.shape[0]

    # validity mask, region-partitioned the same way (padded rows must be zero POST-LN)
    valid = (jnp.arange(H * W) < L).astype(x.dtype)
    valid = jnp.broadcast_to(valid[None, :, None], (B, H * W, 1)).reshape(B, H, W, 1)
    mask_regions = region_partition(valid, rs).reshape(-1, N, 1)                 # (NR, N, 1)

    RB = choose_region_block(NR)
    grid = (NR // RB,)

    out_regions = pl.pallas_call(
        make_fused_kernel(RB, N, C),
        out_shape=jax.ShapeDtypeStruct((NR, N, C), x.dtype),
        grid=grid,
        in_specs=[
            pl.BlockSpec((RB, N, C), lambda r: (r, 0, 0)),      # x regions (raw, padded)
            pl.BlockSpec((RB, N, 1), lambda r: (r, 0, 0)),      # validity mask
            pl.BlockSpec((1, C), lambda r: (0, 0)),             # ln gamma
            pl.BlockSpec((1, C), lambda r: (0, 0)),             # ln beta
            pl.BlockSpec((C, 3 * INNER), lambda r: (0, 0)),     # w_qkv (loaded once)
            pl.BlockSpec((1, 3 * INNER), lambda r: (0, 0)),     # b_qkv
            pl.BlockSpec((INNER, C), lambda r: (0, 0)),         # w_proj
            pl.BlockSpec((1, C), lambda r: (0, 0)),             # b_proj
        ],
        out_specs=pl.BlockSpec((RB, N, C), lambda r: (r, 0, 0)),
        compiler_params=pltpu.CompilerParams(dimension_semantics=("parallel",)),
    )(x_regions, mask_regions, params["ln_g"], params["ln_b"],
      params["w_qkv"], params["b_qkv"], params["w_proj"], params["b_proj"])

    # --- region reverse + unpad (residual already fused in-kernel) ---
    z = region_reverse(out_regions.reshape(-1, rs, rs, C), rs, H, W).reshape(B, H * W, C)
    if add_length > 0:
        z = z[:, :-add_length]
    return z


# ---------------------------------------------------------------------------
# pure-JAX reference (mirrors the PyTorch forward, eval mode)
# ---------------------------------------------------------------------------
def reference_forward(x, params):
    B, L, C = x.shape
    mu = jnp.mean(x, axis=-1, keepdims=True)
    var = jnp.mean((x - mu) ** 2, axis=-1, keepdims=True)
    xn = (x - mu) / jnp.sqrt(var + LN_EPS) * params["ln_g"][0] + params["ln_b"][0]

    H, W, add_length, rs = compute_padding(L)
    if add_length > 0:
        xn = jnp.concatenate([xn, jnp.zeros((B, add_length, C), xn.dtype)], axis=1)
    regions = region_partition(xn.reshape(B, H, W, C), rs).reshape(-1, rs * rs, C)
    NR, N, _ = regions.shape

    qkv = regions @ params["w_qkv"] + params["b_qkv"][0]
    qkv = qkv.reshape(NR, N, 3, HEADS, HEAD_DIM).transpose(2, 0, 3, 1, 4)
    q, k, v = qkv[0] * SCALE, qkv[1], qkv[2]                 # (NR, H, N, hd)
    a = jax.nn.softmax(jnp.einsum("whnd,whmd->whnm", q, k), axis=-1)
    o = jnp.einsum("whnm,whmd->whnd", a, v).transpose(0, 2, 1, 3).reshape(NR, N, INNER)
    o = o @ params["w_proj"] + params["b_proj"][0]

    z = region_reverse(o.reshape(-1, rs, rs, C), rs, H, W).reshape(B, H * W, C)
    if add_length > 0:
        z = z[:, :-add_length]
    return x + z


# ---------------------------------------------------------------------------
if __name__ == "__main__":
    key = jax.random.PRNGKey(0)
    k1, k2, k3, k4, k5, k6 = jax.random.split(key, 6)

    params = {
        "ln_g": jnp.ones((1, DIM), jnp.float32),
        "ln_b": jnp.zeros((1, DIM), jnp.float32),
        "w_qkv": jax.random.normal(k1, (DIM, 3 * INNER), jnp.float32) / math.sqrt(DIM),
        "b_qkv": jax.random.normal(k2, (1, 3 * INNER), jnp.float32) * 0.02,
        "w_proj": jax.random.normal(k3, (INNER, DIM), jnp.float32) / math.sqrt(INNER),
        "b_proj": jax.random.normal(k4, (1, DIM), jnp.float32) * 0.02,
    }

    # case 1: B=2, L=60  -> pads to H=W=8,  NR=8,  R_BLOCK=4, grid=(2,)
    # case 2: B=1, L=250 -> pads to H=W=16, NR=16, R_BLOCK=8, grid=(2,)
    for (B, L), kx in [((2, 60), k5), ((1, 250), k6)]:
        x = jax.random.normal(kx, (B, L, DIM), jnp.float32)
        out = jax.block_until_ready(trans_layer_forward(x, params))
        ref = reference_forward(x, params)
        assert out.shape == (B, L, DIM)
        assert np.allclose(np.asarray(out), np.asarray(ref), rtol=2e-3, atol=2e-3)

    print("KERNEL_OK")
</pallas_src>

<mosaic_0001>
module attributes {stable_mosaic.version = 11 : i64} {
  func.func @kernel(%arg0: i32, %arg1: memref<4x16x64xf32, #tpu.memory_space<vmem>>, %arg2: memref<4x16x1xf32, #tpu.memory_space<vmem>>, %arg3: memref<1x64xf32, #tpu.memory_space<vmem>>, %arg4: memref<1x64xf32, #tpu.memory_space<vmem>>, %arg5: memref<64x192xf32, #tpu.memory_space<vmem>>, %arg6: memref<1x192xf32, #tpu.memory_space<vmem>>, %arg7: memref<64x64xf32, #tpu.memory_space<vmem>>, %arg8: memref<1x64xf32, #tpu.memory_space<vmem>>, %arg9: memref<4x16x64xf32, #tpu.memory_space<vmem>>) attributes {dimension_semantics = [#tpu.dimension_semantics<parallel>], iteration_bounds = array<i64: 2>, scalar_prefetch = 0 : i64, scratch_operands = 0 : i64, tpu.core_type = #tpu.core_type<tc>, window_params = [{transform_indices = @transform_0, window_bounds = array<i64: 4, 16, 64>}, {transform_indices = @transform_1, window_bounds = array<i64: 4, 16, 1>}, {pipeline_mode = #tpu.pipeline_mode<synchronous>, transform_indices = @transform_2, window_bounds = array<i64: 1, 64>}, {pipeline_mode = #tpu.pipeline_mode<synchronous>, transform_indices = @transform_3, window_bounds = array<i64: 1, 64>}, {pipeline_mode = #tpu.pipeline_mode<synchronous>, transform_indices = @transform_4, window_bounds = array<i64: 64, 192>}, {pipeline_mode = #tpu.pipeline_mode<synchronous>, transform_indices = @transform_5, window_bounds = array<i64: 1, 192>}, {pipeline_mode = #tpu.pipeline_mode<synchronous>, transform_indices = @transform_6, window_bounds = array<i64: 64, 64>}, {pipeline_mode = #tpu.pipeline_mode<synchronous>, transform_indices = @transform_7, window_bounds = array<i64: 1, 64>}, {transform_indices = @transform_8, window_bounds = array<i64: 4, 16, 64>}]} {
    %c0 = arith.constant 0 : index
    %c0_0 = arith.constant 0 : index
    %c0_1 = arith.constant 0 : index
    %0 = vector.load %arg1[%c0, %c0_0, %c0_1] : memref<4x16x64xf32, #tpu.memory_space<vmem>>, vector<4x16x64xf32>
    %1 = vector.shape_cast %0 : vector<4x16x64xf32> to vector<64x64xf32>
    %c0_2 = arith.constant 0 : index
    %c0_3 = arith.constant 0 : index
    %c0_4 = arith.constant 0 : index
    %2 = vector.load %arg2[%c0_2, %c0_3, %c0_4] : memref<4x16x1xf32, #tpu.memory_space<vmem>>, vector<4x16x1xf32>
    %3 = vector.shape_cast %2 : vector<4x16x1xf32> to vector<64x1xf32>
    %cst = arith.constant dense<0.000000e+00> : vector<64xf32>
    %4 = vector.multi_reduction <add>, %1, %cst [1] : vector<64x64xf32> to vector<64xf32>
    %5 = vector.shape_cast %4 : vector<64xf32> to vector<64x1xf32>
    %cst_5 = arith.constant 6.400000e+01 : f32
    %6 = vector.broadcast %cst_5 : f32 to vector<64x1xf32>
    %7 = arith.divf %5, %6 : vector<64x1xf32>
    %8 = vector.broadcast %7 : vector<64x1xf32> to vector<64x64xf32>
    %9 = arith.subf %1, %8 : vector<64x64xf32>
    %10 = arith.mulf %9, %9 : vector<64x64xf32>
    %cst_6 = arith.constant dense<0.000000e+00> : vector<64xf32>
    %11 = vector.multi_reduction <add>, %10, %cst_6 [1] : vector<64x64xf32> to vector<64xf32>
    %12 = vector.shape_cast %11 : vector<64xf32> to vector<64x1xf32>
    %cst_7 = arith.constant 6.400000e+01 : f32
    %13 = vector.broadcast %cst_7 : f32 to vector<64x1xf32>
    %14 = arith.divf %12, %13 : vector<64x1xf32>
    %cst_8 = arith.constant 9.99999974E-6 : f32
    %15 = vector.broadcast %cst_8 : f32 to vector<64x1xf32>
    %16 = arith.addf %14, %15 : vector<64x1xf32>
    %17 = math.rsqrt %16 : vector<64x1xf32>
    %18 = vector.broadcast %17 : vector<64x1xf32> to vector<64x64xf32>
    %19 = arith.mulf %9, %18 : vector<64x64xf32>
    %c0_9 = arith.constant 0 : index
    %c0_10 = arith.constant 0 : index
    %20 = vector.load %arg3[%c0_9, %c0_10] : memref<1x64xf32, #tpu.memory_space<vmem>>, vector<1x64xf32>
    %21 = vector.broadcast %20 : vector<1x64xf32> to vector<64x64xf32>
    %22 = arith.mulf %19, %21 : vector<64x64xf32>
    %c0_11 = arith.constant 0 : index
    %c0_12 = arith.constant 0 : index
    %23 = vector.load %arg4[%c0_11, %c0_12] : memref<1x64xf32, #tpu.memory_space<vmem>>, vector<1x64xf32>
    %24 = vector.broadcast %23 : vector<1x64xf32> to vector<64x64xf32>
    %25 = arith.addf %22, %24 : vector<64x64xf32>
    %26 = vector.broadcast %3 : vector<64x1xf32> to vector<64x64xf32>
    %27 = arith.mulf %25, %26 : vector<64x64xf32>
    %c0_13 = arith.constant 0 : index
    %c0_14 = arith.constant 0 : index
    %28 = vector.load %arg5[%c0_13, %c0_14] : memref<64x192xf32, #tpu.memory_space<vmem>>, vector<64x192xf32>
    %cst_15 = arith.constant dense<0.000000e+00> : vector<64x192xf32>
    %29 = tpu.matmul %27, %28, %cst_15 {dimension_numbers = #tpu.dot_dimension_numbers<[1], [0], [0], [1], [0, 0, 1, 1], [], []>} : vector<64x64xf32>, vector<64x192xf32>, vector<64x192xf32> -> vector<64x192xf32>
    %c0_16 = arith.constant 0 : index
    %c0_17 = arith.constant 0 : index
    %30 = vector.load %arg6[%c0_16, %c0_17] : memref<1x192xf32, #tpu.memory_space<vmem>>, vector<1x192xf32>
    %31 = vector.broadcast %30 : vector<1x192xf32> to vector<64x192xf32>
    %32 = arith.addf %29, %31 : vector<64x192xf32>
    %33 = vector.shape_cast %32 : vector<64x192xf32> to vector<4x16x192xf32>
    %34 = vector.extract_strided_slice %33 {offsets = [0, 0, 0], sizes = [4, 16, 8], strides = [1, 1, 1]} : vector<4x16x192xf32> to vector<4x16x8xf32>
    %cst_18 = arith.constant 0.353553385 : f32
    %35 = vector.broadcast %cst_18 : f32 to vector<4x16x8xf32>
    %36 = arith.mulf %34, %35 : vector<4x16x8xf32>
    %37 = vector.extract_strided_slice %33 {offsets = [0, 0, 64], sizes = [4, 16, 8], strides = [1, 1, 1]} : vector<4x16x192xf32> to vector<4x16x8xf32>
    %38 = vector.extract_strided_slice %33 {offsets = [0, 0, 128], sizes = [4, 16, 8], strides = [1, 1, 1]} : vector<4x16x192xf32> to vector<4x16x8xf32>
    "tpu.trace_start"() <{level = 10 : i32, message = "rnd,rmd->rnm"}> : () -> ()
    %cst_19 = arith.constant dense<0.000000e+00> : vector<4x16x16xf32>
    %39 = tpu.matmul %36, %37, %cst_19 {dimension_numbers = #tpu.dot_dimension_numbers<[2], [2], [1], [1], [0, 0, 0, 1, 1, 1], [0], [0]>} : vector<4x16x8xf32>, vector<4x16x8xf32>, vector<4x16x16xf32> -> vector<4x16x16xf32>
    "tpu.trace_stop"() : () -> ()
    %cst_20 = arith.constant dense<0xFF800000> : vector<4x16xf32>
    %40 = vector.multi_reduction <maximumf>, %39, %cst_20 [2] : vector<4x16x16xf32> to vector<4x16xf32>
    %cst_21 = arith.constant 0xFF800000 : f32
    %41 = vector.broadcast %cst_21 : f32 to vector<4x16xf32>
    %42 = arith.maximumf %41, %40 : vector<4x16xf32>
    %43 = vector.shape_cast %42 : vector<4x16xf32> to vector<4x16x1xf32>
    %44 = vector.broadcast %43 : vector<4x16x1xf32> to vector<4x16x16xf32>
    %45 = arith.subf %39, %44 : vector<4x16x16xf32>
    %46 = math.exp %45 : vector<4x16x16xf32>
    %cst_22 = arith.constant dense<0.000000e+00> : vector<4x16xf32>
    %47 = vector.multi_reduction <add>, %46, %cst_22 [2] : vector<4x16x16xf32> to vector<4x16xf32>
    %48 = vector.shape_cast %47 : vector<4x16xf32> to vector<4x16x1xf32>
    %49 = vector.broadcast %48 : vector<4x16x1xf32> to vector<4x16x16xf32>
    %50 = arith.divf %46, %49 : vector<4x16x16xf32>
    "tpu.trace_start"() <{level = 10 : i32, message = "rnm,rmd->rnd"}> : () -> ()
    %cst_23 = arith.constant dense<0.000000e+00> : vector<4x16x8xf32>
    %51 = tpu.matmul %50, %38, %cst_23 {dimension_numbers = #tpu.dot_dimension_numbers<[2], [1], [1], [2], [0, 0, 0, 1, 1, 2], [0], [0]>} : vector<4x16x16xf32>, vector<4x16x8xf32>, vector<4x16x8xf32> -> vector<4x16x8xf32>
    "tpu.trace_stop"() : () -> ()
    %52 = vector.extract_strided_slice %33 {offsets = [0, 0, 8], sizes = [4, 16, 8], strides = [1, 1, 1]} : vector<4x16x192xf32> to vector<4x16x8xf32>
    %cst_24 = arith.constant 0.353553385 : f32
    %53 = vector.broadcast %cst_24 : f32 to vector<4x16x8xf32>
    %54 = arith.mulf %52, %53 : vector<4x16x8xf32>
    %55 = vector.extract_strided_slice %33 {offsets = [0, 0, 72], sizes = [4, 16, 8], strides = [1, 1, 1]} : vector<4x16x192xf32> to vector<4x16x8xf32>
    %56 = vector.extract_strided_slice %33 {offsets = [0, 0, 136], sizes = [4, 16, 8], strides = [1, 1, 1]} : vector<4x16x192xf32> to vector<4x16x8xf32>
    "tpu.trace_start"() <{level = 10 : i32, message = "rnd,rmd->rnm"}> : () -> ()
    %cst_25 = arith.constant dense<0.000000e+00> : vector<4x16x16xf32>
    %57 = tpu.matmul %54, %55, %cst_25 {dimension_numbers = #tpu.dot_dimension_numbers<[2], [2], [1], [1], [0, 0, 0, 1, 1, 1], [0], [0]>} : vector<4x16x8xf32>, vector<4x16x8xf32>, vector<4x16x16xf32> -> vector<4x16x16xf32>
    "tpu.trace_stop"() : () -> ()
    %cst_26 = arith.constant dense<0xFF800000> : vector<4x16xf32>
    %58 = vector.multi_reduction <maximumf>, %57, %cst_26 [2] : vector<4x16x16xf32> to vector<4x16xf32>
    %cst_27 = arith.constant 0xFF800000 : f32
    %59 = vector.broadcast %cst_27 : f32 to vector<4x16xf32>
    %60 = arith.maximumf %59, %58 : vector<4x16xf32>
    %61 = vector.shape_cast %60 : vector<4x16xf32> to vector<4x16x1xf32>
    %62 = vector.broadcast %61 : vector<4x16x1xf32> to vector<4x16x16xf32>
    %63 = arith.subf %57, %62 : vector<4x16x16xf32>
    %64 = math.exp %63 : vector<4x16x16xf32>
    %cst_28 = arith.constant dense<0.000000e+00> : vector<4x16xf32>
    %65 = vector.multi_reduction <add>, %64, %cst_28 [2] : vector<4x16x16xf32> to vector<4x16xf32>
    %66 = vector.shape_cast %65 : vector<4x16xf32> to vector<4x16x1xf32>
    %67 = vector.broadcast %66 : vector<4x16x1xf32> to vector<4x16x16xf32>
    %68 = arith.divf %64, %67 : vector<4x16x16xf32>
    "tpu.trace_start"() <{level = 10 : i32, message = "rnm,rmd->rnd"}> : () -> ()
    %cst_29 = arith.constant dense<0.000000e+00> : vector<4x16x8xf32>
    %69 = tpu.matmul %68, %56, %cst_29 {dimension_numbers = #tpu.dot_dimension_numbers<[2], [1], [1], [2], [0, 0, 0, 1, 1, 2], [0], [0]>} : vector<4x16x16xf32>, vector<4x16x8xf32>, vector<4x16x8xf32> -> vector<4x16x8xf32>
    "tpu.trace_stop"() : () -> ()
    %70 = vector.extract_strided_slice %33 {offsets = [0, 0, 16], sizes = [4, 16, 8], strides = [1, 1, 1]} : vector<4x16x192xf32> to vector<4x16x8xf32>
    %cst_30 = arith.constant 0.353553385 : f32
    %71 = vector.broadcast %cst_30 : f32 to vector<4x16x8xf32>
    %72 = arith.mulf %70, %71 : vector<4x16x8xf32>
    %73 = vector.extract_strided_slice %33 {offsets = [0, 0, 80], sizes = [4, 16, 8], strides = [1, 1, 1]} : vector<4x16x192xf32> to vector<4x16x8xf32>
    %74 = vector.extract_strided_slice %33 {offsets = [0, 0, 144], sizes = [4, 16, 8], strides = [1, 1, 1]} : vector<4x16x192xf32> to vector<4x16x8xf32>
    "tpu.trace_start"() <{level = 10 : i32, message = "rnd,rmd->rnm"}> : () -> ()
    %cst_31 = arith.constant dense<0.000000e+00> : vector<4x16x16xf32>
    %75 = tpu.matmul %72, %73, %cst_31 {dimension_numbers = #tpu.dot_dimension_numbers<[2], [2], [1], [1], [0, 0, 0, 1, 1, 1], [0], [0]>} : vector<4x16x8xf32>, vector<4x16x8xf32>, vector<4x16x16xf32> -> vector<4x16x16xf32>
    "tpu.trace_stop"() : () -> ()
    %cst_32 = arith.constant dense<0xFF800000> : vector<4x16xf32>
    %76 = vector.multi_reduction <maximumf>, %75, %cst_32 [2] : vector<4x16x16xf32> to vector<4x16xf32>
    %cst_33 = arith.constant 0xFF800000 : f32
    %77 = vector.broadcast %cst_33 : f32 to vector<4x16xf32>
    %78 = arith.maximumf %77, %76 : vector<4x16xf32>
    %79 = vector.shape_cast %78 : vector<4x16xf32> to vector<4x16x1xf32>
    %80 = vector.broadcast %79 : vector<4x16x1xf32> to vector<4x16x16xf32>
    %81 = arith.subf %75, %80 : vector<4x16x16xf32>
    %82 = math.exp %81 : vector<4x16x16xf32>
    %cst_34 = arith.constant dense<0.000000e+00> : vector<4x16xf32>
    %83 = vector.multi_reduction <add>, %82, %cst_34 [2] : vector<4x16x16xf32> to vector<4x16xf32>
    %84 = vector.shape_cast %83 : vector<4x16xf32> to vector<4x16x1xf32>
    %85 = vector.broadcast %84 : vector<4x16x1xf32> to vector<4x16x16xf32>
    %86 = arith.divf %82, %85 : vector<4x16x16xf32>
    "tpu.trace_start"() <{level = 10 : i32, message = "rnm,rmd->rnd"}> : () -> ()
    %cst_35 = arith.constant dense<0.000000e+00> : vector<4x16x8xf32>
    %87 = tpu.matmul %86, %74, %cst_35 {dimension_numbers = #tpu.dot_dimension_numbers<[2], [1], [1], [2], [0, 0, 0, 1, 1, 2], [0], [0]>} : vector<4x16x16xf32>, vector<4x16x8xf32>, vector<4x16x8xf32> -> vector<4x16x8xf32>
    "tpu.trace_stop"() : () -> ()
    %88 = vector.extract_strided_slice %33 {offsets = [0, 0, 24], sizes = [4, 16, 8], strides = [1, 1, 1]} : vector<4x16x192xf32> to vector<4x16x8xf32>
    %cst_36 = arith.constant 0.353553385 : f32
    %89 = vector.broadcast %cst_36 : f32 to vector<4x16x8xf32>
    %90 = arith.mulf %88, %89 : vector<4x16x8xf32>
    %91 = vector.extract_strided_slice %33 {offsets = [0, 0, 88], sizes = [4, 16, 8], strides = [1, 1, 1]} : vector<4x16x192xf32> to vector<4x16x8xf32>
    %92 = vector.extract_strided_slice %33 {offsets = [0, 0, 152], sizes = [4, 16, 8], strides = [1, 1, 1]} : vector<4x16x192xf32> to vector<4x16x8xf32>
    "tpu.trace_start"() <{level = 10 : i32, message = "rnd,rmd->rnm"}> : () -> ()
    %cst_37 = arith.constant dense<0.000000e+00> : vector<4x16x16xf32>
    %93 = tpu.matmul %90, %91, %cst_37 {dimension_numbers = #tpu.dot_dimension_numbers<[2], [2], [1], [1], [0, 0, 0, 1, 1, 1], [0], [0]>} : vector<4x16x8xf32>, vector<4x16x8xf32>, vector<4x16x16xf32> -> vector<4x16x16xf32>
    "tpu.trace_stop"() : () -> ()
    %cst_38 = arith.constant dense<0xFF800000> : vector<4x16xf32>
    %94 = vector.multi_reduction <maximumf>, %93, %cst_38 [2] : vector<4x16x16xf32> to vector<4x16xf32>
    %cst_39 = arith.constant 0xFF800000 : f32
    %95 = vector.broadcast %cst_39 : f32 to vector<4x16xf32>
    %96 = arith.maximumf %95, %94 : vector<4x16xf32>
    %97 = vector.shape_cast %96 : vector<4x16xf32> to vector<4x16x1xf32>
    %98 = vector.broadcast %97 : vector<4x16x1xf32> to vector<4x16x16xf32>
    %99 = arith.subf %93, %98 : vector<4x16x16xf32>
    %100 = math.exp %99 : vector<4x16x16xf32>
    %cst_40 = arith.constant dense<0.000000e+00> : vector<4x16xf32>
    %101 = vector.multi_reduction <add>, %100, %cst_40 [2] : vector<4x16x16xf32> to vector<4x16xf32>
    %102 = vector.shape_cast %101 : vector<4x16xf32> to vector<4x16x1xf32>
    %103 = vector.broadcast %102 : vector<4x16x1xf32> to vector<4x16x16xf32>
    %104 = arith.divf %100, %103 : vector<4x16x16xf32>
    "tpu.trace_start"() <{level = 10 : i32, message = "rnm,rmd->rnd"}> : () -> ()
    %cst_41 = arith.constant dense<0.000000e+00> : vector<4x16x8xf32>
    %105 = tpu.matmul %104, %92, %cst_41 {dimension_numbers = #tpu.dot_dimension_numbers<[2], [1], [1], [2], [0, 0, 0, 1, 1, 2], [0], [0]>} : vector<4x16x16xf32>, vector<4x16x8xf32>, vector<4x16x8xf32> -> vector<4x16x8xf32>
    "tpu.trace_stop"() : () -> ()
    %106 = vector.extract_strided_slice %33 {offsets = [0, 0, 32], sizes = [4, 16, 8], strides = [1, 1, 1]} : vector<4x16x192xf32> to vector<4x16x8xf32>
    %cst_42 = arith.constant 0.353553385 : f32
    %107 = vector.broadcast %cst_42 : f32 to vector<4x16x8xf32>
    %108 = arith.mulf %106, %107 : vector<4x16x8xf32>
    %109 = vector.extract_strided_slice %33 {offsets = [0, 0, 96], sizes = [4, 16, 8], strides = [1, 1, 1]} : vector<4x16x192xf32> to vector<4x16x8xf32>
    %110 = vector.extract_strided_slice %33 {offsets = [0, 0, 160], sizes = [4, 16, 8], strides = [1, 1, 1]} : vector<4x16x192xf32> to vector<4x16x8xf32>
    "tpu.trace_start"() <{level = 10 : i32, message = "rnd,rmd->rnm"}> : () -> ()
    %cst_43 = arith.constant dense<0.000000e+00> : vector<4x16x16xf32>
    %111 = tpu.matmul %108, %109, %cst_43 {dimension_numbers = #tpu.dot_dimension_numbers<[2], [2], [1], [1], [0, 0, 0, 1, 1, 1], [0], [0]>} : vector<4x16x8xf32>, vector<4x16x8xf32>, vector<4x16x16xf32> -> vector<4x16x16xf32>
    "tpu.trace_stop"() : () -> ()
    %cst_44 = arith.constant dense<0xFF800000> : vector<4x16xf32>
    %112 = vector.multi_reduction <maximumf>, %111, %cst_44 [2] : vector<4x16x16xf32> to vector<4x16xf32>
    %cst_45 = arith.constant 0xFF800000 : f32
    %113 = vector.broadcast %cst_45 : f32 to vector<4x16xf32>
    %114 = arith.maximumf %113, %112 : vector<4x16xf32>
    %115 = vector.shape_cast %114 : vector<4x16xf32> to vector<4x16x1xf32>
    %116 = vector.broadcast %115 : vector<4x16x1xf32> to vector<4x16x16xf32>
    %117 = arith.subf %111, %116 : vector<4x16x16xf32>
    %118 = math.exp %117 : vector<4x16x16xf32>
    %cst_46 = arith.constant dense<0.000000e+00> : vector<4x16xf32>
    %119 = vector.multi_reduction <add>, %118, %cst_46 [2] : vector<4x16x16xf32> to vector<4x16xf32>
    %120 = vector.shape_cast %119 : vector<4x16xf32> to vector<4x16x1xf32>
    %121 = vector.broadcast %120 : vector<4x16x1xf32> to vector<4x16x16xf32>
    %122 = arith.divf %118, %121 : vector<4x16x16xf32>
    "tpu.trace_start"() <{level = 10 : i32, message = "rnm,rmd->rnd"}> : () -> ()
    %cst_47 = arith.constant dense<0.000000e+00> : vector<4x16x8xf32>
    %123 = tpu.matmul %122, %110, %cst_47 {dimension_numbers = #tpu.dot_dimension_numbers<[2], [1], [1], [2], [0, 0, 0, 1, 1, 2], [0], [0]>} : vector<4x16x16xf32>, vector<4x16x8xf32>, vector<4x16x8xf32> -> vector<4x16x8xf32>
    "tpu.trace_stop"() : () -> ()
    %124 = vector.extract_strided_slice %33 {offsets = [0, 0, 40], sizes = [4, 16, 8], strides = [1, 1, 1]} : vector<4x16x192xf32> to vector<4x16x8xf32>
    %cst_48 = arith.constant 0.353553385 : f32
    %125 = vector.broadcast %cst_48 : f32 to vector<4x16x8xf32>
    %126 = arith.mulf %124, %125 : vector<4x16x8xf32>
    %127 = vector.extract_strided_slice %33 {offsets = [0, 0, 104], sizes = [4, 16, 8], strides = [1, 1, 1]} : vector<4x16x192xf32> to vector<4x16x8xf32>
    %128 = vector.extract_strided_slice %33 {offsets = [0, 0, 168], sizes = [4, 16, 8], strides = [1, 1, 1]} : vector<4x16x192xf32> to vector<4x16x8xf32>
    "tpu.trace_start"() <{level = 10 : i32, message = "rnd,rmd->rnm"}> : () -> ()
    %cst_49 = arith.constant dense<0.000000e+00> : vector<4x16x16xf32>
    %129 = tpu.matmul %126, %127, %cst_49 {dimension_numbers = #tpu.dot_dimension_numbers<[2], [2], [1], [1], [0, 0, 0, 1, 1, 1], [0], [0]>} : vector<4x16x8xf32>, vector<4x16x8xf32>, vector<4x16x16xf32> -> vector<4x16x16xf32>
    "tpu.trace_stop"() : () -> ()
    %cst_50 = arith.constant dense<0xFF800000> : vector<4x16xf32>
    %130 = vector.multi_reduction <maximumf>, %129, %cst_50 [2] : vector<4x16x16xf32> to vector<4x16xf32>
    %cst_51 = arith.constant 0xFF800000 : f32
    %131 = vector.broadcast %cst_51 : f32 to vector<4x16xf32>
    %132 = arith.maximumf %131, %130 : vector<4x16xf32>
    %133 = vector.shape_cast %132 : vector<4x16xf32> to vector<4x16x1xf32>
    %134 = vector.broadcast %133 : vector<4x16x1xf32> to vector<4x16x16xf32>
    %135 = arith.subf %129, %134 : vector<4x16x16xf32>
    %136 = math.exp %135 : vector<4x16x16xf32>
    %cst_52 = arith.constant dense<0.000000e+00> : vector<4x16xf32>
    %137 = vector.multi_reduction <add>, %136, %cst_52 [2] : vector<4x16x16xf32> to vector<4x16xf32>
    %138 = vector.shape_cast %137 : vector<4x16xf32> to vector<4x16x1xf32>
    %139 = vector.broadcast %138 : vector<4x16x1xf32> to vector<4x16x16xf32>
    %140 = arith.divf %136, %139 : vector<4x16x16xf32>
    "tpu.trace_start"() <{level = 10 : i32, message = "rnm,rmd->rnd"}> : () -> ()
    %cst_53 = arith.constant dense<0.000000e+00> : vector<4x16x8xf32>
    %141 = tpu.matmul %140, %128, %cst_53 {dimension_numbers = #tpu.dot_dimension_numbers<[2], [1], [1], [2], [0, 0, 0, 1, 1, 2], [0], [0]>} : vector<4x16x16xf32>, vector<4x16x8xf32>, vector<4x16x8xf32> -> vector<4x16x8xf32>
    "tpu.trace_stop"() : () -> ()
    %142 = vector.extract_strided_slice %33 {offsets = [0, 0, 48], sizes = [4, 16, 8], strides = [1, 1, 1]} : vector<4x16x192xf32> to vector<4x16x8xf32>
    %cst_54 = arith.constant 0.353553385 : f32
    %143 = vector.broadcast %cst_54 : f32 to vector<4x16x8xf32>
    %144 = arith.mulf %142, %143 : vector<4x16x8xf32>
    %145 = vector.extract_strided_slice %33 {offsets = [0, 0, 112], sizes = [4, 16, 8], strides = [1, 1, 1]} : vector<4x16x192xf32> to vector<4x16x8xf32>
    %146 = vector.extract_strided_slice %33 {offsets = [0, 0, 176], sizes = [4, 16, 8], strides = [1, 1, 1]} : vector<4x16x192xf32> to vector<4x16x8xf32>
    "tpu.trace_start"() <{level = 10 : i32, message = "rnd,rmd->rnm"}> : () -> ()
    %cst_55 = arith.constant dense<0.000000e+00> : vector<4x16x16xf32>
    %147 = tpu.matmul %144, %145, %cst_55 {dimension_numbers = #tpu.dot_dimension_numbers<[2], [2], [1], [1], [0, 0, 0, 1, 1, 1], [0], [0]>} : vector<4x16x8xf32>, vector<4x16x8xf32>, vector<4x16x16xf32> -> vector<4x16x16xf32>
    "tpu.trace_stop"() : () -> ()
    %cst_56 = arith.constant dense<0xFF800000> : vector<4x16xf32>
    %148 = vector.multi_reduction <maximumf>, %147, %cst_56 [2] : vector<4x16x16xf32> to vector<4x16xf32>
    %cst_57 = arith.constant 0xFF800000 : f32
    %149 = vector.broadcast %cst_57 : f32 to vector<4x16xf32>
    %150 = arith.maximumf %149, %148 : vector<4x16xf32>
    %151 = vector.shape_cast %150 : vector<4x16xf32> to vector<4x16x1xf32>
    %152 = vector.broadcast %151 : vector<4x16x1xf32> to vector<4x16x16xf32>
    %153 = arith.subf %147, %152 : vector<4x16x16xf32>
    %154 = math.exp %153 : vector<4x16x16xf32>
    %cst_58 = arith.constant dense<0.000000e+00> : vector<4x16xf32>
    %155 = vector.multi_reduction <add>, %154, %cst_58 [2] : vector<4x16x16xf32> to vector<4x16xf32>
    %156 = vector.shape_cast %155 : vector<4x16xf32> to vector<4x16x1xf32>
    %157 = vector.broadcast %156 : vector<4x16x1xf32> to vector<4x16x16xf32>
    %158 = arith.divf %154, %157 : vector<4x16x16xf32>
    "tpu.trace_start"() <{level = 10 : i32, message = "rnm,rmd->rnd"}> : () -> ()
    %cst_59 = arith.constant dense<0.000000e+00> : vector<4x16x8xf32>
    %159 = tpu.matmul %158, %146, %cst_59 {dimension_numbers = #tpu.dot_dimension_numbers<[2], [1], [1], [2], [0, 0, 0, 1, 1, 2], [0], [0]>} : vector<4x16x16xf32>, vector<4x16x8xf32>, vector<4x16x8xf32> -> vector<4x16x8xf32>
    "tpu.trace_stop"() : () -> ()
    %160 = vector.extract_strided_slice %33 {offsets = [0, 0, 56], sizes = [4, 16, 8], strides = [1, 1, 1]} : vector<4x16x192xf32> to vector<4x16x8xf32>
    %cst_60 = arith.constant 0.353553385 : f32
    %161 = vector.broadcast %cst_60 : f32 to vector<4x16x8xf32>
    %162 = arith.mulf %160, %161 : vector<4x16x8xf32>
    %163 = vector.extract_strided_slice %33 {offsets = [0, 0, 120], sizes = [4, 16, 8], strides = [1, 1, 1]} : vector<4x16x192xf32> to vector<4x16x8xf32>
    %164 = vector.extract_strided_slice %33 {offsets = [0, 0, 184], sizes = [4, 16, 8], strides = [1, 1, 1]} : vector<4x16x192xf32> to vector<4x16x8xf32>
    "tpu.trace_start"() <{level = 10 : i32, message = "rnd,rmd->rnm"}> : () -> ()
    %cst_61 = arith.constant dense<0.000000e+00> : vector<4x16x16xf32>
    %165 = tpu.matmul %162, %163, %cst_61 {dimension_numbers = #tpu.dot_dimension_numbers<[2], [2], [1], [1], [0, 0, 0, 1, 1, 1], [0], [0]>} : vector<4x16x8xf32>, vector<4x16x8xf32>, vector<4x16x16xf32> -> vector<4x16x16xf32>
    "tpu.trace_stop"() : () -> ()
    %cst_62 = arith.constant dense<0xFF800000> : vector<4x16xf32>
    %166 = vector.multi_reduction <maximumf>, %165, %cst_62 [2] : vector<4x16x16xf32> to vector<4x16xf32>
    %cst_63 = arith.constant 0xFF800000 : f32
    %167 = vector.broadcast %cst_63 : f32 to vector<4x16xf32>
    %168 = arith.maximumf %167, %166 : vector<4x16xf32>
    %169 = vector.shape_cast %168 : vector<4x16xf32> to vector<4x16x1xf32>
    %170 = vector.broadcast %169 : vector<4x16x1xf32> to vector<4x16x16xf32>
    %171 = arith.subf %165, %170 : vector<4x16x16xf32>
    %172 = math.exp %171 : vector<4x16x16xf32>
    %cst_64 = arith.constant dense<0.000000e+00> : vector<4x16xf32>
    %173 = vector.multi_reduction <add>, %172, %cst_64 [2] : vector<4x16x16xf32> to vector<4x16xf32>
    %174 = vector.shape_cast %173 : vector<4x16xf32> to vector<4x16x1xf32>
    %175 = vector.broadcast %174 : vector<4x16x1xf32> to vector<4x16x16xf32>
    %176 = arith.divf %172, %175 : vector<4x16x16xf32>
    "tpu.trace_start"() <{level = 10 : i32, message = "rnm,rmd->rnd"}> : () -> ()
    %cst_65 = arith.constant dense<0.000000e+00> : vector<4x16x8xf32>
    %177 = tpu.matmul %176, %164, %cst_65 {dimension_numbers = #tpu.dot_dimension_numbers<[2], [1], [1], [2], [0, 0, 0, 1, 1, 2], [0], [0]>} : vector<4x16x16xf32>, vector<4x16x8xf32>, vector<4x16x8xf32> -> vector<4x16x8xf32>
    "tpu.trace_stop"() : () -> ()
    %178 = tpu.concatenate %51, %69, %87, %105, %123, %141, %159, %177 in 2 : vector<4x16x8xf32>, vector<4x16x8xf32>, vector<4x16x8xf32>, vector<4x16x8xf32>, vector<4x16x8xf32>, vector<4x16x8xf32>, vector<4x16x8xf32>, vector<4x16x8xf32> -> vector<4x16x64xf32>
    %179 = vector.shape_cast %178 : vector<4x16x64xf32> to vector<64x64xf32>
    %c0_66 = arith.constant 0 : index
    %c0_67 = arith.constant 0 : index
    %180 = vector.load %arg7[%c0_66, %c0_67] : memref<64x64xf32, #tpu.memory_space<vmem>>, vector<64x64xf32>
    %cst_68 = arith.constant dense<0.000000e+00> : vector<64x64xf32>
    %181 = tpu.matmul %179, %180, %cst_68 {dimension_numbers = #tpu.dot_dimension_numbers<[1], [0], [0], [1], [0, 0, 1, 1], [], []>} : vector<64x64xf32>, vector<64x64xf32>, vector<64x64xf32> -> vector<64x64xf32>
    %c0_69 = arith.constant 0 : index
    %c0_70 = arith.constant 0 : index
    %182 = vector.load %arg8[%c0_69, %c0_70] : memref<1x64xf32, #tpu.memory_space<vmem>>, vector<1x64xf32>
    %183 = vector.broadcast %182 : vector<1x64xf32> to vector<64x64xf32>
    %184 = arith.addf %181, %183 : vector<64x64xf32>
    %185 = arith.addf %1, %184 : vector<64x64xf32>
    %186 = vector.shape_cast %185 : vector<64x64xf32> to vector<4x16x64xf32>
    %c0_71 = arith.constant 0 : index
    %c0_72 = arith.constant 0 : index
    %c0_73 = arith.constant 0 : index
    %187 = vector.load %arg9[%c0_71, %c0_72, %c0_73] : memref<4x16x64xf32, #tpu.memory_space<vmem>>, vector<4x16x64xf32>
    tpu.vector_store %arg9[%c0_71, %c0_72, %c0_73], %186 {strides = array<i32>} : memref<4x16x64xf32, #tpu.memory_space<vmem>>, vector<4x16x64xf32>,
    return
  }
  func.func @transform_0(%arg0: i32) -> (i32, i32, i32) {
    %c0_i32 = arith.constant 0 : i32
    %c0_i32_0 = arith.constant 0 : i32
    %c0_i32_1 = arith.constant 0 : i32
    return %arg0, %c0_i32, %c0_i32_0 : i32, i32, i32
  }
  func.func @transform_1(%arg0: i32) -> (i32, i32, i32) {
    %c0_i32 = arith.constant 0 : i32
    %c0_i32_0 = arith.constant 0 : i32
    %c0_i32_1 = arith.constant 0 : i32
    return %arg0, %c0_i32, %c0_i32_0 : i32, i32, i32
  }
  func.func @transform_2(%arg0: i32) -> (i32, i32) {
    %c0_i32 = arith.constant 0 : i32
    %c0_i32_0 = arith.constant 0 : i32
    %c0_i32_1 = arith.constant 0 : i32
    return %c0_i32, %c0_i32_0 : i32, i32
  }
  func.func @transform_3(%arg0: i32) -> (i32, i32) {
    %c0_i32 = arith.constant 0 : i32
    %c0_i32_0 = arith.constant 0 : i32
    %c0_i32_1 = arith.constant 0 : i32
    return %c0_i32, %c0_i32_0 : i32, i32
  }
  func.func @transform_4(%arg0: i32) -> (i32, i32) {
    %c0_i32 = arith.constant 0 : i32
    %c0_i32_0 = arith.constant 0 : i32
    %c0_i32_1 = arith.constant 0 : i32
    return %c0_i32, %c0_i32_0 : i32, i32
  }
  func.func @transform_5(%arg0: i32) -> (i32, i32) {
    %c0_i32 = arith.constant 0 : i32
    %c0_i32_0 = arith.constant 0 : i32
    %c0_i32_1 = arith.constant 0 : i32
    return %c0_i32, %c0_i32_0 : i32, i32
  }
  func.func @transform_6(%arg0: i32) -> (i32, i32) {
    %c0_i32 = arith.constant 0 : i32
    %c0_i32_0 = arith.constant 0 : i32
    %c0_i32_1 = arith.constant 0 : i32
    return %c0_i32, %c0_i32_0 : i32, i32
  }
  func.func @transform_7(%arg0: i32) -> (i32, i32) {
    %c0_i32 = arith.constant 0 : i32
    %c0_i32_0 = arith.constant 0 : i32
    %c0_i32_1 = arith.constant 0 : i32
    return %c0_i32, %c0_i32_0 : i32, i32
  }
  func.func @transform_8(%arg0: i32) -> (i32, i32, i32) {
    %c0_i32 = arith.constant 0 : i32
    %c0_i32_0 = arith.constant 0 : i32
    %c0_i32_1 = arith.constant 0 : i32
    return %arg0, %c0_i32, %c0_i32_0 : i32, i32, i32
  }
}

</mosaic_0001>

<bundles_post_ra>
// kernel: tpu_custom_call.1
= control target key start
LH: loop header
LB: loop body
LE: loop exit
PB: predicated region body
PF: predicated region fallthrough
CT: control target
= control target key end

     0   :  { %13 = vsyncpa [#allocation3], 0  ;;  %s11528_s0 = inlined_call_operand.vmem [shape: f32[8,16,64], index: 0, kind: input, shape index: {}]   ;;  %s11529_s1 = inlined_call_operand.vmem [shape: f32[8,16,1], index: 1, kind: input, shape index: {}]   ;;  %s11530_s2 = inlined_call_operand.vmem [shape: f32[1,64], index: 2, kind: input, shape index: {}]   ;;  %s11531_s3 = inlined_call_operand.vmem [shape: f32[1,64], index: 3, kind: input, shape index: {}]   ;;  %s11532_s4 = inlined_call_operand.hbm [shape: f32[64,192], index: 4, kind: input, shape index: {}]   ;;  %s11533_s5 = inlined_call_operand.vmem [shape: f32[1,192], index: 5, kind: input, shape index: {}]   ;;  %s11534_s6 = inlined_call_operand.hbm [shape: f32[64,64], index: 6, kind: input, shape index: {}]   ;;  %s11535_s7 = inlined_call_operand.vmem [shape: f32[1,64], index: 7, kind: input, shape index: {}]   ;;  %s11536_s8 = inlined_call_operand.hbm [shape: f32[8,16,64], index: 8, kind: output, shape index: {}]  }
   0x1   :  { %14 = vsyncpa [#allocation6], 0 }
   0x2   :  { %15 = vsyncpa [#allocation4], 0 }
   0x3   :  { %17 = vsyncpa [#allocation4 + $0x1], 0  ;;  %s9878_s27 = smov 0   ;;  %s9880_s28 = smov 0  }
   0x4   :  { %s9882_s29 = smov 0   ;;  %s9884_s30 = smov 0  }
   0x5 LB: > { %11541 = sst [smem:[#allocation11_spill]] %s9802_s29  ;;  %s9899_s9 = sadd.s32 4294967295, %s9806_s30   ;;  %s9806_s30 = sphi %s9884_s30, %s11606_s30   ;;  %s9802_s29 = sphi %s9882_s29, %s11603_s29   ;;  %s9798_s28 = sphi %s9880_s28, %s11605_s28   ;;  %s9794_s27 = sphi %s9878_s27, %s11604_s27  }
   0x6   : > { %s7680_s10 = sadd.s32 4294967294, %s9806_s30   ;;  %s9903_s11 = sadd.s32 1, %s9806_s30  }
   0x7   : > { %s208_s12 = sadd.s32 1, %s9802_s29  ;;  %s205_s13 = ssub.s32 %s9806_s30, %s9903_s11 }
   0x8   : > { %p218_p0 = scmp.ne.s32.totalorder %s9802_s29, %s9798_s28  ;;  %p206_p1 = scmp.eq.s32.totalorder %s205_s13, 0 }
   0x9   : > { %p219_p2 = scmp.eq.s32.totalorder %s9899_s9, 1  ;;  %p224_p3 = scmp.ne.s32.totalorder %s9798_s28, %s9794_s27 }
   0xa   : > { %p225_p4 = scmp.eq.s32.totalorder %s7680_s10, 1  ;;  %p7681_p7 = scmp.ge.s32.totalorder %s9806_s30, 1 }
   0xb   : > { %s9914_s14 = scalar_select %p206_p1, %s9802_s29, %s208_s12  }
   0xc   : > { %p9916_p5 = por %p219_p2, %p218_p0  ;;  %p9920_p6 = por %p225_p4, %p224_p3 }
   0xd   : > { %11542 = sst [smem:[#allocation12_spill]] %s9914_s14  ;;  %p232_p8 = scmp.lt.s32.totalorder %s9806_s30, 3 }
   0xe   : > { %s11543_s15 = scalar_select %p9916_p5, 1, 0 }
   0xf   : > { %s11544_s16 = scalar_select %p9920_p6, 1, 0 }
  0x10   : > { %p11537_p9 = scmp.eq.s32.totalorder %s9899_s9, 0  ;;  %p9927_p10 = pnand %p7681_p7, %p232_p8 }
  0x11   : > { %s9808_s18 = smov [#allocation2]   ;;  %s9809_s21 = smov [#allocation5]  }
  0x12   : > { %s11545_s17 = scalar_select %p9927_p10, 1, 0 }
  0x13   : > { %s250_s19 = sshll.u32 %s9808_s18, 4  ;;  %p9026_p11 = pneg %p9927_p10  ;;  %s251_s19 = int_to_ptr.vmem [resolvable:$true] %s250_s19 }
  0x14   : > { %s266_s22 = sshll.u32 %s9809_s21, 4  ;;  %s9680_s25 = scalar_lea.hbm %s11532_s4, 2048  ;;  %s9939_s22 = int_to_ptr.vmem [resolvable:$true] %s266_s22 }
  0x15   : > { %p9935_p12 = pnand %p11537_p9, %p9026_p11  ;;  %p9681_p13 = scmp.ne.s32.totalorder %s11532_s4, %s9680_s25 }
  0x16   : > { %p9687_p3 = scmp.lt.u32.totalorder %s9680_s25, %s11532_s4 }
  0x17   : > { %p9682_p0 = pneg %p9935_p12 }
  0x19   : > { %p9683_p1 = pnand %p9682_p0, %p9681_p13 }
  0x1b   : > { %p9684_p2 = pneg %p9683_p1 }
  0x1d   : > { %p9689_p4 = pnand %p9687_p3, %p9684_p2 }
  0x1f   : > { %9692 = shalt.err (!%p9689_p4)
}
  0x20   : > { %s9693_s18 = scalar_lea.vmem %s251_s19, 2048  ;;  %p9701_p9 = scmp.lt.s32.totalorder %s251_s19, %s251_s19 }
  0x21   : > { %p9694_p7 = scmp.ne.s32.totalorder %s251_s19, %s9693_s18  ;;  %p9702_p6 = scmp.lt.s32.totalorder %s9693_s18, %s9693_s18 }
  0x23   : > { %p9696_p8 = pnand %p9694_p7, %p9682_p0  ;;  %p9703_p5 = por %p9702_p6, %p9701_p9 }
  0x25   : > { %p9697_p11 = pneg %p9696_p8 }
  0x27   : > { %p9704_p10 = pnand %p9703_p5, %p9697_p11 }
  0x29   : > { %9707 = shalt.err (!%p9704_p10)
}
  0x2a   : > { %s9810_s21 = smov 256   ;;  %s9811_s23 = smov 16  }
  0x2b   : > { %9029 = dma.hbm_to_vmem [thread:$0]  (!%p9935_p12), %s11532_s4, 2048, %s251_s19, [#allocation3], %s9810_s21, %s9810_s21, %s9811_s23  }
  0x2c   : > { %s9708_s12 = scalar_lea.hbm %s11534_s6, 1024 }
  0x2d   : > { %p9709_p13 = scmp.ne.s32.totalorder %s11534_s6, %s9708_s12  ;;  %p9715_p9 = scmp.lt.u32.totalorder %s9708_s12, %s11534_s6 }
  0x2f   : > { %p9711_p5 = pnand %p9709_p13, %p9682_p0 }
  0x31   : > { %p9712_p6 = pneg %p9711_p5 }
  0x33   : > { %p9717_p10 = pnand %p9715_p9, %p9712_p6 }
  0x35   : > { %9720 = shalt.err (!%p9717_p10)
}
  0x36   : > { %s9721_s19 = scalar_lea.vmem %s9939_s22, 1024  ;;  %p9729_p4 = scmp.lt.s32.totalorder %s9939_s22, %s9939_s22 }
  0x37   : > { %p9722_p1 = scmp.ne.s32.totalorder %s9939_s22, %s9721_s19  ;;  %p9730_p7 = scmp.lt.s32.totalorder %s9721_s19, %s9721_s19 }
  0x39   : > { %p9724_p2 = pnand %p9722_p1, %p9682_p0  ;;  %p9731_p8 = por %p9730_p7, %p9729_p4 }
  0x3b   : > { %p9725_p3 = pneg %p9724_p2 }
  0x3d   : > { %p9732_p11 = pnand %p9731_p8, %p9725_p3 }
  0x3f   : > { %9735 = shalt.err (!%p9732_p11)
}
  0x40   : > { %s9812_s29 = smov 128   ;;  %s9813_s14 = smov 8  }
  0x41   : > { %9032 = dma.hbm_to_vmem [thread:$0]  (!%p9935_p12), %s11534_s6, 1024, %s9939_s22, [#allocation6], %s9812_s29, %s9812_s29, %s9813_s14  }
  0x42   : > { %p11547_p13 = scmp.ne.s32.totalorder %s11545_s17, 0 }
  0x44   : > { %305 = sbr.rel (%p11547_p13) target bundleno = 6033 (0x1791), region = 52 }
  0x4b   : > { %p11548_p0 = scmp.eq.s32.totalorder %s9899_s9, 0 }
  0x4d   : > { %9781 = dma.done.wait (%p11548_p0), [#allocation3], 2048   ;;  %p11549_p5 = pmov %p11548_p0 }
  0x4e   : > { %p11550_p6 = pmov %p11548_p0 }
  0x4f   : > { %9783 = vsyncadd (%p11549_p5), [#allocation3], 4294965248 }
  0x50   : > { %9785 = dma.done.wait (%p11550_p6), [#allocation6], 1024   ;;  %p11551_p9 = pmov %p11548_p0 }
  0x51   : > { %s7689_s20 = sshll.u32 %s9899_s9, 2  ;;  %vm381_vm0 = vcmask 523264   ;;  %v9814_v16 = vmov 0   ;;  %v566_v52 = vld [vmem:[#allocation2 + $0x8] sm:$0xff]  ;;  %v568_v53 = vld [vmem:[#allocation2 + $0x18] sm:$0xff]  ;;  %v565_v55 = vld [vmem:[#allocation2] sm:$0xff] }
  0x52   : > { %9787 = vsyncadd (%p11551_p9), [#allocation6], 4294966272  ;;  %p351_p10 = scmp.lt.s32.totalorder %s7689_s20, 7  ;;  %9099 = vset.pattern.permute.xlu1 %v9814_v16  ;;  %9098 = vset.pattern.permute.xlu0 %v9814_v16  ;;  %v8664_v54 = vpack.c.bf16 %v568_v53, %v566_v52  ;;  %v567_v56 = vld [vmem:[#allocation2 + $0x10] sm:$0xff]  ;;  %v570_v58 = vld [vmem:[#allocation2 + $0x28] sm:$0xff]  ;;  %vm744_vm1 = vcmask 64512  }
  0x53   : > { %v8666_v57 = vpack.c.bf16 %v567_v56, %v565_v55  ;;  %v572_v59 = vld [vmem:[#allocation2 + $0x38] sm:$0xff]  ;;  %v569_v61 = vld [vmem:[#allocation2 + $0x20] sm:$0xff]  ;;  %v571_v62 = vld [vmem:[#allocation2 + $0x30] sm:$0xff]  ;;  %s9816_s23 = smov 64   ;;  %vm1103_vm3 = vcmask 130048   ;;  %s9819_s22 = smov 48  }
  0x54   : > { %s11608_s20 = smov (!%p351_p10, %s7689_s20), 7  ;;  %8665 = vmatprep.subr.bf16.mxu0 %v8664_v54  ;;  %v8668_v60 = vpack.c.bf16 %v572_v59, %v570_v58  ;;  %v8670_v63 = vpack.c.bf16 %v571_v62, %v569_v61  ;;  %v10088_v54 = vld [vmem:[%s11530_s2] ss:$0 sm:$0xff]  ;;  %vm10177_vm2 = vmpackc.low %vm744_vm1, %vm744_vm1  ;;  %s9820_s24 = smov 112   ;;  %vm7364_vm4 = vcmask 195584   ;;  %vm7373_vm5 = vcmask 261120  }
  0x55   : > { %s7912_s17 = sshll.u32 %s11608_s20, 4  ;;  %8667 = vmatpush1.bf16.msra.mxu0 %v8666_v57  ;;  %v10094_v57 = vld [vmem:[%s11531_s3] ss:$0 sm:$0xff]  ;;  %s9817_s20 = smov 56   ;;  %vm7382_vm6 = vcmask 326656   ;;  %vm7391_vm7 = vcmask 392192  }
  0x56   : > { %s10007_s25 = scalar_lea.vmem %s11528_s0, %s7912_s17  ;;  %s10068_s12 = scalar_lea.vmem %s11529_s1, %s7912_s17  ;;  %8669 = vmatprep.subr.bf16.mxu0 %v8668_v60  ;;  %vm7400_vm8 = vcmask 457728  }
  0x57   : > { %v365_v0 = vld [vmem:[%s10007_s25] sm:$0xff]  ;;  %v367_v1 = vld [vmem:[%s10007_s25 + $0x10] sm:$0xff]  ;;  %v366_v2 = vld [vmem:[%s10007_s25 + $0x8] sm:$0xff]  ;;  %s9818_s17 = smov 120   ;;  %s9821_s26 = smov 40  }
  0x58   : > { %v382_v3 = vsel %vm381_vm0, %v365_v0, 0.0  ;;  %v388_v4 = vsel %vm381_vm0, %v367_v1, 0.0  ;;  %v368_v5 = vld [vmem:[%s10007_s25 + $0x18] sm:$0xff]  ;;  %v385_v6 = vsel %vm381_vm0, %v366_v2, 0.0  ;;  %v369_v8 = vld [vmem:[%s10007_s25 + $0x20] sm:$0xff]  ;;  %v370_v9 = vld [vmem:[%s10007_s25 + $0x28] sm:$0xff] }
  0x59   : > { %383 = vadd.xlane.f32.xlu0 %v382_v3  ;;  %389 = vadd.xlane.f32.xlu1 %v388_v4  ;;  %v391_v7 = vsel %vm381_vm0, %v368_v5, 0.0  ;;  %v394_v10 = vsel %vm381_vm0, %v369_v8, 0.0  ;;  %v397_v11 = vsel %vm381_vm0, %v370_v9, 0.0  ;;  %v371_v12 = vld [vmem:[%s10007_s25 + $0x30] sm:$0xff]  ;;  %v10023_v13 = vld [vmem:[%s10007_s25 + $0x38] sm:$0xff]  ;;  %v573_v4 = vld [vmem:[#allocation2 + $0x40] sm:$0xff] }
  0x5a   : > { %v400_v14 = vsel %vm381_vm0, %v371_v12, 0.0  ;;  %v403_v15 = vsel %vm381_vm0, %v10023_v13, 0.0  ;;  %8671 = vmatpush1.bf16.msra.mxu0 %v8670_v63  ;;  %v376_v16 = vld [vmem:[%s10068_s12 + $0x18] sm:$0xff]  ;;  %s9822_s10 = smov 104   ;;  %s9824_s13 = smov 96  }
  0x5b   : > { %s9825_s18 = smov 24   ;;  %s9826_s19 = smov 88  }
  0x5c   : > { %s9827_s29 = smov 16   ;;  %s9828_s14 = smov 80  }
  0x5d   : > { %386 = vadd.xlane.f32.xlu0 %v385_v6  ;;  %392 = vadd.xlane.f32.xlu1 %v391_v7  ;;  %v375_v7 = vld [vmem:[%s10068_s12 + $0x10] sm:$0xff]  ;;  %s9829_s21 = smov 8   ;;  %p11600_p1 = scmp.ne.s32.totalorder %s11543_s15, 0 }
  0x61   : > { %395 = vadd.xlane.f32.xlu0 %v394_v10  ;;  %398 = vadd.xlane.f32.xlu1 %v397_v11  ;;  %v580_v10 = vld [vmem:[#allocation2 + $0x78] sm:$0xff] }
  0x65   : > { %401 = vadd.xlane.f32.xlu0 %v400_v14  ;;  %404 = vadd.xlane.f32.xlu1 %v403_v15  ;;  %v579_v14 = vld [vmem:[#allocation2 + $0x70] sm:$0xff] }
  0xe6   : > { %v384_v17 = vpop.xlane.xlu0 %383  ;;  %v390_v18 = vpop.xlane.xlu1 %389 }
  0xe7   : > { %v407_v19 = vmul.f32 0.015625, %v384_v17  ;;  %v409_v20 = vmul.f32 0.015625, %v390_v18  ;;  %v9815_v17 = vmov 0.0   ;;  %v377_v18 = vld [vmem:[%s10068_s12 + $0x20] sm:$0xff] }
  0xe8   : > { %681 = vmatprep.mubr.f32.mxu0 %v9815_v17 }
  0xe9   : > { %v10028_v21 = vsub.f32 %v365_v0, %v407_v19  ;;  %v10030_v22 = vsub.f32 %v367_v1, %v409_v20  ;;  %v374_v0 = vld [vmem:[%s10068_s12 + $0x8] sm:$0xff]  ;;  %v379_v20 = vld [vmem:[%s10068_s12 + $0x30] sm:$0xff] }
  0xea   : > { %v387_v23 = vpop.xlane.xlu0 %386  ;;  %v393_v24 = vpop.xlane.xlu1 %392  ;;  %v574_v1 = vld [vmem:[#allocation2 + $0x48] sm:$0xff] }
  0xeb   : > { %v408_v25 = vmul.f32 0.015625, %v387_v23  ;;  %v410_v26 = vmul.f32 0.015625, %v393_v24  ;;  %v423_v27 = vmul.f32 %v10028_v21, %v10028_v21  ;;  %v425_v28 = vmul.f32 %v10030_v22, %v10030_v22  ;;  %v378_v19 = vld [vmem:[%s10068_s12 + $0x28] sm:$0xff] }
  0xed   : > { %v10036_v29 = vsub.f32 %v366_v2, %v408_v25  ;;  %v10038_v30 = vsub.f32 %v368_v5, %v410_v26  ;;  %v431_v31 = vsel %vm381_vm0, %v423_v27, 0.0  ;;  %v437_v34 = vsel %vm381_vm0, %v425_v28, 0.0  ;;  %v576_v2 = vld [vmem:[#allocation2 + $0x58] sm:$0xff]  ;;  %v575_v5 = vld [vmem:[#allocation2 + $0x50] sm:$0xff] }
  0xee   : > { %432 = vadd.xlane.f32.xlu0 %v431_v31  ;;  %v396_v32 = vpop.xlane.xlu0 %395  ;;  %v399_v33 = vpop.xlane.xlu1 %398  ;;  %v8672_v3 = vpack.c.bf16 %v576_v2, %v574_v1  ;;  %v8674_v6 = vpack.c.bf16 %v575_v5, %v573_v4  ;;  %v380_v28 = vld [vmem:[%s10068_s12 + $0x38] sm:$0xff] }
  0xef   : > { %v411_v35 = vmul.f32 0.015625, %v396_v32  ;;  %v412_v36 = vmul.f32 0.015625, %v399_v33  ;;  %v424_v37 = vmul.f32 %v10036_v29, %v10036_v29  ;;  %v426_v38 = vmul.f32 %v10038_v30, %v10038_v30 }
  0xf0   : > { %8673 = vmatprep.subr.bf16.mxu0 %v8672_v3 }
  0xf1   : > { %v10046_v39 = vsub.f32 %v369_v8, %v411_v35  ;;  %v10048_v40 = vsub.f32 %v370_v9, %v412_v36  ;;  %v434_v41 = vsel %vm381_vm0, %v424_v37, 0.0  ;;  %v440_v44 = vsel %vm381_vm0, %v426_v38, 0.0  ;;  %v373_v8 = vld [vmem:[%s10068_s12] sm:$0xff]  ;;  %8675 = vmatpush1.bf16.msra.mxu0 %v8674_v6  ;;  %v578_v9 = vld [vmem:[#allocation2 + $0x68] sm:$0xff]  ;;  %s9823_s12 = smov 32  }
  0xf2   : > { %438 = vadd.xlane.f32.xlu0 %v437_v34  ;;  %435 = vadd.xlane.f32.xlu1 %v434_v41  ;;  %v402_v42 = vpop.xlane.xlu0 %401  ;;  %v8676_v11 = vpack.c.bf16 %v580_v10, %v578_v9  ;;  %v405_v23 = vpop.xlane.xlu1 %404 }
  0xf3   : > { %v413_v43 = vmul.f32 0.015625, %v402_v42  ;;  %v427_v45 = vmul.f32 %v10046_v39, %v10046_v39  ;;  %v428_v46 = vmul.f32 %v10048_v40, %v10048_v40  ;;  %v414_v24 = vmul.f32 0.015625, %v405_v23 }
  0xf4   : > { %8677 = vmatprep.subr.bf16.mxu0 %v8676_v11 }
  0xf5   : > { %v10056_v47 = vsub.f32 %v371_v12, %v413_v43  ;;  %v443_v48 = vsel %vm381_vm0, %v427_v45, 0.0  ;;  %v446_v49 = vsel %vm381_vm0, %v428_v46, 0.0  ;;  %v577_v12 = vld [vmem:[#allocation2 + $0x60] sm:$0xff]  ;;  %v10079_v25 = vsub.f32 %v10023_v13, %v414_v24 }
  0xf6   : > { %441 = vadd.xlane.f32.xlu1 %v440_v44  ;;  %444 = vadd.xlane.f32.xlu0 %v443_v48  ;;  %v8678_v15 = vpack.c.bf16 %v579_v14, %v577_v12 }
  0xf7   : > { %v429_v50 = vmul.f32 %v10056_v47, %v10056_v47  ;;  %v430_v26 = vmul.f32 %v10079_v25, %v10079_v25 }
  0xf8   : > { %8679 = vmatpush1.bf16.msra.mxu0 %v8678_v15 }
  0xf9   : > { %v449_v51 = vsel %vm381_vm0, %v429_v50, 0.0  ;;  %v452_v27 = vsel %vm381_vm0, %v430_v26, 0.0 }
  0xfa   : > { %447 = vadd.xlane.f32.xlu1 %v446_v49  ;;  %450 = vadd.xlane.f32.xlu0 %v449_v51 }
 0x10b   : > { %524 = vperm.xlu1 %9099, %v374_v0  }
 0x10f   : > { %529 = vperm.xlu1 %9099, %v375_v7  }
 0x110   : > { %519 = vperm.xlu0 %9098, %v373_v8  }
 0x113   : > { %534 = vperm.xlu1 %9099, %v376_v16  }
 0x117   : > { %539 = vperm.xlu1 %9099, %v377_v18  }
 0x11b   : > { %544 = vperm.xlu1 %9099, %v378_v19  }
 0x11f   : > { %549 = vperm.xlu1 %9099, %v379_v20  }
 0x143   : > { %453 = vadd.xlane.f32.xlu1 %v452_v27 }
 0x154   : > { %554 = vperm.xlu1 %9099, %v380_v28  }
 0x17b   : > { %v433_v31 = vpop.xlane.xlu0 %432 }
 0x17c   : > { %v455_v32 = vmul.f32 0.015625, %v433_v31 }
 0x17e   : > { %v463_v33 = vadd.f32 1e-05, %v455_v32 }
 0x17f   : > { %v436_v34 = vpop.xlane.xlu1 %435  ;;  %v439_v35 = vpop.xlane.xlu0 %438 }
 0x180   : > { %9400 = vrsqrt.f32 %v463_v33  ;;  %v456_v36 = vmul.f32 0.015625, %v436_v34  ;;  %v457_v37 = vmul.f32 0.015625, %v439_v35 }
 0x182   : > { %v464_v38 = vadd.f32 1e-05, %v456_v36  ;;  %v465_v41 = vadd.f32 1e-05, %v457_v37 }
 0x183   : > { %v442_v13 = vpop.xlane.xlu1 %441  ;;  %v445_v42 = vpop.xlane.xlu0 %444 }
 0x184   : > { %9402 = vrsqrt.f32 %v464_v38  ;;  %v458_v43 = vmul.f32 0.015625, %v442_v13  ;;  %v459_v44 = vmul.f32 0.015625, %v445_v42 }
 0x185   : > { %9404 = vrsqrt.f32 %v465_v41 }
 0x186   : > { %v466_v45 = vadd.f32 1e-05, %v458_v43  ;;  %v467_v46 = vadd.f32 1e-05, %v459_v44  ;;  %v583_v44 = vlaneseq }
 0x187   : > { %v448_v48 = vpop.xlane.xlu1 %447  ;;  %v451_v49 = vpop.xlane.xlu0 %450 }
 0x188   : > { %9406 = vrsqrt.f32 %v466_v45  ;;  %v460_v50 = vmul.f32 0.015625, %v448_v48  ;;  %v461_v53 = vmul.f32 0.015625, %v451_v49  ;;  %v584_v45 = vshrl.u32 %v583_v44, 7 }
 0x189   : > { %9408 = vrsqrt.f32 %v467_v46 }
 0x18a   : > { %v9401_v51 = vpop.eup %9400  ;;  %v468_v52 = vadd.f32 1e-05, %v460_v50  ;;  %v469_v60 = vadd.f32 1e-05, %v461_v53  ;;  %v585_v46 = vsub.s32 0, %v584_v45  ;;  %v589_v49 = vsub.s32 1, %v584_v45 }
 0x18b   : > { %v525_v55 = vpop.permute.xlu1 %524  ;;  %v479_v56 = vmul.f32 %v9401_v51, %v10028_v21 }
 0x18c   : > { %9410 = vrsqrt.f32 %v468_v52 }
 0x18d   : > { %v494_v58 = vmul.f32 %v10088_v54, %v479_v56  ;;  %9412 = vrsqrt.f32 %v469_v60 }
 0x18e   : > { %v9403_v59 = vpop.eup %9402 }
 0x18f   : > { %v9405_v61 = vpop.eup %9404  ;;  %v480_v62 = vmul.f32 %v9403_v59, %v10036_v29  ;;  %v530_v63 = vpop.permute.xlu1 %529  ;;  %v509_v0 = vadd.f32 %v10094_v57, %v494_v58 }
 0x190   : > { %v520_v1 = vpop.permute.xlu0 %519  ;;  %v481_v2 = vmul.f32 %v9405_v61, %v10030_v22 }
 0x191   : > { %v495_v21 = vmul.f32 %v10088_v54, %v480_v62  ;;  %v557_v3 = vmul.f32 %v520_v1, %v509_v0 }
 0x192   : > { %v9407_v4 = vpop.eup %9406  ;;  %v496_v5 = vmul.f32 %v10088_v54, %v481_v2 }
 0x193   : > { %v9409_v6 = vpop.eup %9408  ;;  %v510_v7 = vadd.f32 %v10094_v57, %v495_v21  ;;  %v482_v8 = vmul.f32 %v9407_v4, %v10038_v30  ;;  %7697 = vmatmul.mubr.msk.f32.vlgmr.msra.gmra.mrb[0].mxu0 %vm381_vm0, %v557_v3  ;;  %v535_v29 = vpop.permute.xlu1 %534 }
 0x194   : > { %687 = vmatprep.mubr.f32.mxu0 %v9815_v17  ;;  %v511_v22 = vadd.f32 %v10094_v57, %v496_v5  ;;  %v483_v11 = vmul.f32 %v9409_v6, %v10046_v39 }
 0x195   : > { %v558_v9 = vmul.f32 %v525_v55, %v510_v7  ;;  %v497_v10 = vmul.f32 %v10088_v54, %v482_v8 }
 0x196   : > { %v9411_v12 = vpop.eup %9410  ;;  %v559_v14 = vmul.f32 %v530_v63, %v511_v22  ;;  %v498_v15 = vmul.f32 %v10088_v54, %v483_v11 }
 0x197   : > { %7698 = vmatmul.mubr.msk.f32.gmra.mrb[2].mxu0 %vm381_vm0, %v558_v9  ;;  %v512_v30 = vadd.f32 %v10094_v57, %v497_v10  ;;  %v484_v16 = vmul.f32 %v9411_v12, %v10048_v40  ;;  %v540_v18 = vpop.permute.xlu1 %539  ;;  %v9413_v19 = vpop.eup %9412 }
 0x198   : > { %693 = vmatprep.mubr.f32.mxu0 %v9815_v17  ;;  %v513_v39 = vadd.f32 %v10094_v57, %v498_v15  ;;  %v485_v24 = vmul.f32 %v9413_v19, %v10056_v47 }
 0x199   : > { %v560_v20 = vmul.f32 %v535_v29, %v512_v30  ;;  %v499_v23 = vmul.f32 %v10088_v54, %v484_v16 }
 0x19a   : > { %v561_v27 = vmul.f32 %v540_v18, %v513_v39  ;;  %v500_v28 = vmul.f32 %v10088_v54, %v485_v24 }
 0x19b   : > { %7699 = vmatmul.mubr.msk.f32.gmra.mrb[4].mxu0 %vm381_vm0, %v559_v14  ;;  %v545_v26 = vpop.permute.xlu1 %544  ;;  %v514_v40 = vadd.f32 %v10094_v57, %v499_v23 }
 0x19c   : > { %699 = vmatprep.mubr.f32.mxu0 %v9815_v17  ;;  %v515_v33 = vadd.f32 %v10094_v57, %v500_v28 }
 0x19d   : > { %v562_v31 = vmul.f32 %v545_v26, %v514_v40 }
 0x19f   : > { %7700 = vmatmul.mubr.msk.f32.gmra.mrb[6].mxu0 %vm381_vm0, %v560_v20  ;;  %v550_v32 = vpop.permute.xlu1 %549 }
 0x1a0   : > { %705 = vmatprep.mubr.f32.mxu0 %v9815_v17  ;;  %v563_v47 = vmul.f32 %v550_v32, %v515_v33 }
 0x1a3   : > { %7701 = vmatmul.mubr.msk.f32.gmra.mrb[8].mxu0 %vm381_vm0, %v561_v27 }
 0x1a4   : > { %711 = vmatprep.mubr.f32.mxu0 %v9815_v17 }
 0x1a7   : > { %7702 = vmatmul.mubr.msk.f32.gmra.mrb[10].mxu0 %vm381_vm0, %v562_v31 }
 0x1a8   : > { %717 = vmatprep.mubr.f32.mxu0 %v9815_v17 }
 0x1ab   : > { %7703 = vmatmul.mubr.msk.f32.gmra.mrb[12].mxu0 %vm381_vm0, %v563_v47 }
 0x1ac   : > { %723 = vmatprep.mubr.f32.mxu0 %v9815_v17  ;;  %v581_v17 = vld [vmem:[%s11533_s5] sm:$0x3] }
 0x1ad   : > { %v586_v48 = vrot.slane %v581_v17, %v585_v46  ;;  %v590_v52 = vrot.slane %v581_v17, %v589_v49 }
 0x1d0   : > { %v454_v34 = vpop.xlane.xlu1 %453 }
 0x1d1   : > { %v462_v35 = vmul.f32 0.015625, %v454_v34 }
 0x1d3   : > { %v470_v36 = vadd.f32 1e-05, %v462_v35 }
 0x1d4   : > { %v555_v42 = vpop.permute.xlu1 %554 }
 0x1d5   : > { %9414 = vrsqrt.f32 %v470_v36 }
 0x1df   : > { %v9415_v37 = vpop.eup %9414 }
 0x1e0   : > { %v486_v38 = vmul.f32 %v9415_v37, %v10079_v25 }
 0x1e2   : > { %v501_v41 = vmul.f32 %v10088_v54, %v486_v38 }
 0x1e4   : > { %v516_v13 = vadd.f32 %v10094_v57, %v501_v41 }
 0x1e6   : > { %v564_v43 = vmul.f32 %v555_v42, %v516_v13 }
 0x1e8   : > { %7704 = vmatmul.mubr.msk.f32.gmra.mrb[14].mxu0 %vm381_vm0, %v564_v43 }
 0x266   : > { %v683_v50 = vpop.f32.mrb[0].mxu0 }
 0x267   : > { %v684_v51 = vadd.f32 %v683_v50, %v586_v48  ;;  %v685_v25 = vpop.f32.mrb[1].mxu0 }
 0x268   : > { %v686_v57 = vadd.f32 %v685_v25, %v590_v52 }
 0x269   : > { %v10137_v53 = vmul.f32 0.35355338, %v684_v51 }
 0x26a   : > { %v689_v54 = vpop.f32.mrb[2].mxu0 }
 0x26b   : > { %v690_v55 = vadd.f32 %v689_v54, %v586_v48  ;;  %v691_v56 = vpop.f32.mrb[3].mxu0  ;;  %8192 = vmatprep.mubr.msk.f32.mxu0 %vm744_vm1, %v10137_v53 }
 0x26c   : > { %v692_v58 = vadd.f32 %v691_v56, %v590_v52 }
 0x26d   : > { %v10141_v59 = vpack.i.bf16 %v690_v55, %v684_v51  ;;  %v10185_v42 = vmul.f32 0.35355338, %v690_v55 }
 0x26e   : > { %v695_v60 = vpop.f32.mrb[4].mxu0  ;;  %v10143_v61 = vpack.c.bf16 %v692_v58, %v686_v57  ;;  %v10145_v62 = vpack.i.bf16 %v692_v58, %v686_v57 }
 0x26f   : > { %v697_v63 = vpop.f32.mrb[5].mxu0  ;;  %9101 = vrot.lane.b32.xlu1 %v10141_v59, %s9816_s23  ;;  %v696_v1 = vadd.f32 %v695_v60, %v586_v48 }
 0x270   : > { %v698_v3 = vadd.f32 %v697_v63, %v590_v52 }
 0x271   : > { %v10187_v43 = vmul.f32 0.35355338, %v696_v1 }
 0x272   : > { %v701_v0 = vpop.f32.mrb[6].mxu0 }
 0x273   : > { %v702_v2 = vadd.f32 %v701_v0, %v586_v48  ;;  %v703_v21 = vpop.f32.mrb[7].mxu0 }
 0x274   : > { %v704_v4 = vadd.f32 %v703_v21, %v590_v52 }
 0x275   : > { %v10149_v5 = vpack.i.bf16 %v702_v2, %v696_v1  ;;  %v10197_v17 = vmul.f32 0.35355338, %v702_v2 }
 0x276   : > { %v707_v6 = vpop.f32.mrb[8].mxu0  ;;  %v10151_v7 = vpack.c.bf16 %v704_v4, %v698_v3  ;;  %v10153_v8 = vpack.i.bf16 %v704_v4, %v698_v3 }
 0x277   : > { %v708_v29 = vadd.f32 %v707_v6, %v586_v48  ;;  %v709_v9 = vpop.f32.mrb[9].mxu0  ;;  %9106 = vrot.lane.b32.xlu0 %v10149_v5, %s9816_s23 }
 0x278   : > { %v710_v14 = vadd.f32 %v709_v9, %v590_v52 }
 0x279   : > { %v10157_v22 = vmul.f32 0.35355338, %v708_v29 }
 0x27a   : > { %v713_v10 = vpop.f32.mrb[10].mxu0 }
 0x27b   : > { %v714_v11 = vadd.f32 %v713_v10, %v586_v48  ;;  %v715_v12 = vpop.f32.mrb[11].mxu0  ;;  %8206 = vmatprep.mubr.msk.f32.mxu1 %vm744_vm1, %v10157_v22 }
 0x27c   : > { %v716_v30 = vadd.f32 %v715_v12, %v590_v52 }
 0x27d   : > { %v10161_v15 = vpack.i.bf16 %v714_v11, %v708_v29  ;;  %v10205_v49 = vmul.f32 0.35355338, %v714_v11 }
 0x27e   : > { %v719_v16 = vpop.f32.mrb[12].mxu0  ;;  %v10163_v18 = vpack.i.bf16 %v716_v30, %v710_v14  ;;  %v10165_v19 = vpack.c.bf16 %v716_v30, %v710_v14 }
 0x27f   : > { %v721_v20 = vpop.f32.mrb[13].mxu0  ;;  %9111 = vrot.lane.b32.xlu1 %v10161_v15, %s9816_s23  ;;  %v720_v23 = vadd.f32 %v719_v16, %v586_v48 }
 0x280   : > { %v722_v27 = vadd.f32 %v721_v20, %v590_v52 }
 0x281   : > { %v10207_v50 = vmul.f32 0.35355338, %v720_v23 }
 0x2bb   : > { %v725_v39 = vpop.f32.mrb[14].mxu0 }
 0x2bc   : > { %v726_v24 = vadd.f32 %v725_v39, %v586_v48  ;;  %v727_v26 = vpop.f32.mrb[15].mxu0 }
 0x2bd   : > { %v728_v40 = vadd.f32 %v727_v26, %v590_v52 }
 0x2be   : > { %v10169_v28 = vpack.i.bf16 %v726_v24, %v720_v23  ;;  %v10218_v55 = vmul.f32 0.35355338, %v726_v24 }
 0x2bf   : > { %v8716_v31 = vpack.c.bf16 %v728_v40, %v722_v27  ;;  %v10171_v32 = vpack.i.bf16 %v728_v40, %v722_v27 }
 0x2c0   : > { %9116 = vrot.lane.b32.xlu0 %v10169_v28, %s9816_s23  ;;  %s9830_s23 = smov 72  }
 0x2e1   : > { %v9102_v33 = vpop.permute.xlu1 %9101 }
 0x2e2   : > { %v9104_v47 = vunpack.i.h.bf16 %v9102_v33  ;;  %v9103_v34 = vunpack.i.l.bf16 %v9102_v33 }
 0x2e4   : > { %v8680_v36 = vpack.c.bf16 %v9104_v47, %v9103_v34 }
 0x2e6   : > { %8682 = vmatprep.subr.msk.bf16.mxu0 %vm10177_vm2, %v8680_v36 }
 0x2e7   : > { %8685 = vmatpush3.bf16.xpose.msk.msra.mxu0 %vm10177_vm2, %v8680_v36 }
 0x2e9   : > { %v9107_v37 = vpop.permute.xlu0 %9106 }
 0x2ea   : > { %v9109_v38 = vunpack.i.h.bf16 %v9107_v37  ;;  %v9108_v41 = vunpack.i.l.bf16 %v9107_v37 }
 0x2ec   : > { %v8686_v13 = vpack.c.bf16 %v9109_v38, %v9108_v41 }
 0x2ee   : > { %8193 = vmatmul.mubr.msk.f32.vlgmr.msra.gmra.mrb[16].mxu0 %vm744_vm1, %v10185_v42  ;;  %8688 = vmatprep.subr.msk.bf16.mxu0 %vm10177_vm2, %v8686_v13 }
 0x2ef   : > { %8691 = vmatpush3.bf16.xpose.msk.msra.mxu0 %vm10177_vm2, %v8686_v13  ;;  %8199 = vmatprep.mubr.msk.f32.mxu0 %vm744_vm1, %v10187_v43 }
 0x2f0   : > { %8717 = vmatprep.subr.bf16.mxu0 %v8716_v31 }
 0x2f1   : > { %v9112_v44 = vpop.permute.xlu1 %9111 }
 0x2f2   : > { %v9114_v45 = vunpack.i.h.bf16 %v9112_v44  ;;  %v9113_v46 = vunpack.i.l.bf16 %v9112_v44 }
 0x2f4   : > { %v8692_v48 = vpack.c.bf16 %v9114_v45, %v9113_v46 }
 0x2f6   : > { %8200 = vmatmul.mubr.msk.f32.vlgmr.msra.gmra.mrb[18].mxu0 %vm744_vm1, %v10197_v17  ;;  %8694 = vmatprep.subr.msk.bf16.mxu1 %vm10177_vm2, %v8692_v48 }
 0x2f7   : > { %8697 = vmatpush3.bf16.xpose.msk.msra.mxu1 %vm10177_vm2, %v8692_v48  ;;  %8719 = vmatpush3.bf16.msra.mxu0 %v8716_v31 }
 0x2fe   : > { %8207 = vmatmul.mubr.msk.f32.vlgmr.msra.gmra.mrb[0].mxu1 %vm744_vm1, %v10205_v49 }
 0x2ff   : > { %8213 = vmatprep.mubr.msk.f32.mxu1 %vm744_vm1, %v10207_v50 }
 0x332   : > { %v9117_v51 = vpop.permute.xlu0 %9116 }
 0x333   : > { %v9119_v25 = vunpack.i.h.bf16 %v9117_v51  ;;  %v9118_v52 = vunpack.i.l.bf16 %v9117_v51 }
 0x335   : > { %v8698_v54 = vpack.c.bf16 %v9119_v25, %v9118_v52 }
 0x337   : > { %8700 = vmatprep.subr.msk.bf16.mxu1 %vm10177_vm2, %v8698_v54 }
 0x338   : > { %8703 = vmatpush3.bf16.xpose.msk.msra.mxu1 %vm10177_vm2, %v8698_v54 }
 0x339   : > { %8705 = vmatprep.subr.bf16.mxu1 %v10143_v61 }
 0x33f   : > { %8214 = vmatmul.mubr.msk.f32.vlgmr.msra.gmra.mrb[2].mxu1 %vm744_vm1, %v10218_v55 }
 0x340   : > { %8707 = vmatpush3.bf16.msra.mxu1 %v10143_v61 }
 0x341   : > { %8709 = vmatprep.subr.bf16.mxu1 %v10151_v7 }
 0x3c1   : > { %v8194_v56 = vpop.f32.mrb[16].mxu0 }
 0x3c2   : > { %v821_v57 = vpop.f32.mrb[17].mxu0  ;;  %v1107_v58 = vsel %vm1103_vm3, %v8194_v56, -inf }
 0x3c3   : > { %1108 = vmax.xlane.f32.xlu0 %v1107_v58  ;;  %v1104_v60 = vsel %vm1103_vm3, %v821_v57, -inf }
 0x3c4   : > { %1105 = vmax.xlane.f32.xlu1 %v1104_v60 }
 0x3c9   : > { %v8201_v63 = vpop.f32.mrb[18].mxu0 }
 0x3ca   : > { %v912_v0 = vpop.f32.mrb[19].mxu0  ;;  %v1113_v1 = vsel %vm1103_vm3, %v8201_v63, -inf }
 0x3cb   : > { %1114 = vmax.xlane.f32.xlu1 %v1113_v1  ;;  %v1110_v2 = vsel %vm1103_vm3, %v912_v0, -inf }
 0x3cc   : > { %1111 = vmax.xlane.f32.xlu0 %v1110_v2 }
 0x3d1   : > { %v8208_v61 = vpop.f32.mrb[0].mxu1 }
 0x3d2   : > { %v1003_v21 = vpop.f32.mrb[1].mxu1  ;;  %v1119_v3 = vsel %vm1103_vm3, %v8208_v61, -inf }
 0x3d3   : > { %1120 = vmax.xlane.f32.xlu1 %v1119_v3  ;;  %v1116_v4 = vsel %vm1103_vm3, %v1003_v21, -inf }
 0x3d4   : > { %1117 = vmax.xlane.f32.xlu0 %v1116_v4 }
 0x412   : > { %v8215_v6 = vpop.f32.mrb[2].mxu1 }
 0x413   : > { %v1094_v29 = vpop.f32.mrb[3].mxu1  ;;  %v1125_v9 = vsel %vm1103_vm3, %v8215_v6, -inf }
 0x414   : > { %1126 = vmax.xlane.f32.xlu1 %v1125_v9  ;;  %v1122_v10 = vsel %vm1103_vm3, %v1094_v29, -inf }
 0x415   : > { %1123 = vmax.xlane.f32.xlu0 %v1122_v10 }
 0x425   : > { %9126 = vrot.lane.b32.xlu1 %v10149_v5, %s9817_s20 }
 0x429   : > { %1516 = vrot.lane.b32.xlu1 %v10137_v53, %s9818_s17 }
 0x42b   : > { %9121 = vrot.lane.b32.xlu0 %v10141_v59, %s9817_s20 }
 0x450   : > { %v1109_v11 = vpop.xlane.xlu0 %1108 }
 0x451   : > { %v1129_v12 = vsub.f32 %v8194_v56, %v1109_v11  ;;  %v1106_v14 = vpop.xlane.xlu1 %1105 }
 0x452   : > { %v1128_v30 = vsub.f32 %v821_v57, %v1106_v14 }
 0x453   : > { %v1138_v16 = vmul.f32 1.442695, %v1129_v12 }
 0x454   : > { %v1136_v20 = vmul.f32 1.442695, %v1128_v30 }
 0x455   : > { %9416 = vpow2.f32 %v1138_v16 }
 0x456   : > { %9418 = vpow2.f32 %v1136_v20 }
 0x458   : > { %v1115_v39 = vpop.xlane.xlu1 %1114 }
 0x459   : > { %v1131_v23 = vsub.f32 %v8201_v63, %v1115_v39  ;;  %v1112_v24 = vpop.xlane.xlu0 %1111 }
 0x45a   : > { %v1130_v26 = vsub.f32 %v912_v0, %v1112_v24 }
 0x45b   : > { %v1142_v27 = vmul.f32 1.442695, %v1131_v23 }
 0x45c   : > { %v1140_v40 = vmul.f32 1.442695, %v1130_v26 }
 0x45d   : > { %9420 = vpow2.f32 %v1142_v27 }
 0x45e   : > { %9422 = vpow2.f32 %v1140_v40 }
 0x45f   : > { %v10238_v31 = vpop.eup %9416 }
 0x460   : > { %v10240_v33 = vpop.eup %9418  ;;  %v1155_v47 = vsel %vm1103_vm3, %v10238_v31, 0.0  ;;  %v1121_v13 = vpop.xlane.xlu1 %1120 }
 0x461   : > { %1156 = vadd.xlane.f32.xlu1 %v1155_v47  ;;  %v1152_v34 = vsel %vm1103_vm3, %v10240_v33, 0.0  ;;  %v1118_v44 = vpop.xlane.xlu0 %1117  ;;  %v1133_v45 = vsub.f32 %v8208_v61, %v1121_v13 }
 0x462   : > { %1153 = vadd.xlane.f32.xlu0 %v1152_v34  ;;  %v1132_v46 = vsub.f32 %v1003_v21, %v1118_v44 }
 0x463   : > { %v1146_v48 = vmul.f32 1.442695, %v1133_v45 }
 0x464   : > { %v1144_v51 = vmul.f32 1.442695, %v1132_v46 }
 0x465   : > { %9424 = vpow2.f32 %v1146_v48 }
 0x466   : > { %9426 = vpow2.f32 %v1144_v51 }
 0x467   : > { %v10246_v36 = vpop.eup %9420 }
 0x468   : > { %v10248_v37 = vpop.eup %9422  ;;  %v1161_v38 = vsel %vm1103_vm3, %v10246_v36, 0.0 }
 0x469   : > { %1162 = vadd.xlane.f32.xlu1 %v1161_v38  ;;  %v1158_v41 = vsel %vm1103_vm3, %v10248_v37, 0.0 }
 0x46a   : > { %1159 = vadd.xlane.f32.xlu0 %v1158_v41 }
 0x46f   : > { %v10258_v25 = vpop.eup %9424 }
 0x470   : > { %v10260_v52 = vpop.eup %9426  ;;  %v1167_v54 = vsel %vm1103_vm3, %v10258_v25, 0.0 }
 0x471   : > { %v1164_v56 = vsel %vm1103_vm3, %v10260_v52, 0.0 }
 0x47a   : > { %1518 = vrot.lane.b32.xlu1 %v10185_v42, %s9818_s17 }
 0x480   : > { %9131 = vrot.lane.b32.xlu0 %v10161_v15, %s9817_s20 }
 0x49e   : > { %1168 = vadd.xlane.f32.xlu1 %v1167_v54 }
 0x49f   : > { %1165 = vadd.xlane.f32.xlu0 %v1164_v56 }
 0x4a1   : > { %v1127_v57 = vpop.xlane.xlu1 %1126 }
 0x4a2   : > { %v1135_v58 = vsub.f32 %v8215_v6, %v1127_v57  ;;  %v1124_v60 = vpop.xlane.xlu0 %1123 }
 0x4a3   : > { %v1134_v63 = vsub.f32 %v1094_v29, %v1124_v60 }
 0x4a4   : > { %v1150_v0 = vmul.f32 1.442695, %v1135_v58 }
 0x4a5   : > { %v1148_v1 = vmul.f32 1.442695, %v1134_v63  ;;  %v9127_v2 = vpop.permute.xlu1 %9126 }
 0x4a6   : > { %9428 = vpow2.f32 %v1150_v0  ;;  %v9129_v61 = vunpack.i.h.bf16 %v9127_v2  ;;  %v9128_v21 = vunpack.i.l.bf16 %v9127_v2  ;;  %v9122_v11 = vpop.permute.xlu0 %9121 }
 0x4a7   : > { %9430 = vpow2.f32 %v1148_v1  ;;  %v9124_v40 = vunpack.i.h.bf16 %v9122_v11  ;;  %v9123_v47 = vunpack.i.l.bf16 %v9122_v11 }
 0x4a8   : > { %v10266_v3 = vpack.c.bf16 %v9129_v61, %v9128_v21 }
 0x4a9   : > { %v1517_v10 = vpop.permute.xlu1 %1516 }
 0x4aa   : > { %8728 = vmatprep.subr.msk.bf16.mxu0 %vm10177_vm2, %v10266_v3 }
 0x4b0   : > { %v10271_v4 = vpop.eup %9428 }
 0x4b1   : > { %v10273_v9 = vpop.eup %9430  ;;  %v1173_v6 = vsel %vm1103_vm3, %v10271_v4, 0.0 }
 0x4b2   : > { %1174 = vadd.xlane.f32.xlu1 %v1173_v6  ;;  %v1170_v29 = vsel %vm1103_vm3, %v10273_v9, 0.0 }
 0x4b3   : > { %1171 = vadd.xlane.f32.xlu0 %v1170_v29 }
 0x4c3   : > { %9136 = vrot.lane.b32.xlu1 %v10169_v28, %s9817_s20 }
 0x4c7   : > { %1698 = vrot.lane.b32.xlu1 %v10157_v22, %s9818_s17 }
 0x4c9   : > { %1607 = vrot.lane.b32.xlu0 %v10187_v43, %s9818_s17 }
 0x4cb   : > { %1789 = vrot.lane.b32.xlu1 %v10207_v50, %s9818_s17 }
 0x4cd   : > { %1609 = vrot.lane.b32.xlu0 %v10197_v17, %s9818_s17 }
 0x4cf   : > { %9146 = vrot.lane.b32.xlu1 %v10153_v8, %s9818_s17 }
 0x4d1   : > { %1700 = vrot.lane.b32.xlu0 %v10205_v49, %s9818_s17 }
 0x4d3   : > { %9151 = vrot.lane.b32.xlu1 %v10163_v18, %s9818_s17 }
 0x4d5   : > { %1791 = vrot.lane.b32.xlu0 %v10218_v55, %s9818_s17 }
 0x4d7   : > { %9161 = vrot.lane.b32.xlu1 %v10141_v59, %s9819_s22 }
 0x4d9   : > { %9141 = vrot.lane.b32.xlu0 %v10145_v62, %s9818_s17 }
 0x4dd   : > { %9156 = vrot.lane.b32.xlu0 %v10171_v32, %s9818_s17 }
 0x4ee   : > { %v1157_v12 = vpop.xlane.xlu1 %1156 }
 0x4ef   : > { %9432 = vrcp.f32 %v1157_v12  ;;  %v1154_v14 = vpop.xlane.xlu0 %1153 }
 0x4f0   : > { %9434 = vrcp.f32 %v1154_v14 }
 0x4f6   : > { %v1163_v30 = vpop.xlane.xlu1 %1162 }
 0x4f7   : > { %9436 = vrcp.f32 %v1163_v30  ;;  %v1160_v16 = vpop.xlane.xlu0 %1159 }
 0x4f8   : > { %9438 = vrcp.f32 %v1160_v16 }
 0x4f9   : > { %v9433_v20 = vpop.eup %9432 }
 0x4fa   : > { %v9435_v39 = vpop.eup %9434  ;;  %v1179_v24 = vmul.f32 %v9433_v20, %v10238_v31 }
 0x4fb   : > { %v1177_v23 = vmul.f32 %v9435_v39, %v10240_v33  ;;  %v8720_v33 = vpack.c.bf16 %v9124_v40, %v9123_v47  ;;  %v9132_v31 = vpop.permute.xlu0 %9131 }
 0x4fc   : > { %v9134_v45 = vunpack.i.h.bf16 %v9132_v31 }
 0x4fd   : > { %8220 = vmatprep.mubr.msk.f32.mxu1 %vm1103_vm3, %v1177_v23 }
 0x4fe   : > { %8221 = vmatmul.mubr.msk.f32.vlgmr.msra.gmra.mrb[4].mxu1 %vm1103_vm3, %v1179_v24 }
 0x4ff   : > { %8711 = vmatpush3.bf16.msra.mxu1 %v10151_v7  ;;  %v1519_v7 = vpop.permute.xlu1 %1518 }
 0x500   : > { %8713 = vmatprep.subr.bf16.mxu1 %v10165_v19 }
 0x501   : > { %v9437_v26 = vpop.eup %9436 }
 0x502   : > { %v9439_v27 = vpop.eup %9438  ;;  %v1183_v38 = vmul.f32 %v9437_v26, %v10246_v36  ;;  %v9133_v36 = vunpack.i.l.bf16 %v9132_v31 }
 0x503   : > { %v1181_v34 = vmul.f32 %v9439_v27, %v10248_v37 }
 0x505   : > { %8227 = vmatprep.mubr.msk.f32.mxu1 %vm1103_vm3, %v1181_v34 }
 0x506   : > { %8228 = vmatmul.mubr.msk.f32.vlgmr.msra.gmra.mrb[6].mxu1 %vm1103_vm3, %v1183_v38 }
 0x507   : > { %8715 = vmatpush3.bf16.msra.mxu1 %v10165_v19  ;;  %v8732_v19 = vpack.c.bf16 %v9134_v45, %v9133_v36 }
 0x508   : > { %8722 = vmatprep.subr.msk.bf16.mxu1 %vm10177_vm2, %v8720_v33 }
 0x52b   : > { %v1169_v41 = vpop.xlane.xlu1 %1168 }
 0x52c   : > { %9440 = vrcp.f32 %v1169_v41  ;;  %v1166_v13 = vpop.xlane.xlu0 %1165 }
 0x52d   : > { %9442 = vrcp.f32 %v1166_v13 }
 0x536   : > { %v9441_v44 = vpop.eup %9440 }
 0x537   : > { %v9443_v37 = vpop.eup %9442  ;;  %v1187_v48 = vmul.f32 %v9441_v44, %v10258_v25 }
 0x538   : > { %v1185_v46 = vmul.f32 %v9443_v37, %v10260_v52 }
 0x53a   : > { %8234 = vmatprep.mubr.msk.f32.mxu1 %vm1103_vm3, %v1185_v46 }
 0x53b   : > { %8235 = vmatmul.mubr.msk.f32.vlgmr.msra.gmra.mrb[8].mxu1 %vm1103_vm3, %v1187_v48 }
 0x53c   : > { %8725 = vmatpush3.bf16.xpose.msk.msra.mxu1 %vm10177_vm2, %v8720_v33  ;;  %8248 = vmatprep.mubr.msk.f32.mxu1 %vm744_vm1, %v1517_v10 }
 0x53d   : > { %8734 = vmatprep.subr.msk.bf16.mxu1 %vm10177_vm2, %v8732_v19 }
 0x53f   : > { %v1175_v51 = vpop.xlane.xlu1 %1174 }
 0x540   : > { %9444 = vrcp.f32 %v1175_v51  ;;  %v1172_v54 = vpop.xlane.xlu0 %1171 }
 0x541   : > { %9446 = vrcp.f32 %v1172_v54 }
 0x543   : > { %8249 = vmatmul.mubr.msk.f32.vlgmr.msra.gmra.mrb[10].mxu1 %vm744_vm1, %v1519_v7  ;;  %v9137_v25 = vpop.permute.xlu1 %9136 }
 0x544   : > { %8737 = vmatpush3.bf16.xpose.msk.msra.mxu1 %vm10177_vm2, %v8732_v19  ;;  %v1608_v52 = vpop.permute.xlu0 %1607  ;;  %v9139_v63 = vunpack.i.h.bf16 %v9137_v25  ;;  %v9138_v0 = vunpack.i.l.bf16 %v9137_v25 }
 0x546   : > { %v8738_v6 = vpack.c.bf16 %v9139_v63, %v9138_v0 }
 0x547   : > { %v1699_v56 = vpop.permute.xlu1 %1698 }
 0x548   : > { %v1610_v57 = vpop.permute.xlu0 %1609  ;;  %8262 = vmatprep.mubr.msk.f32.mxu1 %vm744_vm1, %v1699_v56 }
 0x54a   : > { %v9445_v58 = vpop.eup %9444 }
 0x54b   : > { %v9447_v60 = vpop.eup %9446  ;;  %v1790_v1 = vpop.permute.xlu1 %1789  ;;  %v1191_v21 = vmul.f32 %v9445_v58, %v10271_v4 }
 0x54c   : > { %v1701_v2 = vpop.permute.xlu0 %1700  ;;  %v1189_v61 = vmul.f32 %v9447_v60, %v10273_v9 }
 0x54d   : > { %8263 = vmatmul.mubr.msk.f32.vlgmr.msra.gmra.mrb[12].mxu1 %vm744_vm1, %v1701_v2 }
 0x54e   : > { %8241 = vmatprep.mubr.msk.f32.mxu0 %vm1103_vm3, %v1189_v61 }
 0x54f   : > { %v9147_v29 = vpop.permute.xlu1 %9146  ;;  %8242 = vmatmul.mubr.msk.f32.vlgmr.msra.gmra.mrb[20].mxu0 %vm1103_vm3, %v1191_v21 }
 0x550   : > { %8731 = vmatpush3.bf16.xpose.msk.msra.mxu0 %vm10177_vm2, %v10266_v3  ;;  %8255 = vmatprep.mubr.msk.f32.mxu0 %vm744_vm1, %v1608_v52  ;;  %v1792_v10 = vpop.permute.xlu0 %1791  ;;  %v9149_v9 = vunpack.i.h.bf16 %v9147_v29  ;;  %v9148_v11 = vunpack.i.l.bf16 %v9147_v29 }
 0x551   : > { %8740 = vmatprep.subr.msk.bf16.mxu0 %vm10177_vm2, %v8738_v6 }
 0x552   : > { %v8748_v39 = vpack.c.bf16 %v9149_v9, %v9148_v11 }
 0x553   : > { %v9152_v12 = vpop.permute.xlu1 %9151 }
 0x554   : > { %v9142_v4 = vpop.permute.xlu0 %9141  ;;  %v9154_v14 = vunpack.i.h.bf16 %v9152_v12  ;;  %v9153_v30 = vunpack.i.l.bf16 %v9152_v12 }
 0x555   : > { %v9144_v16 = vunpack.i.h.bf16 %v9142_v4  ;;  %v9143_v20 = vunpack.i.l.bf16 %v9142_v4 }
 0x556   : > { %v10344_v24 = vpack.c.bf16 %v9154_v14, %v9153_v30 }
 0x557   : > { %8256 = vmatmul.mubr.msk.f32.vlgmr.msra.gmra.mrb[22].mxu0 %vm744_vm1, %v1610_v57  ;;  %v8744_v23 = vpack.c.bf16 %v9144_v16, %v9143_v20  ;;  %v10379_v0 = vpop.permute.xlu1 %9161 }
 0x558   : > { %8743 = vmatpush3.bf16.xpose.msk.msra.mxu0 %vm10177_vm2, %v8738_v6  ;;  %8269 = vmatprep.mubr.msk.f32.mxu0 %vm744_vm1, %v1790_v1  ;;  %v9157_v3 = vpop.permute.xlu0 %9156 }
 0x559   : > { %8749 = vmatprep.subr.bf16.mxu0 %v8748_v39  ;;  %8745 = vmatprep.subr.bf16.mxu1 %v8744_v23  ;;  %v9159_v26 = vunpack.i.h.bf16 %v9157_v3  ;;  %v9158_v27 = vunpack.i.l.bf16 %v9157_v3 }
 0x55a   : > { %8747 = vmatpush3.bf16.msra.mxu1 %v8744_v23 }
 0x55b   : > { %8753 = vmatprep.subr.bf16.mxu1 %v10344_v24  ;;  %v10348_v40 = vpack.c.bf16 %v9159_v26, %v9158_v27 }
 0x55f   : > { %8270 = vmatmul.mubr.msk.f32.vlgmr.msra.gmra.mrb[24].mxu0 %vm744_vm1, %v1792_v10 }
 0x560   : > { %8751 = vmatpush3.bf16.msra.mxu0 %v8748_v39 }
 0x561   : > { %8757 = vmatprep.subr.bf16.mxu0 %v10348_v40 }
 0x5d1   : > { %v10351_v47 = vpop.f32.mrb[4].mxu1 }
 0x5d2   : > { %11554 = vst [vmem:[#allocation13_spill] sm:$0xff] %v10351_v47  ;;  %v10353_v34 = vpop.f32.mrb[5].mxu1 }
 0x5d3   : > { %11555 = vst [vmem:[#allocation14_spill] sm:$0xff] %v10353_v34 }
 0x5d9   : > { %v10355_v38 = vpop.f32.mrb[6].mxu1 }
 0x5da   : > { %11556 = vst [vmem:[#allocation15_spill] sm:$0xff] %v10355_v38  ;;  %v10357_v33 = vpop.f32.mrb[7].mxu1 }
 0x5db   : > { %11557 = vst [vmem:[#allocation16_spill] sm:$0xff] %v10357_v33 }
 0x60e   : > { %v10359_v7 = vpop.f32.mrb[8].mxu1 }
 0x60f   : > { %11558 = vst [vmem:[#allocation17_spill] sm:$0xff] %v10359_v7  ;;  %v10361_v31 = vpop.f32.mrb[9].mxu1 }
 0x610   : > { %11559 = vst [vmem:[#allocation18_spill] sm:$0xff] %v10361_v31 }
 0x616   : > { %v8250_v41 = vpop.f32.mrb[10].mxu1 }
 0x617   : > { %v1598_v13 = vpop.f32.mrb[11].mxu1  ;;  %v1883_v44 = vsel %vm1103_vm3, %v8250_v41, -inf }
 0x618   : > { %1884 = vmax.xlane.f32.xlu0 %v1883_v44  ;;  %v1880_v37 = vsel %vm1103_vm3, %v1598_v13, -inf }
 0x619   : > { %1881 = vmax.xlane.f32.xlu1 %v1880_v37 }
 0x620   : > { %v8264_v45 = vpop.f32.mrb[12].mxu1 }
 0x621   : > { %v1780_v36 = vpop.f32.mrb[13].mxu1  ;;  %v1895_v52 = vsel %vm1103_vm3, %v8264_v45, -inf }
 0x622   : > { %v10365_v46 = vpop.f32.mrb[20].mxu0  ;;  %v1892_v56 = vsel %vm1103_vm3, %v1780_v36, -inf }
 0x623   : > { %11560 = vst [vmem:[#allocation19_spill] sm:$0xff] %v10365_v46  ;;  %v10367_v48 = vpop.f32.mrb[21].mxu0 }
 0x624   : > { %11561 = vst [vmem:[#allocation20_spill] sm:$0xff] %v10367_v48 }
 0x62a   : > { %v8257_v19 = vpop.f32.mrb[22].mxu0 }
 0x62b   : > { %v1689_v51 = vpop.f32.mrb[23].mxu0  ;;  %v1889_v54 = vsel %vm1103_vm3, %v8257_v19, -inf }
 0x62c   : > { %1890 = vmax.xlane.f32.xlu1 %v1889_v54  ;;  %v1886_v25 = vsel %vm1103_vm3, %v1689_v51, -inf }
 0x62d   : > { %1887 = vmax.xlane.f32.xlu0 %v1886_v25 }
 0x630   : > { %1896 = vmax.xlane.f32.xlu1 %v1895_v52 }
 0x631   : > { %1893 = vmax.xlane.f32.xlu0 %v1892_v56 }
 0x632   : > { %v8271_v57 = vpop.f32.mrb[24].mxu0 }
 0x633   : > { %v1871_v58 = vpop.f32.mrb[25].mxu0  ;;  %v1901_v60 = vsel %vm1103_vm3, %v8271_v57, -inf }
 0x634   : > { %1902 = vmax.xlane.f32.xlu1 %v1901_v60  ;;  %v1898_v63 = vsel %vm1103_vm3, %v1871_v58, -inf }
 0x635   : > { %1899 = vmax.xlane.f32.xlu0 %v1898_v63 }
 0x645   : > { %2324 = vrot.lane.b32.xlu1 %v10137_v53, %s9820_s24 }
 0x64b   : > { %9166 = vrot.lane.b32.xlu0 %v10149_v5, %s9819_s22 }
 0x6a5   : > { %v1885_v1 = vpop.xlane.xlu0 %1884 }
 0x6a6   : > { %v1905_v2 = vsub.f32 %v8250_v41, %v1885_v1  ;;  %v1882_v61 = vpop.xlane.xlu1 %1881 }
 0x6a7   : > { %v1904_v21 = vsub.f32 %v1598_v13, %v1882_v61 }
 0x6a8   : > { %v1914_v6 = vmul.f32 1.442695, %v1905_v2 }
 0x6a9   : > { %v1912_v29 = vmul.f32 1.442695, %v1904_v21 }
 0x6aa   : > { %9448 = vpow2.f32 %v1914_v6 }
 0x6ab   : > { %9450 = vpow2.f32 %v1912_v29 }
 0x6b4   : > { %v10381_v10 = vpop.eup %9448 }
 0x6b5   : > { %v10383_v9 = vpop.eup %9450  ;;  %v1931_v11 = vsel %vm1103_vm3, %v10381_v10, 0.0 }
 0x6b6   : > { %1932 = vadd.xlane.f32.xlu1 %v1931_v11  ;;  %v1928_v12 = vsel %vm1103_vm3, %v10383_v9, 0.0 }
 0x6b7   : > { %1929 = vadd.xlane.f32.xlu0 %v1928_v12 }
 0x6b9   : > { %v1891_v4 = vpop.xlane.xlu1 %1890 }
 0x6ba   : > { %v1907_v14 = vsub.f32 %v8257_v19, %v1891_v4  ;;  %v1888_v30 = vpop.xlane.xlu0 %1887 }
 0x6bb   : > { %v1906_v16 = vsub.f32 %v1689_v51, %v1888_v30  ;;  %v9164_v30 = vunpack.i.h.bf16 %v10379_v0 }
 0x6bc   : > { %v1918_v20 = vmul.f32 1.442695, %v1907_v14 }
 0x6bd   : > { %v1916_v39 = vmul.f32 1.442695, %v1906_v16  ;;  %v1897_v41 = vpop.xlane.xlu1 %1896  ;;  %v9163_v16 = vunpack.i.l.bf16 %v10379_v0 }
 0x6be   : > { %9452 = vpow2.f32 %v1918_v20  ;;  %v1894_v13 = vpop.xlane.xlu0 %1893  ;;  %v1909_v44 = vsub.f32 %v8264_v45, %v1897_v41 }
 0x6bf   : > { %9454 = vpow2.f32 %v1916_v39  ;;  %v1908_v37 = vsub.f32 %v1780_v36, %v1894_v13 }
 0x6c0   : > { %v1922_v54 = vmul.f32 1.442695, %v1909_v44 }
 0x6c1   : > { %v1903_v19 = vpop.xlane.xlu1 %1902  ;;  %v1920_v52 = vmul.f32 1.442695, %v1908_v37 }
 0x6c2   : > { %v1900_v51 = vpop.xlane.xlu0 %1899  ;;  %v1911_v25 = vsub.f32 %v8271_v57, %v1903_v19  ;;  %9456 = vpow2.f32 %v1922_v54 }
 0x6c3   : > { %v1910_v56 = vsub.f32 %v1871_v58, %v1900_v51  ;;  %9458 = vpow2.f32 %v1920_v52 }
 0x6c4   : > { %v1926_v60 = vmul.f32 1.442695, %v1911_v25 }
 0x6c5   : > { %v1924_v63 = vmul.f32 1.442695, %v1910_v56  ;;  %v2325_v6 = vpop.permute.xlu1 %2324 }
 0x6c6   : > { %9460 = vpow2.f32 %v1926_v60  ;;  %v9167_v29 = vpop.permute.xlu0 %9166 }
 0x6c7   : > { %9462 = vpow2.f32 %v1924_v63  ;;  %v9169_v44 = vunpack.i.h.bf16 %v9167_v29 }
 0x6c8   : > { %v10389_v23 = vpop.eup %9452 }
 0x6c9   : > { %v10391_v3 = vpop.eup %9454  ;;  %v1937_v26 = vsel %vm1103_vm3, %v10389_v23, 0.0 }
 0x6ca   : > { %1938 = vadd.xlane.f32.xlu1 %v1937_v26  ;;  %v1934_v27 = vsel %vm1103_vm3, %v10391_v3, 0.0  ;;  %v8760_v26 = vpack.c.bf16 %v9164_v30, %v9163_v16 }
 0x6cb   : > { %1935 = vadd.xlane.f32.xlu0 %v1934_v27 }
 0x6cc   : > { %v10401_v1 = vpop.eup %9456 }
 0x6cd   : > { %v10403_v2 = vpop.eup %9458  ;;  %v1943_v45 = vsel %vm1103_vm3, %v10401_v1, 0.0 }
 0x6ce   : > { %v1940_v57 = vsel %vm1103_vm3, %v10403_v2, 0.0 }
 0x6d0   : > { %v10407_v36 = vpop.eup %9460 }
 0x6d1   : > { %v10411_v58 = vpop.eup %9462  ;;  %v1949_v61 = vsel %vm1103_vm3, %v10407_v36, 0.0 }
 0x6d2   : > { %v1946_v21 = vsel %vm1103_vm3, %v10411_v58, 0.0 }
 0x6db   : > { %2326 = vrot.lane.b32.xlu1 %v10185_v42, %s9820_s24 }
 0x6e1   : > { %9171 = vrot.lane.b32.xlu0 %v10161_v15, %s9819_s22 }
 0x6ff   : > { %1944 = vadd.xlane.f32.xlu1 %v1943_v45 }
 0x700   : > { %1941 = vadd.xlane.f32.xlu0 %v1940_v57 }
 0x703   : > { %1950 = vadd.xlane.f32.xlu1 %v1949_v61 }
 0x704   : > { %1947 = vadd.xlane.f32.xlu0 %v1946_v21 }
 0x714   : > { %9176 = vrot.lane.b32.xlu1 %v10169_v28, %s9819_s22 }
 0x718   : > { %2506 = vrot.lane.b32.xlu1 %v10157_v22, %s9820_s24 }
 0x71a   : > { %2415 = vrot.lane.b32.xlu0 %v10187_v43, %s9820_s24 }
 0x71c   : > { %2597 = vrot.lane.b32.xlu1 %v10207_v50, %s9820_s24 }
 0x71e   : > { %2417 = vrot.lane.b32.xlu0 %v10197_v17, %s9820_s24 }
 0x720   : > { %9186 = vrot.lane.b32.xlu1 %v10153_v8, %s9820_s24 }
 0x722   : > { %2508 = vrot.lane.b32.xlu0 %v10205_v49, %s9820_s24 }
 0x724   : > { %9191 = vrot.lane.b32.xlu1 %v10163_v18, %s9820_s24 }
 0x726   : > { %2599 = vrot.lane.b32.xlu0 %v10218_v55, %s9820_s24 }
 0x728   : > { %9201 = vrot.lane.b32.xlu1 %v10141_v59, %s9821_s26 }
 0x72a   : > { %9181 = vrot.lane.b32.xlu0 %v10145_v62, %s9820_s24 }
 0x72e   : > { %9196 = vrot.lane.b32.xlu0 %v10171_v32, %s9820_s24 }
 0x743   : > { %v1933_v11 = vpop.xlane.xlu1 %1932 }
 0x744   : > { %9464 = vrcp.f32 %v1933_v11  ;;  %v1930_v12 = vpop.xlane.xlu0 %1929 }
 0x745   : > { %9466 = vrcp.f32 %v1930_v12 }
 0x74e   : > { %v9465_v4 = vpop.eup %9464 }
 0x74f   : > { %v9467_v14 = vpop.eup %9466  ;;  %v1955_v39 = vmul.f32 %v9465_v4, %v10381_v10 }
 0x750   : > { %v1953_v20 = vmul.f32 %v9467_v14, %v10383_v9  ;;  %v9168_v9 = vunpack.i.l.bf16 %v9167_v29 }
 0x752   : > { %8276 = vmatprep.mubr.msk.f32.mxu1 %vm1103_vm3, %v1953_v20  ;;  %v8766_v19 = vpack.c.bf16 %v9169_v44, %v9168_v9 }
 0x753   : > { %8277 = vmatmul.mubr.msk.f32.vlgmr.msra.gmra.mrb[14].mxu1 %vm1103_vm3, %v1955_v39 }
 0x754   : > { %8755 = vmatpush3.bf16.msra.mxu1 %v10344_v24 }
 0x755   : > { %8762 = vmatprep.subr.msk.bf16.mxu1 %vm10177_vm2, %v8760_v26 }
 0x757   : > { %v1939_v27 = vpop.xlane.xlu1 %1938 }
 0x758   : > { %9468 = vrcp.f32 %v1939_v27  ;;  %v1936_v41 = vpop.xlane.xlu0 %1935 }
 0x759   : > { %9470 = vrcp.f32 %v1936_v41 }
 0x75b   : > { %v2327_v24 = vpop.permute.xlu1 %2326 }
 0x75c   : > { %v9172_v51 = vpop.permute.xlu0 %9171 }
 0x75d   : > { %v9174_v45 = vunpack.i.h.bf16 %v9172_v51  ;;  %v9173_v57 = vunpack.i.l.bf16 %v9172_v51 }
 0x75f   : > { %v8772_v4 = vpack.c.bf16 %v9174_v45, %v9173_v57 }
 0x762   : > { %v9469_v13 = vpop.eup %9468 }
 0x763   : > { %v9471_v0 = vpop.eup %9470  ;;  %v1959_v37 = vmul.f32 %v9469_v13, %v10389_v23 }
 0x764   : > { %v1957_v10 = vmul.f32 %v9471_v0, %v10391_v3 }
 0x766   : > { %8283 = vmatprep.mubr.msk.f32.mxu0 %vm1103_vm3, %v1957_v10 }
 0x767   : > { %8284 = vmatmul.mubr.msk.f32.vlgmr.msra.gmra.mrb[26].mxu0 %vm1103_vm3, %v1959_v37 }
 0x768   : > { %8759 = vmatpush3.bf16.msra.mxu0 %v10348_v40 }
 0x769   : > { %8768 = vmatprep.subr.msk.bf16.mxu0 %vm10177_vm2, %v8766_v19 }
 0x78c   : > { %v1945_v54 = vpop.xlane.xlu1 %1944 }
 0x78d   : > { %9472 = vrcp.f32 %v1945_v54  ;;  %v1942_v25 = vpop.xlane.xlu0 %1941 }
 0x78e   : > { %9474 = vrcp.f32 %v1942_v25 }
 0x790   : > { %v1951_v52 = vpop.xlane.xlu1 %1950 }
 0x791   : > { %9476 = vrcp.f32 %v1951_v52  ;;  %v1948_v3 = vpop.xlane.xlu0 %1947 }
 0x792   : > { %9478 = vrcp.f32 %v1948_v3 }
 0x794   : > { %v9177_v23 = vpop.permute.xlu1 %9176 }
 0x795   : > { %v2416_v56 = vpop.permute.xlu0 %2415  ;;  %v9179_v14 = vunpack.i.h.bf16 %v9177_v23  ;;  %v9178_v30 = vunpack.i.l.bf16 %v9177_v23 }
 0x797   : > { %v9473_v60 = vpop.eup %9472  ;;  %v8778_v39 = vpack.c.bf16 %v9179_v14, %v9178_v30 }
 0x798   : > { %v9475_v63 = vpop.eup %9474  ;;  %v2507_v40 = vpop.permute.xlu1 %2506  ;;  %v1963_v29 = vmul.f32 %v9473_v60, %v10401_v1 }
 0x799   : > { %v2418_v61 = vpop.permute.xlu0 %2417  ;;  %v1961_v21 = vmul.f32 %v9475_v63, %v10403_v2 }
 0x79b   : > { %v9477_v11 = vpop.eup %9476  ;;  %8290 = vmatprep.mubr.msk.f32.mxu1 %vm1103_vm3, %v1961_v21 }
 0x79c   : > { %v9479_v12 = vpop.eup %9478  ;;  %v2598_v16 = vpop.permute.xlu1 %2597  ;;  %8291 = vmatmul.mubr.msk.f32.vlgmr.msra.gmra.mrb[16].mxu1 %vm1103_vm3, %v1963_v29  ;;  %v1967_v1 = vmul.f32 %v9477_v11, %v10407_v36 }
 0x79d   : > { %8765 = vmatpush3.bf16.xpose.msk.msra.mxu1 %vm10177_vm2, %v8760_v26  ;;  %8304 = vmatprep.mubr.msk.f32.mxu1 %vm744_vm1, %v2325_v6  ;;  %v2509_v20 = vpop.permute.xlu0 %2508  ;;  %v1965_v2 = vmul.f32 %v9479_v12, %v10411_v58 }
 0x79e   : > { %8774 = vmatprep.subr.msk.bf16.mxu1 %vm10177_vm2, %v8772_v4 }
 0x79f   : > { %8297 = vmatprep.mubr.msk.f32.mxu0 %vm1103_vm3, %v1965_v2 }
 0x7a0   : > { %v9187_v27 = vpop.permute.xlu1 %9186  ;;  %8298 = vmatmul.mubr.msk.f32.vlgmr.msra.gmra.mrb[28].mxu0 %vm1103_vm3, %v1967_v1 }
 0x7a1   : > { %8771 = vmatpush3.bf16.xpose.msk.msra.mxu0 %vm10177_vm2, %v8766_v19  ;;  %8311 = vmatprep.mubr.msk.f32.mxu0 %vm744_vm1, %v2416_v56  ;;  %v2600_v6 = vpop.permute.xlu0 %2599  ;;  %v9189_v58 = vunpack.i.h.bf16 %v9187_v27  ;;  %v9188_v26 = vunpack.i.l.bf16 %v9187_v27 }
 0x7a2   : > { %8780 = vmatprep.subr.msk.bf16.mxu0 %vm10177_vm2, %v8778_v39 }
 0x7a3   : > { %v8788_v10 = vpack.c.bf16 %v9189_v58, %v9188_v26 }
 0x7a4   : > { %8305 = vmatmul.mubr.msk.f32.vlgmr.msra.gmra.mrb[18].mxu1 %vm744_vm1, %v2327_v24  ;;  %v9192_v36 = vpop.permute.xlu1 %9191 }
 0x7a5   : > { %8777 = vmatpush3.bf16.xpose.msk.msra.mxu1 %vm10177_vm2, %v8772_v4  ;;  %8318 = vmatprep.mubr.msk.f32.mxu1 %vm744_vm1, %v2507_v40  ;;  %v9182_v41 = vpop.permute.xlu0 %9181  ;;  %v9194_v44 = vunpack.i.h.bf16 %v9192_v36  ;;  %v9193_v9 = vunpack.i.l.bf16 %v9192_v36 }
 0x7a6   : > { %v9184_v13 = vunpack.i.h.bf16 %v9182_v41  ;;  %v9183_v0 = vunpack.i.l.bf16 %v9182_v41 }
 0x7a7   : > { %v10484_v54 = vpack.c.bf16 %v9194_v44, %v9193_v9 }
 0x7a8   : > { %8312 = vmatmul.mubr.msk.f32.vlgmr.msra.gmra.mrb[30].mxu0 %vm744_vm1, %v2418_v61  ;;  %v8784_v37 = vpack.c.bf16 %v9184_v13, %v9183_v0  ;;  %v10519_v58 = vpop.permute.xlu1 %9201 }
 0x7a9   : > { %8783 = vmatpush3.bf16.xpose.msk.msra.mxu0 %vm10177_vm2, %v8778_v39  ;;  %8325 = vmatprep.mubr.msk.f32.mxu0 %vm744_vm1, %v2598_v16  ;;  %v9197_v19 = vpop.permute.xlu0 %9196 }
 0x7aa   : > { %8789 = vmatprep.subr.bf16.mxu0 %v8788_v10  ;;  %8785 = vmatprep.subr.bf16.mxu1 %v8784_v37  ;;  %v9199_v24 = vunpack.i.h.bf16 %v9197_v19  ;;  %v9198_v51 = vunpack.i.l.bf16 %v9197_v19 }
 0x7ac   : > { %8319 = vmatmul.mubr.msk.f32.vlgmr.msra.gmra.mrb[20].mxu1 %vm744_vm1, %v2509_v20  ;;  %v10488_v25 = vpack.c.bf16 %v9199_v24, %v9198_v51 }
 0x7ad   : > { %8787 = vmatpush3.bf16.msra.mxu1 %v8784_v37 }
 0x7ae   : > { %8793 = vmatprep.subr.bf16.mxu1 %v10484_v54 }
 0x7b0   : > { %8326 = vmatmul.mubr.msk.f32.vlgmr.msra.gmra.mrb[32].mxu0 %vm744_vm1, %v2600_v6 }
 0x7b1   : > { %8791 = vmatpush3.bf16.msra.mxu0 %v8788_v10 }
 0x7b2   : > { %8797 = vmatprep.subr.bf16.mxu0 %v10488_v25 }
 0x826   : > { %v10491_v52 = vpop.f32.mrb[14].mxu1 }
 0x827   : > { %v10493_v3 = vpop.f32.mrb[15].mxu1 }
 0x83a   : > { %v10495_v23 = vpop.f32.mrb[26].mxu0 }
 0x83b   : > { %v10497_v56 = vpop.f32.mrb[27].mxu0 }
 0x86f   : > { %v10499_v60 = vpop.f32.mrb[16].mxu1 }
 0x870   : > { %v10501_v63 = vpop.f32.mrb[17].mxu1 }
 0x873   : > { %v10503_v45 = vpop.f32.mrb[28].mxu0 }
 0x874   : > { %11562 = vst [vmem:[#allocation21_spill] sm:$0xff] %v10503_v45  ;;  %v10505_v57 = vpop.f32.mrb[29].mxu0 }
 0x875   : > { %11563 = vst [vmem:[#allocation22_spill] sm:$0xff] %v10505_v57 }
 0x877   : > { %v8306_v40 = vpop.f32.mrb[18].mxu1 }
 0x878   : > { %v2406_v61 = vpop.f32.mrb[19].mxu1  ;;  %v2691_v21 = vsel %vm1103_vm3, %v8306_v40, -inf }
 0x879   : > { %2692 = vmax.xlane.f32.xlu0 %v2691_v21  ;;  %v2688_v29 = vsel %vm1103_vm3, %v2406_v61, -inf }
 0x87a   : > { %2689 = vmax.xlane.f32.xlu1 %v2688_v29 }
 0x87b   : > { %v8313_v11 = vpop.f32.mrb[30].mxu0 }
 0x87c   : > { %v2497_v12 = vpop.f32.mrb[31].mxu0  ;;  %v2697_v4 = vsel %vm1103_vm3, %v8313_v11, -inf }
 0x87d   : > { %v2694_v14 = vsel %vm1103_vm3, %v2497_v12, -inf }
 0x87e   : > { %2698 = vmax.xlane.f32.xlu1 %v2697_v4  ;;  %2695 = vmax.xlane.f32.xlu0 %v2694_v14 }
 0x87f   : > { %v8320_v30 = vpop.f32.mrb[20].mxu1 }
 0x880   : > { %v2588_v16 = vpop.f32.mrb[21].mxu1  ;;  %v2703_v20 = vsel %vm1103_vm3, %v8320_v30, -inf }
 0x881   : > { %v2700_v2 = vsel %vm1103_vm3, %v2588_v16, -inf }
 0x882   : > { %2704 = vmax.xlane.f32.xlu1 %v2703_v20  ;;  %2701 = vmax.xlane.f32.xlu0 %v2700_v2 }
 0x883   : > { %v8327_v1 = vpop.f32.mrb[32].mxu0 }
 0x884   : > { %v2679_v39 = vpop.f32.mrb[33].mxu0  ;;  %v2709_v27 = vsel %vm1103_vm3, %v8327_v1, -inf }
 0x885   : > { %v2706_v6 = vsel %vm1103_vm3, %v2679_v39, -inf }
 0x886   : > { %2710 = vmax.xlane.f32.xlu1 %v2709_v27  ;;  %2707 = vmax.xlane.f32.xlu0 %v2706_v6 }
 0x897   : > { %3124 = vrot.lane.b32.xlu1 %v10137_v53, %s9822_s10 }
 0x89c   : > { %9206 = vrot.lane.b32.xlu0 %v10149_v5, %s9821_s26 }
 0x906   : > { %v2693_v26 = vpop.xlane.xlu0 %2692 }
 0x907   : > { %v2713_v36 = vsub.f32 %v8306_v40, %v2693_v26  ;;  %v2690_v41 = vpop.xlane.xlu1 %2689 }
 0x908   : > { %v2712_v13 = vsub.f32 %v2406_v61, %v2690_v41 }
 0x909   : > { %v2722_v0 = vmul.f32 1.442695, %v2713_v36 }
 0x90a   : > { %v2720_v44 = vmul.f32 1.442695, %v2712_v13 }
 0x90b   : > { %9480 = vpow2.f32 %v2722_v0  ;;  %v2699_v9 = vpop.xlane.xlu1 %2698  ;;  %v2696_v10 = vpop.xlane.xlu0 %2695 }
 0x90c   : > { %9482 = vpow2.f32 %v2720_v44  ;;  %v2715_v37 = vsub.f32 %v8313_v11, %v2699_v9  ;;  %v2714_v19 = vsub.f32 %v2497_v12, %v2696_v10 }
 0x90e   : > { %v2726_v24 = vmul.f32 1.442695, %v2715_v37  ;;  %v2724_v51 = vmul.f32 1.442695, %v2714_v19 }
 0x90f   : > { %v2705_v20 = vpop.xlane.xlu1 %2704  ;;  %v2702_v2 = vpop.xlane.xlu0 %2701 }
 0x910   : > { %9484 = vpow2.f32 %v2726_v24  ;;  %v2717_v27 = vsub.f32 %v8320_v30, %v2705_v20  ;;  %v2716_v6 = vsub.f32 %v2588_v16, %v2702_v2 }
 0x911   : > { %9486 = vpow2.f32 %v2724_v51 }
 0x912   : > { %v2730_v41 = vmul.f32 1.442695, %v2717_v27  ;;  %v2728_v0 = vmul.f32 1.442695, %v2716_v6 }
 0x913   : > { %v2711_v26 = vpop.xlane.xlu1 %2710  ;;  %v2708_v36 = vpop.xlane.xlu0 %2707 }
 0x914   : > { %v2719_v13 = vsub.f32 %v8327_v1, %v2711_v26  ;;  %v2718_v44 = vsub.f32 %v2679_v39, %v2708_v36  ;;  %9488 = vpow2.f32 %v2730_v41  ;;  %v9204_v26 = vunpack.i.h.bf16 %v10519_v58 }
 0x915   : > { %v10521_v21 = vpop.eup %9480  ;;  %9490 = vpow2.f32 %v2728_v0  ;;  %v9203_v36 = vunpack.i.l.bf16 %v10519_v58 }
 0x916   : > { %v10523_v29 = vpop.eup %9482  ;;  %v2739_v40 = vsel %vm1103_vm3, %v10521_v21, 0.0  ;;  %v2734_v9 = vmul.f32 1.442695, %v2719_v13  ;;  %v2732_v10 = vmul.f32 1.442695, %v2718_v44 }
 0x917   : > { %2740 = vadd.xlane.f32.xlu1 %v2739_v40  ;;  %v2736_v61 = vsel %vm1103_vm3, %v10523_v29, 0.0  ;;  %v3125_v40 = vpop.permute.xlu1 %3124  ;;  %v8800_v44 = vpack.c.bf16 %v9204_v26, %v9203_v36 }
 0x918   : > { %2737 = vadd.xlane.f32.xlu0 %v2736_v61  ;;  %9492 = vpow2.f32 %v2734_v9  ;;  %v9207_v61 = vpop.permute.xlu0 %9206 }
 0x919   : > { %9494 = vpow2.f32 %v2732_v10  ;;  %v9209_v10 = vunpack.i.h.bf16 %v9207_v61 }
 0x91a   : > { %v10529_v4 = vpop.eup %9484 }
 0x91b   : > { %v10531_v11 = vpop.eup %9486  ;;  %v2745_v12 = vsel %vm1103_vm3, %v10529_v4, 0.0 }
 0x91c   : > { %2746 = vadd.xlane.f32.xlu1 %v2745_v12  ;;  %v2742_v14 = vsel %vm1103_vm3, %v10531_v11, 0.0 }
 0x91d   : > { %2743 = vadd.xlane.f32.xlu0 %v2742_v14 }
 0x91e   : > { %v10541_v37 = vpop.eup %9488 }
 0x91f   : > { %v10543_v19 = vpop.eup %9490  ;;  %v2751_v30 = vsel %vm1103_vm3, %v10541_v37, 0.0 }
 0x920   : > { %v2748_v1 = vsel %vm1103_vm3, %v10543_v19, 0.0 }
 0x922   : > { %v10547_v16 = vpop.eup %9492 }
 0x923   : > { %v10551_v39 = vpop.eup %9494  ;;  %v2757_v24 = vsel %vm1103_vm3, %v10547_v16, 0.0 }
 0x924   : > { %v2754_v51 = vsel %vm1103_vm3, %v10551_v39, 0.0 }
 0x92d   : > { %3126 = vrot.lane.b32.xlu1 %v10185_v42, %s9822_s10 }
 0x933   : > { %9211 = vrot.lane.b32.xlu0 %v10161_v15, %s9821_s26 }
 0x951   : > { %2752 = vadd.xlane.f32.xlu1 %v2751_v30  ;;  %v9208_v30 = vunpack.i.l.bf16 %v9207_v61 }
 0x952   : > { %2749 = vadd.xlane.f32.xlu0 %v2748_v1 }
 0x955   : > { %2758 = vadd.xlane.f32.xlu1 %v2757_v24 }
 0x956   : > { %2755 = vadd.xlane.f32.xlu0 %v2754_v51 }
 0x966   : > { %9216 = vrot.lane.b32.xlu1 %v10169_v28, %s9821_s26 }
 0x96a   : > { %3306 = vrot.lane.b32.xlu1 %v10157_v22, %s9822_s10 }
 0x96c   : > { %3215 = vrot.lane.b32.xlu0 %v10187_v43, %s9822_s10 }
 0x96e   : > { %3397 = vrot.lane.b32.xlu1 %v10207_v50, %s9822_s10 }
 0x970   : > { %3217 = vrot.lane.b32.xlu0 %v10197_v17, %s9822_s10 }
 0x972   : > { %9226 = vrot.lane.b32.xlu1 %v10153_v8, %s9822_s10 }
 0x974   : > { %3308 = vrot.lane.b32.xlu0 %v10205_v49, %s9822_s10 }
 0x976   : > { %9231 = vrot.lane.b32.xlu1 %v10163_v18, %s9822_s10 }
 0x978   : > { %3399 = vrot.lane.b32.xlu0 %v10218_v55, %s9822_s10 }
 0x97a   : > { %9241 = vrot.lane.b32.xlu1 %v10141_v59, %s9823_s12 }
 0x97c   : > { %9221 = vrot.lane.b32.xlu0 %v10145_v62, %s9822_s10 }
 0x980   : > { %9236 = vrot.lane.b32.xlu0 %v10171_v32, %s9822_s10  ;;  %s7915_s10 = sshll.u32 %s9899_s9, 10 }
 0x9a4   : > { %v2741_v12 = vpop.xlane.xlu1 %2740 }
 0x9a5   : > { %9496 = vrcp.f32 %v2741_v12  ;;  %v2738_v14 = vpop.xlane.xlu0 %2737 }
 0x9a6   : > { %9498 = vrcp.f32 %v2738_v14 }
 0x9a9   : > { %v2747_v20 = vpop.xlane.xlu1 %2746 }
 0x9aa   : > { %9500 = vrcp.f32 %v2747_v20  ;;  %v2744_v2 = vpop.xlane.xlu0 %2743 }
 0x9ab   : > { %9502 = vrcp.f32 %v2744_v2 }
 0x9ae   : > { %v9212_v24 = vpop.permute.xlu0 %9211 }
 0x9af   : > { %v9497_v27 = vpop.eup %9496  ;;  %v9214_v2 = vunpack.i.h.bf16 %v9212_v24 }
 0x9b0   : > { %v9499_v6 = vpop.eup %9498  ;;  %v2763_v13 = vmul.f32 %v9497_v27, %v10521_v21  ;;  %v8806_v21 = vpack.c.bf16 %v9209_v10, %v9208_v30  ;;  %v9213_v27 = vunpack.i.l.bf16 %v9212_v24 }
 0x9b1   : > { %v2761_v41 = vmul.f32 %v9499_v6, %v10523_v29  ;;  %v3127_v29 = vpop.permute.xlu1 %3126 }
 0x9b3   : > { %8332 = vmatprep.mubr.msk.f32.mxu1 %vm1103_vm3, %v2761_v41 }
 0x9b4   : > { %v9501_v0 = vpop.eup %9500  ;;  %8333 = vmatmul.mubr.msk.f32.vlgmr.msra.gmra.mrb[22].mxu1 %vm1103_vm3, %v2763_v13 }
 0x9b5   : > { %v9503_v9 = vpop.eup %9502  ;;  %8795 = vmatpush3.bf16.msra.mxu1 %v10484_v54  ;;  %v2767_v1 = vmul.f32 %v9501_v0, %v10529_v4  ;;  %v8812_v0 = vpack.c.bf16 %v9214_v2, %v9213_v27 }
 0x9b6   : > { %8802 = vmatprep.subr.msk.bf16.mxu1 %vm10177_vm2, %v8800_v44  ;;  %v2765_v58 = vmul.f32 %v9503_v9, %v10531_v11 }
 0x9b8   : > { %8339 = vmatprep.mubr.msk.f32.mxu0 %vm1103_vm3, %v2765_v58 }
 0x9b9   : > { %8340 = vmatmul.mubr.msk.f32.vlgmr.msra.gmra.mrb[34].mxu0 %vm1103_vm3, %v2767_v1 }
 0x9ba   : > { %8799 = vmatpush3.bf16.msra.mxu0 %v10488_v25 }
 0x9bb   : > { %8808 = vmatprep.subr.msk.bf16.mxu0 %vm10177_vm2, %v8806_v21 }
 0x9de   : > { %v2753_v54 = vpop.xlane.xlu1 %2752 }
 0x9df   : > { %9504 = vrcp.f32 %v2753_v54  ;;  %v2750_v4 = vpop.xlane.xlu0 %2749 }
 0x9e0   : > { %9506 = vrcp.f32 %v2750_v4 }
 0x9e2   : > { %v2759_v51 = vpop.xlane.xlu1 %2758 }
 0x9e3   : > { %9508 = vrcp.f32 %v2759_v51  ;;  %v2756_v61 = vpop.xlane.xlu0 %2755 }
 0x9e4   : > { %9510 = vrcp.f32 %v2756_v61 }
 0x9e6   : > { %v9217_v11 = vpop.permute.xlu1 %9216 }
 0x9e7   : > { %v3216_v12 = vpop.permute.xlu0 %3215  ;;  %v9219_v9 = vunpack.i.h.bf16 %v9217_v11  ;;  %v9218_v10 = vunpack.i.l.bf16 %v9217_v11 }
 0x9e9   : > { %v9505_v14 = vpop.eup %9504  ;;  %v8818_v58 = vpack.c.bf16 %v9219_v9, %v9218_v10 }
 0x9ea   : > { %v9507_v20 = vpop.eup %9506  ;;  %v3307_v25 = vpop.permute.xlu1 %3306  ;;  %v2771_v6 = vmul.f32 %v9505_v14, %v10541_v37 }
 0x9eb   : > { %v3218_v26 = vpop.permute.xlu0 %3217  ;;  %v2769_v36 = vmul.f32 %v9507_v20, %v10543_v19 }
 0x9ed   : > { %v9509_v41 = vpop.eup %9508  ;;  %8346 = vmatprep.mubr.msk.f32.mxu1 %vm1103_vm3, %v2769_v36 }
 0x9ee   : > { %v9511_v13 = vpop.eup %9510  ;;  %8347 = vmatmul.mubr.msk.f32.vlgmr.msra.gmra.mrb[24].mxu1 %vm1103_vm3, %v2771_v6  ;;  %v3398_v30 = vpop.permute.xlu1 %3397  ;;  %v2775_v1 = vmul.f32 %v9509_v41, %v10547_v16 }
 0x9ef   : > { %8805 = vmatpush3.bf16.xpose.msk.msra.mxu1 %vm10177_vm2, %v8800_v44  ;;  %8360 = vmatprep.mubr.msk.f32.mxu1 %vm744_vm1, %v3125_v40  ;;  %v3309_v37 = vpop.permute.xlu0 %3308  ;;  %v2773_v19 = vmul.f32 %v9511_v13, %v10551_v39 }
 0x9f0   : > { %8814 = vmatprep.subr.msk.bf16.mxu1 %vm10177_vm2, %v8812_v0 }
 0x9f1   : > { %8353 = vmatprep.mubr.msk.f32.mxu0 %vm1103_vm3, %v2773_v19 }
 0x9f2   : > { %8354 = vmatmul.mubr.msk.f32.vlgmr.msra.gmra.mrb[36].mxu0 %vm1103_vm3, %v2775_v1  ;;  %v9227_v24 = vpop.permute.xlu1 %9226 }
 0x9f3   : > { %8811 = vmatpush3.bf16.xpose.msk.msra.mxu0 %vm10177_vm2, %v8806_v21  ;;  %8367 = vmatprep.mubr.msk.f32.mxu0 %vm744_vm1, %v3216_v12  ;;  %v3400_v16 = vpop.permute.xlu0 %3399  ;;  %v9229_v40 = vunpack.i.h.bf16 %v9227_v24  ;;  %v9228_v39 = vunpack.i.l.bf16 %v9227_v24 }
 0x9f4   : > { %8820 = vmatprep.subr.msk.bf16.mxu0 %vm10177_vm2, %v8818_v58 }
 0x9f5   : > { %v8828_v11 = vpack.c.bf16 %v9229_v40, %v9228_v39 }
 0x9f6   : > { %8361 = vmatmul.mubr.msk.f32.vlgmr.msra.gmra.mrb[26].mxu1 %vm744_vm1, %v3127_v29  ;;  %v9232_v44 = vpop.permute.xlu1 %9231 }
 0x9f7   : > { %8817 = vmatpush3.bf16.xpose.msk.msra.mxu1 %vm10177_vm2, %v8812_v0  ;;  %8374 = vmatprep.mubr.msk.f32.mxu1 %vm744_vm1, %v3307_v25  ;;  %v9222_v54 = vpop.permute.xlu0 %9221  ;;  %v9234_v21 = vunpack.i.h.bf16 %v9232_v44  ;;  %v9233_v61 = vunpack.i.l.bf16 %v9232_v44 }
 0x9f8   : > { %v9224_v4 = vunpack.i.h.bf16 %v9222_v54  ;;  %v9223_v51 = vunpack.i.l.bf16 %v9222_v54 }
 0x9f9   : > { %v10624_v2 = vpack.c.bf16 %v9234_v21, %v9233_v61 }
 0x9fa   : > { %8368 = vmatmul.mubr.msk.f32.vlgmr.msra.gmra.mrb[38].mxu0 %vm744_vm1, %v3218_v26  ;;  %v8824_v12 = vpack.c.bf16 %v9224_v4, %v9223_v51 }
 0x9fb   : > { %8823 = vmatpush3.bf16.xpose.msk.msra.mxu0 %vm10177_vm2, %v8818_v58  ;;  %8381 = vmatprep.mubr.msk.f32.mxu0 %vm744_vm1, %v3398_v30  ;;  %v9237_v29 = vpop.permute.xlu0 %9236 }
 0x9fc   : > { %8829 = vmatprep.subr.bf16.mxu0 %v8828_v11  ;;  %8825 = vmatprep.subr.bf16.mxu1 %v8824_v12  ;;  %v9239_v14 = vunpack.i.h.bf16 %v9237_v29  ;;  %v9238_v20 = vunpack.i.l.bf16 %v9237_v29 }
 0x9fe   : > { %8375 = vmatmul.mubr.msk.f32.vlgmr.msra.gmra.mrb[28].mxu1 %vm744_vm1, %v3309_v37  ;;  %v10628_v27 = vpack.c.bf16 %v9239_v14, %v9238_v20 }
 0x9ff   : > { %8827 = vmatpush3.bf16.msra.mxu1 %v8824_v12 }
 0xa00   : > { %8833 = vmatprep.subr.bf16.mxu1 %v10624_v2 }
 0xa02   : > { %8382 = vmatmul.mubr.msk.f32.vlgmr.msra.gmra.mrb[40].mxu0 %vm744_vm1, %v3400_v16 }
 0xa03   : > { %8831 = vmatpush3.bf16.msra.mxu0 %v8828_v11  ;;  %v10659_v11 = vpop.permute.xlu1 %9241 }
 0xa04   : > { %8837 = vmatprep.subr.bf16.mxu0 %v10628_v27 }
 0xa87   : > { %v10631_v25 = vpop.f32.mrb[22].mxu1 }
 0xa88   : > { %v10633_v6 = vpop.f32.mrb[23].mxu1 }
 0xa8c   : > { %v10635_v26 = vpop.f32.mrb[34].mxu0 }
 0xa8d   : > { %v10637_v36 = vpop.f32.mrb[35].mxu0 }
 0xac1   : > { %v10639_v41 = vpop.f32.mrb[24].mxu1 }
 0xac2   : > { %v10641_v13 = vpop.f32.mrb[25].mxu1 }
 0xac5   : > { %v10643_v0 = vpop.f32.mrb[36].mxu0 }
 0xac6   : > { %11564 = vst [vmem:[#allocation23_spill] sm:$0xff] %v10643_v0  ;;  %v10645_v9 = vpop.f32.mrb[37].mxu0 }
 0xac7   : > { %11565 = vst [vmem:[#allocation24_spill] sm:$0xff] %v10645_v9 }
 0xac9   : > { %v8362_v10 = vpop.f32.mrb[26].mxu1 }
 0xaca   : > { %v3206_v30 = vpop.f32.mrb[27].mxu1  ;;  %v3491_v1 = vsel %vm1103_vm3, %v8362_v10, -inf }
 0xacb   : > { %3492 = vmax.xlane.f32.xlu0 %v3491_v1  ;;  %v3488_v37 = vsel %vm1103_vm3, %v3206_v30, -inf }
 0xacc   : > { %3489 = vmax.xlane.f32.xlu1 %v3488_v37 }
 0xacd   : > { %v8369_v19 = vpop.f32.mrb[38].mxu0 }
 0xace   : > { %v3297_v58 = vpop.f32.mrb[39].mxu0  ;;  %v3497_v24 = vsel %vm1103_vm3, %v8369_v19, -inf }
 0xacf   : > { %v3494_v16 = vsel %vm1103_vm3, %v3297_v58, -inf }
 0xad0   : > { %3498 = vmax.xlane.f32.xlu1 %v3497_v24  ;;  %3495 = vmax.xlane.f32.xlu0 %v3494_v16 }
 0xad1   : > { %v8376_v40 = vpop.f32.mrb[28].mxu1 }
 0xad2   : > { %v3388_v39 = vpop.f32.mrb[29].mxu1  ;;  %v3503_v44 = vsel %vm1103_vm3, %v8376_v40, -inf }
 0xad3   : > { %v3500_v54 = vsel %vm1103_vm3, %v3388_v39, -inf }
 0xad4   : > { %3504 = vmax.xlane.f32.xlu1 %v3503_v44  ;;  %3501 = vmax.xlane.f32.xlu0 %v3500_v54 }
 0xad5   : > { %v8383_v4 = vpop.f32.mrb[40].mxu0 }
 0xad6   : > { %v3479_v51 = vpop.f32.mrb[41].mxu0  ;;  %v3509_v21 = vsel %vm1103_vm3, %v8383_v4, -inf }
 0xad7   : > { %v3506_v61 = vsel %vm1103_vm3, %v3479_v51, -inf }
 0xad8   : > { %3510 = vmax.xlane.f32.xlu1 %v3509_v21  ;;  %3507 = vmax.xlane.f32.xlu0 %v3506_v61 }
 0xae9   : > { %3924 = vrot.lane.b32.xlu1 %v10137_v53, %s9824_s13 }
 0xaee   : > { %9246 = vrot.lane.b32.xlu0 %v10149_v5, %s9823_s12 }
 0xb58   : > { %v3493_v12 = vpop.xlane.xlu0 %3492 }
 0xb59   : > { %v3513_v29 = vsub.f32 %v8362_v10, %v3493_v12  ;;  %v3490_v14 = vpop.xlane.xlu1 %3489 }
 0xb5a   : > { %v3512_v20 = vsub.f32 %v3206_v30, %v3490_v14 }
 0xb5b   : > { %v3522_v1 = vmul.f32 1.442695, %v3513_v29 }
 0xb5c   : > { %v3520_v37 = vmul.f32 1.442695, %v3512_v20 }
 0xb5d   : > { %9512 = vpow2.f32 %v3522_v1  ;;  %v3499_v24 = vpop.xlane.xlu1 %3498  ;;  %v3496_v16 = vpop.xlane.xlu0 %3495 }
 0xb5e   : > { %9514 = vpow2.f32 %v3520_v37  ;;  %v3515_v44 = vsub.f32 %v8369_v19, %v3499_v24  ;;  %v3514_v54 = vsub.f32 %v3297_v58, %v3496_v16 }
 0xb60   : > { %v3526_v21 = vmul.f32 1.442695, %v3515_v44  ;;  %v3524_v61 = vmul.f32 1.442695, %v3514_v54 }
 0xb61   : > { %v3505_v14 = vpop.xlane.xlu1 %3504  ;;  %v3502_v20 = vpop.xlane.xlu0 %3501 }
 0xb62   : > { %9516 = vpow2.f32 %v3526_v21  ;;  %v3517_v1 = vsub.f32 %v8376_v40, %v3505_v14  ;;  %v3516_v37 = vsub.f32 %v3388_v39, %v3502_v20 }
 0xb63   : > { %9518 = vpow2.f32 %v3524_v61 }
 0xb64   : > { %v3530_v44 = vmul.f32 1.442695, %v3517_v1  ;;  %v3528_v21 = vmul.f32 1.442695, %v3516_v37 }
 0xb65   : > { %v3511_v24 = vpop.xlane.xlu1 %3510  ;;  %v3508_v16 = vpop.xlane.xlu0 %3507 }
 0xb66   : > { %v3519_v54 = vsub.f32 %v8383_v4, %v3511_v24  ;;  %v3518_v61 = vsub.f32 %v3479_v51, %v3508_v16  ;;  %9520 = vpow2.f32 %v3530_v44 }
 0xb67   : > { %v10661_v46 = vpop.eup %9512  ;;  %9522 = vpow2.f32 %v3528_v21 }
 0xb68   : > { %v10663_v48 = vpop.eup %9514  ;;  %v3539_v10 = vsel %vm1103_vm3, %v10661_v46, 0.0 }
 0xb69   : > { %3540 = vadd.xlane.f32.xlu1 %v3539_v10  ;;  %v3536_v30 = vsel %vm1103_vm3, %v10663_v48, 0.0  ;;  %v3534_v10 = vmul.f32 1.442695, %v3519_v54  ;;  %v3925_v1 = vpop.permute.xlu1 %3924  ;;  %v9247_v37 = vpop.permute.xlu0 %9246 }
 0xb6a   : > { %3537 = vadd.xlane.f32.xlu0 %v3536_v30  ;;  %v3532_v30 = vmul.f32 1.442695, %v3518_v61 }
 0xb6b   : > { %9524 = vpow2.f32 %v3534_v10  ;;  %v9244_v10 = vunpack.i.h.bf16 %v10659_v11 }
 0xb6c   : > { %v10669_v12 = vpop.eup %9516  ;;  %9526 = vpow2.f32 %v3532_v30  ;;  %v9243_v30 = vunpack.i.l.bf16 %v10659_v11 }
 0xb6d   : > { %v10671_v19 = vpop.eup %9518  ;;  %v3545_v58 = vsel %vm1103_vm3, %v10669_v12, 0.0 }
 0xb6e   : > { %3546 = vadd.xlane.f32.xlu1 %v3545_v58  ;;  %v3542_v29 = vsel %vm1103_vm3, %v10671_v19, 0.0 }
 0xb6f   : > { %3543 = vadd.xlane.f32.xlu0 %v3542_v29 }
 0xb70   : > { %v10681_v58 = vpop.eup %9520 }
 0xb71   : > { %v10683_v29 = vpop.eup %9522  ;;  %v3551_v40 = vsel %vm1103_vm3, %v10681_v58, 0.0 }
 0xb72   : > { %v3548_v4 = vsel %vm1103_vm3, %v10683_v29, 0.0 }
 0xb75   : > { %v10687_v39 = vpop.eup %9524 }
 0xb76   : > { %v10691_v51 = vpop.eup %9526  ;;  %v3557_v14 = vsel %vm1103_vm3, %v10687_v39, 0.0 }
 0xb77   : > { %v3554_v20 = vsel %vm1103_vm3, %v10691_v51, 0.0 }
 0xb7f   : > { %3926 = vrot.lane.b32.xlu1 %v10185_v42, %s9824_s13 }
 0xb85   : > { %9251 = vrot.lane.b32.xlu0 %v10161_v15, %s9823_s12 }
 0xba3   : > { %3552 = vadd.xlane.f32.xlu1 %v3551_v40 }
 0xba4   : > { %3549 = vadd.xlane.f32.xlu0 %v3548_v4 }
 0xba7   : > { %3558 = vadd.xlane.f32.xlu1 %v3557_v14 }
 0xba8   : > { %3555 = vadd.xlane.f32.xlu0 %v3554_v20  ;;  %v8840_v20 = vpack.c.bf16 %v9244_v10, %v9243_v30 }
 0xbb8   : > { %9256 = vrot.lane.b32.xlu1 %v10169_v28, %s9823_s12 }
 0xbbc   : > { %4106 = vrot.lane.b32.xlu1 %v10157_v22, %s9824_s13 }
 0xbbe   : > { %4015 = vrot.lane.b32.xlu0 %v10187_v43, %s9824_s13 }
 0xbc0   : > { %4197 = vrot.lane.b32.xlu1 %v10207_v50, %s9824_s13 }
 0xbc2   : > { %4017 = vrot.lane.b32.xlu0 %v10197_v17, %s9824_s13 }
 0xbc4   : > { %9266 = vrot.lane.b32.xlu1 %v10153_v8, %s9824_s13 }
 0xbc6   : > { %4108 = vrot.lane.b32.xlu0 %v10205_v49, %s9824_s13 }
 0xbc8   : > { %9271 = vrot.lane.b32.xlu1 %v10163_v18, %s9824_s13 }
 0xbca   : > { %4199 = vrot.lane.b32.xlu0 %v10218_v55, %s9824_s13 }
 0xbcc   : > { %9281 = vrot.lane.b32.xlu1 %v10141_v59, %s9825_s18 }
 0xbce   : > { %9261 = vrot.lane.b32.xlu0 %v10145_v62, %s9824_s13 }
 0xbd2   : > { %9276 = vrot.lane.b32.xlu0 %v10171_v32, %s9824_s13 }
 0xbf6   : > { %v3541_v24 = vpop.xlane.xlu1 %3540 }
 0xbf7   : > { %9528 = vrcp.f32 %v3541_v24  ;;  %v3538_v16 = vpop.xlane.xlu0 %3537 }
 0xbf8   : > { %9530 = vrcp.f32 %v3538_v16  ;;  %v9249_v16 = vunpack.i.h.bf16 %v9247_v37 }
 0xbfb   : > { %v3547_v44 = vpop.xlane.xlu1 %3546 }
 0xbfc   : > { %9532 = vrcp.f32 %v3547_v44  ;;  %v3544_v54 = vpop.xlane.xlu0 %3543  ;;  %v9248_v44 = vunpack.i.l.bf16 %v9247_v37 }
 0xbfd   : > { %9534 = vrcp.f32 %v3544_v54 }
 0xbff   : > { %v3927_v11 = vpop.permute.xlu1 %3926 }
 0xc00   : > { %v9252_v37 = vpop.permute.xlu0 %9251 }
 0xc01   : > { %v9529_v21 = vpop.eup %9528 }
 0xc02   : > { %v9531_v61 = vpop.eup %9530  ;;  %v3563_v4 = vmul.f32 %v9529_v21, %v10661_v46  ;;  %v8846_v46 = vpack.c.bf16 %v9249_v16, %v9248_v44 }
 0xc03   : > { %v3561_v40 = vmul.f32 %v9531_v61, %v10663_v48 }
 0xc05   : > { %8388 = vmatprep.mubr.msk.f32.mxu1 %vm1103_vm3, %v3561_v40 }
 0xc06   : > { %v9533_v14 = vpop.eup %9532  ;;  %8389 = vmatmul.mubr.msk.f32.vlgmr.msra.gmra.mrb[30].mxu1 %vm1103_vm3, %v3563_v4  ;;  %v9254_v4 = vunpack.i.h.bf16 %v9252_v37 }
 0xc07   : > { %v9535_v24 = vpop.eup %9534  ;;  %8835 = vmatpush3.bf16.msra.mxu1 %v10624_v2  ;;  %v3567_v54 = vmul.f32 %v9533_v14, %v10669_v12  ;;  %v9253_v14 = vunpack.i.l.bf16 %v9252_v37 }
 0xc08   : > { %8842 = vmatprep.subr.msk.bf16.mxu1 %vm10177_vm2, %v8840_v20  ;;  %v3565_v48 = vmul.f32 %v9535_v24, %v10671_v19 }
 0xc0a   : > { %8395 = vmatprep.mubr.msk.f32.mxu0 %vm1103_vm3, %v3565_v48 }
 0xc0b   : > { %8396 = vmatmul.mubr.msk.f32.vlgmr.msra.gmra.mrb[42].mxu0 %vm1103_vm3, %v3567_v54 }
 0xc0c   : > { %8839 = vmatpush3.bf16.msra.mxu0 %v10628_v27 }
 0xc0d   : > { %8848 = vmatprep.subr.msk.bf16.mxu0 %vm10177_vm2, %v8846_v46 }
 0xc30   : > { %v3553_v2 = vpop.xlane.xlu1 %3552 }
 0xc31   : > { %9536 = vrcp.f32 %v3553_v2  ;;  %v3550_v12 = vpop.xlane.xlu0 %3549  ;;  %v8852_v2 = vpack.c.bf16 %v9254_v4, %v9253_v14 }
 0xc32   : > { %9538 = vrcp.f32 %v3550_v12 }
 0xc34   : > { %v3559_v21 = vpop.xlane.xlu1 %3558 }
 0xc35   : > { %9540 = vrcp.f32 %v3559_v21  ;;  %v3556_v61 = vpop.xlane.xlu0 %3555 }
 0xc36   : > { %9542 = vrcp.f32 %v3556_v61 }
 0xc38   : > { %v9257_v19 = vpop.permute.xlu1 %9256 }
 0xc39   : > { %v4016_v10 = vpop.permute.xlu0 %4015  ;;  %v9259_v12 = vunpack.i.h.bf16 %v9257_v19  ;;  %v9258_v21 = vunpack.i.l.bf16 %v9257_v19 }
 0xc3b   : > { %v9537_v30 = vpop.eup %9536  ;;  %v8858_v37 = vpack.c.bf16 %v9259_v12, %v9258_v21 }
 0xc3c   : > { %v9539_v40 = vpop.eup %9538  ;;  %v4107_v27 = vpop.permute.xlu1 %4106  ;;  %v3571_v24 = vmul.f32 %v9537_v30, %v10681_v58 }
 0xc3d   : > { %v4018_v16 = vpop.permute.xlu0 %4017  ;;  %v3569_v44 = vmul.f32 %v9539_v40, %v10683_v29 }
 0xc3f   : > { %v9541_v54 = vpop.eup %9540  ;;  %8402 = vmatprep.mubr.msk.f32.mxu1 %vm1103_vm3, %v3569_v44 }
 0xc40   : > { %v9543_v48 = vpop.eup %9542  ;;  %8403 = vmatmul.mubr.msk.f32.vlgmr.msra.gmra.mrb[32].mxu1 %vm1103_vm3, %v3571_v24  ;;  %v4198_v61 = vpop.permute.xlu1 %4197  ;;  %v3575_v7 = vmul.f32 %v9541_v54, %v10687_v39 }
 0xc41   : > { %8845 = vmatpush3.bf16.xpose.msk.msra.mxu1 %vm10177_vm2, %v8840_v20  ;;  %8416 = vmatprep.mubr.msk.f32.mxu1 %vm744_vm1, %v3925_v1  ;;  %v4109_v58 = vpop.permute.xlu0 %4108  ;;  %v3573_v29 = vmul.f32 %v9543_v48, %v10691_v51 }
 0xc42   : > { %8854 = vmatprep.subr.msk.bf16.mxu1 %vm10177_vm2, %v8852_v2 }
 0xc43   : > { %8409 = vmatprep.mubr.msk.f32.mxu0 %vm1103_vm3, %v3573_v29 }
 0xc44   : > { %8410 = vmatmul.mubr.msk.f32.vlgmr.msra.gmra.mrb[44].mxu0 %vm1103_vm3, %v3575_v7  ;;  %v9267_v19 = vpop.permute.xlu1 %9266 }
 0xc45   : > { %8851 = vmatpush3.bf16.xpose.msk.msra.mxu0 %vm10177_vm2, %v8846_v46  ;;  %8423 = vmatprep.mubr.msk.f32.mxu0 %vm744_vm1, %v4016_v10  ;;  %v4200_v39 = vpop.permute.xlu0 %4199  ;;  %v9269_v1 = vunpack.i.h.bf16 %v9267_v19  ;;  %v9268_v51 = vunpack.i.l.bf16 %v9267_v19 }
 0xc46   : > { %8860 = vmatprep.subr.msk.bf16.mxu0 %vm10177_vm2, %v8858_v37 }
 0xc47   : > { %v8868_v10 = vpack.c.bf16 %v9269_v1, %v9268_v51 }
 0xc48   : > { %8417 = vmatmul.mubr.msk.f32.vlgmr.msra.gmra.mrb[34].mxu1 %vm744_vm1, %v3927_v11  ;;  %v9272_v7 = vpop.permute.xlu1 %9271 }
 0xc49   : > { %8857 = vmatpush3.bf16.xpose.msk.msra.mxu1 %vm10177_vm2, %v8852_v2  ;;  %8430 = vmatprep.mubr.msk.f32.mxu1 %vm744_vm1, %v4107_v27  ;;  %v9262_v20 = vpop.permute.xlu0 %9261  ;;  %v9274_v46 = vunpack.i.h.bf16 %v9272_v7  ;;  %v9273_v4 = vunpack.i.l.bf16 %v9272_v7 }
 0xc4a   : > { %v9264_v30 = vunpack.i.h.bf16 %v9262_v20  ;;  %v9263_v40 = vunpack.i.l.bf16 %v9262_v20 }
 0xc4b   : > { %v10764_v44 = vpack.c.bf16 %v9274_v46, %v9273_v4 }
 0xc4c   : > { %8424 = vmatmul.mubr.msk.f32.vlgmr.msra.gmra.mrb[46].mxu0 %vm744_vm1, %v4018_v16  ;;  %v8864_v14 = vpack.c.bf16 %v9264_v30, %v9263_v40 }
 0xc4d   : > { %8863 = vmatpush3.bf16.xpose.msk.msra.mxu0 %vm10177_vm2, %v8858_v37  ;;  %8437 = vmatprep.mubr.msk.f32.mxu0 %vm744_vm1, %v4198_v61  ;;  %v9277_v11 = vpop.permute.xlu0 %9276 }
 0xc4e   : > { %8869 = vmatprep.subr.bf16.mxu0 %v8868_v10  ;;  %8865 = vmatprep.subr.bf16.mxu1 %v8864_v14  ;;  %v9279_v24 = vunpack.i.h.bf16 %v9277_v11  ;;  %v9278_v27 = vunpack.i.l.bf16 %v9277_v11 }
 0xc50   : > { %8431 = vmatmul.mubr.msk.f32.vlgmr.msra.gmra.mrb[36].mxu1 %vm744_vm1, %v4109_v58  ;;  %v10768_v16 = vpack.c.bf16 %v9279_v24, %v9278_v27 }
 0xc51   : > { %8867 = vmatpush3.bf16.msra.mxu1 %v8864_v14 }
 0xc52   : > { %8873 = vmatprep.subr.bf16.mxu1 %v10764_v44 }
 0xc54   : > { %8438 = vmatmul.mubr.msk.f32.vlgmr.msra.gmra.mrb[48].mxu0 %vm744_vm1, %v4200_v39 }
 0xc55   : > { %8871 = vmatpush3.bf16.msra.mxu0 %v8868_v10 }
 0xc56   : > { %8877 = vmatprep.subr.bf16.mxu0 %v10768_v16 }
 0xcd9   : > { %v10771_v54 = vpop.f32.mrb[30].mxu1 }
 0xcda   : > { %v10773_v48 = vpop.f32.mrb[31].mxu1 }
 0xcde   : > { %v10775_v2 = vpop.f32.mrb[42].mxu0 }
 0xcdf   : > { %v10777_v12 = vpop.f32.mrb[43].mxu0 }
 0xd13   : > { %v10779_v21 = vpop.f32.mrb[32].mxu1 }
 0xd14   : > { %11566 = vst [vmem:[#allocation25_spill] sm:$0xff] %v10779_v21  ;;  %v10781_v61 = vpop.f32.mrb[33].mxu1 }
 0xd17   : > { %v10783_v58 = vpop.f32.mrb[44].mxu0 }
 0xd18   : > { %11567 = vst [vmem:[#allocation26_spill] sm:$0xff] %v10783_v58  ;;  %v10785_v29 = vpop.f32.mrb[45].mxu0 }
 0xd19   : > { %11568 = vst [vmem:[#allocation27_spill] sm:$0xff] %v10785_v29 }
 0xd1b   : > { %v8418_v37 = vpop.f32.mrb[34].mxu1 }
 0xd1c   : > { %v4006_v19 = vpop.f32.mrb[35].mxu1  ;;  %v4291_v39 = vsel %vm1103_vm3, %v8418_v37, -inf }
 0xd1d   : > { %4292 = vmax.xlane.f32.xlu0 %v4291_v39  ;;  %v4288_v1 = vsel %vm1103_vm3, %v4006_v19, -inf  ;;  %v10799_v39 = vpop.permute.xlu1 %9281 }
 0xd1e   : > { %4289 = vmax.xlane.f32.xlu1 %v4288_v1 }
 0xd1f   : > { %v8425_v51 = vpop.f32.mrb[46].mxu0 }
 0xd20   : > { %v4097_v7 = vpop.f32.mrb[47].mxu0  ;;  %v4297_v20 = vsel %vm1103_vm3, %v8425_v51, -inf }
 0xd21   : > { %v4294_v30 = vsel %vm1103_vm3, %v4097_v7, -inf }
 0xd22   : > { %4298 = vmax.xlane.f32.xlu1 %v4297_v20  ;;  %4295 = vmax.xlane.f32.xlu0 %v4294_v30 }
 0xd23   : > { %v8432_v40 = vpop.f32.mrb[36].mxu1 }
 0xd24   : > { %v4188_v46 = vpop.f32.mrb[37].mxu1  ;;  %v4303_v4 = vsel %vm1103_vm3, %v8432_v40, -inf }
 0xd25   : > { %v4300_v10 = vsel %vm1103_vm3, %v4188_v46, -inf }
 0xd26   : > { %4304 = vmax.xlane.f32.xlu1 %v4303_v4  ;;  %4301 = vmax.xlane.f32.xlu0 %v4300_v10 }
 0xd27   : > { %v8439_v14 = vpop.f32.mrb[48].mxu0 }
 0xd28   : > { %v4279_v11 = vpop.f32.mrb[49].mxu0  ;;  %v4309_v24 = vsel %vm1103_vm3, %v8439_v14, -inf }
 0xd29   : > { %v4306_v27 = vsel %vm1103_vm3, %v4279_v11, -inf }
 0xd2a   : > { %4310 = vmax.xlane.f32.xlu1 %v4309_v24  ;;  %4307 = vmax.xlane.f32.xlu0 %v4306_v27 }
 0xd3b   : > { %4724 = vrot.lane.b32.xlu1 %v10137_v53, %s9826_s19 }
 0xd40   : > { %9286 = vrot.lane.b32.xlu0 %v10149_v5, %s9825_s18 }
 0xdaa   : > { %v4293_v1 = vpop.xlane.xlu0 %4292 }
 0xdab   : > { %v4313_v20 = vsub.f32 %v8418_v37, %v4293_v1  ;;  %v4290_v30 = vpop.xlane.xlu1 %4289 }
 0xdac   : > { %v4312_v4 = vsub.f32 %v4006_v19, %v4290_v30 }
 0xdad   : > { %v4322_v10 = vmul.f32 1.442695, %v4313_v20 }
 0xdae   : > { %v4320_v31 = vmul.f32 1.442695, %v4312_v4 }
 0xdaf   : > { %9544 = vpow2.f32 %v4322_v10  ;;  %v4299_v38 = vpop.xlane.xlu1 %4298  ;;  %v4296_v33 = vpop.xlane.xlu0 %4295 }
 0xdb0   : > { %9546 = vpow2.f32 %v4320_v31  ;;  %v4315_v24 = vsub.f32 %v8425_v51, %v4299_v38  ;;  %v4314_v27 = vsub.f32 %v4097_v7, %v4296_v33 }
 0xdb2   : > { %v4326_v47 = vmul.f32 1.442695, %v4315_v24  ;;  %v4324_v34 = vmul.f32 1.442695, %v4314_v27 }
 0xdb3   : > { %v4305_v33 = vpop.xlane.xlu1 %4304  ;;  %v4302_v31 = vpop.xlane.xlu0 %4301 }
 0xdb4   : > { %9548 = vpow2.f32 %v4326_v47  ;;  %v4317_v51 = vsub.f32 %v8432_v40, %v4305_v33  ;;  %v4316_v7 = vsub.f32 %v4188_v46, %v4302_v31 }
 0xdb5   : > { %9550 = vpow2.f32 %v4324_v34 }
 0xdb6   : > { %v4330_v4 = vmul.f32 1.442695, %v4317_v51  ;;  %v4328_v24 = vmul.f32 1.442695, %v4316_v7 }
 0xdb7   : > { %v4311_v20 = vpop.xlane.xlu1 %4310  ;;  %v4308_v30 = vpop.xlane.xlu0 %4307 }
 0xdb8   : > { %v4319_v10 = vsub.f32 %v8439_v14, %v4311_v20  ;;  %v4318_v27 = vsub.f32 %v4279_v11, %v4308_v30  ;;  %9552 = vpow2.f32 %v4330_v4 }
 0xdb9   : > { %v10801_v58 = vpop.eup %9544  ;;  %9554 = vpow2.f32 %v4328_v24 }
 0xdba   : > { %v10803_v29 = vpop.eup %9546  ;;  %v4339_v37 = vsel %vm1103_vm3, %v10801_v58, 0.0 }
 0xdbb   : > { %4340 = vadd.xlane.f32.xlu1 %v4339_v37  ;;  %v4336_v19 = vsel %vm1103_vm3, %v10803_v29, 0.0  ;;  %v4334_v37 = vmul.f32 1.442695, %v4319_v10  ;;  %v4725_v51 = vpop.permute.xlu1 %4724  ;;  %v9287_v7 = vpop.permute.xlu0 %9286 }
 0xdbc   : > { %4337 = vadd.xlane.f32.xlu0 %v4336_v19  ;;  %v4332_v19 = vmul.f32 1.442695, %v4318_v27 }
 0xdbd   : > { %9556 = vpow2.f32 %v4334_v37  ;;  %v9284_v37 = vunpack.i.h.bf16 %v10799_v39 }
 0xdbe   : > { %v10809_v1 = vpop.eup %9548  ;;  %9558 = vpow2.f32 %v4332_v19  ;;  %v9283_v19 = vunpack.i.l.bf16 %v10799_v39 }
 0xdbf   : > { %v10811_v38 = vpop.eup %9550  ;;  %v4345_v47 = vsel %vm1103_vm3, %v10809_v1, 0.0 }
 0xdc0   : > { %4346 = vadd.xlane.f32.xlu1 %v4345_v47  ;;  %v4342_v34 = vsel %vm1103_vm3, %v10811_v38, 0.0 }
 0xdc1   : > { %4343 = vadd.xlane.f32.xlu0 %v4342_v34 }
 0xdc2   : > { %v10821_v47 = vpop.eup %9552 }
 0xdc3   : > { %v10823_v34 = vpop.eup %9554  ;;  %v4351_v40 = vsel %vm1103_vm3, %v10821_v47, 0.0 }
 0xdc4   : > { %v4348_v14 = vsel %vm1103_vm3, %v10823_v34, 0.0 }
 0xdc7   : > { %v10827_v46 = vpop.eup %9556 }
 0xdc8   : > { %v10831_v11 = vpop.eup %9558  ;;  %v4357_v33 = vsel %vm1103_vm3, %v10827_v46, 0.0 }
 0xdc9   : > { %v4354_v31 = vsel %vm1103_vm3, %v10831_v11, 0.0 }
 0xdd1   : > { %4726 = vrot.lane.b32.xlu1 %v10185_v42, %s9826_s19 }
 0xdd7   : > { %9291 = vrot.lane.b32.xlu0 %v10161_v15, %s9825_s18 }
 0xdf5   : > { %4352 = vadd.xlane.f32.xlu1 %v4351_v40 }
 0xdf6   : > { %4349 = vadd.xlane.f32.xlu0 %v4348_v14 }
 0xdf9   : > { %4358 = vadd.xlane.f32.xlu1 %v4357_v33 }
 0xdfa   : > { %4355 = vadd.xlane.f32.xlu0 %v4354_v31  ;;  %v8880_v31 = vpack.c.bf16 %v9284_v37, %v9283_v19 }
 0xe0a   : > { %9296 = vrot.lane.b32.xlu1 %v10169_v28, %s9825_s18 }
 0xe0e   : > { %4906 = vrot.lane.b32.xlu1 %v10157_v22, %s9826_s19 }
 0xe10   : > { %4815 = vrot.lane.b32.xlu0 %v10187_v43, %s9826_s19 }
 0xe12   : > { %4997 = vrot.lane.b32.xlu1 %v10207_v50, %s9826_s19 }
 0xe14   : > { %4817 = vrot.lane.b32.xlu0 %v10197_v17, %s9826_s19 }
 0xe16   : > { %9306 = vrot.lane.b32.xlu1 %v10153_v8, %s9826_s19 }
 0xe18   : > { %4908 = vrot.lane.b32.xlu0 %v10205_v49, %s9826_s19 }
 0xe1a   : > { %9311 = vrot.lane.b32.xlu1 %v10163_v18, %s9826_s19 }
 0xe1c   : > { %4999 = vrot.lane.b32.xlu0 %v10218_v55, %s9826_s19 }
 0xe1e   : > { %9321 = vrot.lane.b32.xlu1 %v10141_v59, %s9827_s29 }
 0xe20   : > { %9301 = vrot.lane.b32.xlu0 %v10145_v62, %s9826_s19 }
 0xe24   : > { %9316 = vrot.lane.b32.xlu0 %v10171_v32, %s9826_s19  ;;  %s11475_s19 = scalar_lea.hbm %s11536_s8, %s7915_s10 }
 0xe48   : > { %v4341_v20 = vpop.xlane.xlu1 %4340 }
 0xe49   : > { %9560 = vrcp.f32 %v4341_v20  ;;  %v4338_v30 = vpop.xlane.xlu0 %4337 }
 0xe4a   : > { %9562 = vrcp.f32 %v4338_v30  ;;  %v9289_v30 = vunpack.i.h.bf16 %v9287_v7 }
 0xe4d   : > { %v4347_v4 = vpop.xlane.xlu1 %4346 }
 0xe4e   : > { %9564 = vrcp.f32 %v4347_v4  ;;  %v4344_v10 = vpop.xlane.xlu0 %4343  ;;  %v9288_v4 = vunpack.i.l.bf16 %v9287_v7 }
 0xe4f   : > { %9566 = vrcp.f32 %v4344_v10 }
 0xe51   : > { %v4727_v39 = vpop.permute.xlu1 %4726 }
 0xe52   : > { %v9292_v7 = vpop.permute.xlu0 %9291 }
 0xe53   : > { %v9561_v24 = vpop.eup %9560 }
 0xe54   : > { %v9563_v27 = vpop.eup %9562  ;;  %v4363_v14 = vmul.f32 %v9561_v24, %v10801_v58  ;;  %v8886_v58 = vpack.c.bf16 %v9289_v30, %v9288_v4 }
 0xe55   : > { %v4361_v40 = vmul.f32 %v9563_v27, %v10803_v29 }
 0xe57   : > { %8444 = vmatprep.mubr.msk.f32.mxu1 %vm1103_vm3, %v4361_v40 }
 0xe58   : > { %v9565_v33 = vpop.eup %9564  ;;  %8445 = vmatmul.mubr.msk.f32.vlgmr.msra.gmra.mrb[38].mxu1 %vm1103_vm3, %v4363_v14  ;;  %v9294_v14 = vunpack.i.h.bf16 %v9292_v7 }
 0xe59   : > { %v9567_v20 = vpop.eup %9566  ;;  %8875 = vmatpush3.bf16.msra.mxu1 %v10764_v44  ;;  %v4367_v10 = vmul.f32 %v9565_v33, %v10809_v1  ;;  %v9293_v33 = vunpack.i.l.bf16 %v9292_v7 }
 0xe5a   : > { %8882 = vmatprep.subr.msk.bf16.mxu1 %vm10177_vm2, %v8880_v31  ;;  %v4365_v29 = vmul.f32 %v9567_v20, %v10811_v38 }
 0xe5c   : > { %8451 = vmatprep.mubr.msk.f32.mxu0 %vm1103_vm3, %v4365_v29 }
 0xe5d   : > { %8452 = vmatmul.mubr.msk.f32.vlgmr.msra.gmra.mrb[50].mxu0 %vm1103_vm3, %v4367_v10 }
 0xe5e   : > { %8879 = vmatpush3.bf16.msra.mxu0 %v10768_v16 }
 0xe5f   : > { %8888 = vmatprep.subr.msk.bf16.mxu0 %vm10177_vm2, %v8886_v58 }
 0xe82   : > { %v4353_v44 = vpop.xlane.xlu1 %4352 }
 0xe83   : > { %9568 = vrcp.f32 %v4353_v44  ;;  %v4350_v1 = vpop.xlane.xlu0 %4349  ;;  %v8892_v44 = vpack.c.bf16 %v9294_v14, %v9293_v33 }
 0xe84   : > { %9570 = vrcp.f32 %v4350_v1 }
 0xe86   : > { %v4359_v24 = vpop.xlane.xlu1 %4358 }
 0xe87   : > { %9572 = vrcp.f32 %v4359_v24  ;;  %v4356_v27 = vpop.xlane.xlu0 %4355 }
 0xe88   : > { %9574 = vrcp.f32 %v4356_v27 }
 0xe8a   : > { %v9297_v38 = vpop.permute.xlu1 %9296 }
 0xe8b   : > { %v4816_v37 = vpop.permute.xlu0 %4815  ;;  %v9299_v1 = vunpack.i.h.bf16 %v9297_v38  ;;  %v9298_v24 = vunpack.i.l.bf16 %v9297_v38 }
 0xe8d   : > { %v9569_v19 = vpop.eup %9568  ;;  %v8898_v7 = vpack.c.bf16 %v9299_v1, %v9298_v24 }
 0xe8e   : > { %v9571_v40 = vpop.eup %9570  ;;  %v4907_v16 = vpop.permute.xlu1 %4906  ;;  %v4371_v20 = vmul.f32 %v9569_v19, %v10821_v47 }
 0xe8f   : > { %v4818_v30 = vpop.permute.xlu0 %4817  ;;  %v4369_v4 = vmul.f32 %v9571_v40, %v10823_v34 }
 0xe91   : > { %v9573_v10 = vpop.eup %9572  ;;  %8458 = vmatprep.mubr.msk.f32.mxu1 %vm1103_vm3, %v4369_v4 }
 0xe92   : > { %v9575_v29 = vpop.eup %9574  ;;  %8459 = vmatmul.mubr.msk.f32.vlgmr.msra.gmra.mrb[40].mxu1 %vm1103_vm3, %v4371_v20  ;;  %v4998_v27 = vpop.permute.xlu1 %4997  ;;  %v4375_v0 = vmul.f32 %v9573_v10, %v10827_v46 }
 0xe93   : > { %8885 = vmatpush3.bf16.xpose.msk.msra.mxu1 %vm10177_vm2, %v8880_v31  ;;  %8472 = vmatprep.mubr.msk.f32.mxu1 %vm744_vm1, %v4725_v51  ;;  %v4909_v47 = vpop.permute.xlu0 %4908  ;;  %v4373_v34 = vmul.f32 %v9575_v29, %v10831_v11 }
 0xe94   : > { %8894 = vmatprep.subr.msk.bf16.mxu1 %vm10177_vm2, %v8892_v44 }
 0xe95   : > { %8465 = vmatprep.mubr.msk.f32.mxu0 %vm1103_vm3, %v4373_v34 }
 0xe96   : > { %8466 = vmatmul.mubr.msk.f32.vlgmr.msra.gmra.mrb[52].mxu0 %vm1103_vm3, %v4375_v0  ;;  %v9307_v38 = vpop.permute.xlu1 %9306 }
 0xe97   : > { %8891 = vmatpush3.bf16.xpose.msk.msra.mxu0 %vm10177_vm2, %v8886_v58  ;;  %8479 = vmatprep.mubr.msk.f32.mxu0 %vm744_vm1, %v4816_v37  ;;  %v5000_v46 = vpop.permute.xlu0 %4999  ;;  %v9309_v51 = vunpack.i.h.bf16 %v9307_v38  ;;  %v9308_v11 = vunpack.i.l.bf16 %v9307_v38 }
 0xe98   : > { %8900 = vmatprep.subr.msk.bf16.mxu0 %vm10177_vm2, %v8898_v7 }
 0xe99   : > { %v8908_v37 = vpack.c.bf16 %v9309_v51, %v9308_v11 }
 0xe9a   : > { %8473 = vmatmul.mubr.msk.f32.vlgmr.msra.gmra.mrb[42].mxu1 %vm744_vm1, %v4727_v39  ;;  %v9312_v0 = vpop.permute.xlu1 %9311 }
 0xe9b   : > { %8897 = vmatpush3.bf16.xpose.msk.msra.mxu1 %vm10177_vm2, %v8892_v44  ;;  %8486 = vmatprep.mubr.msk.f32.mxu1 %vm744_vm1, %v4907_v16  ;;  %v9302_v31 = vpop.permute.xlu0 %9301  ;;  %v9314_v58 = vunpack.i.h.bf16 %v9312_v0  ;;  %v9313_v14 = vunpack.i.l.bf16 %v9312_v0 }
 0xe9c   : > { %v9304_v19 = vunpack.i.h.bf16 %v9302_v31  ;;  %v9303_v40 = vunpack.i.l.bf16 %v9302_v31 }
 0xe9d   : > { %v10904_v4 = vpack.c.bf16 %v9314_v58, %v9313_v14 }
 0xe9e   : > { %8480 = vmatmul.mubr.msk.f32.vlgmr.msra.gmra.mrb[54].mxu0 %vm744_vm1, %v4818_v30  ;;  %v8904_v33 = vpack.c.bf16 %v9304_v19, %v9303_v40 }
 0xe9f   : > { %8903 = vmatpush3.bf16.xpose.msk.msra.mxu0 %vm10177_vm2, %v8898_v7  ;;  %8493 = vmatprep.mubr.msk.f32.mxu0 %vm744_vm1, %v4998_v27  ;;  %v9317_v39 = vpop.permute.xlu0 %9316 }
 0xea0   : > { %8909 = vmatprep.subr.bf16.mxu0 %v8908_v37  ;;  %8905 = vmatprep.subr.bf16.mxu1 %v8904_v33  ;;  %v9319_v20 = vunpack.i.h.bf16 %v9317_v39  ;;  %v9318_v16 = vunpack.i.l.bf16 %v9317_v39 }
 0xea2   : > { %8487 = vmatmul.mubr.msk.f32.vlgmr.msra.gmra.mrb[44].mxu1 %vm744_vm1, %v4909_v47  ;;  %v10908_v30 = vpack.c.bf16 %v9319_v20, %v9318_v16 }
 0xea3   : > { %8907 = vmatpush3.bf16.msra.mxu1 %v8904_v33 }
 0xea4   : > { %8913 = vmatprep.subr.bf16.mxu1 %v10904_v4 }
 0xea6   : > { %8494 = vmatmul.mubr.msk.f32.vlgmr.msra.gmra.mrb[56].mxu0 %vm744_vm1, %v5000_v46 }
 0xea7   : > { %8911 = vmatpush3.bf16.msra.mxu0 %v8908_v37 }
 0xea8   : > { %8917 = vmatprep.subr.bf16.mxu0 %v10908_v30 }
 0xf2b   : > { %v10911_v10 = vpop.f32.mrb[38].mxu1 }
 0xf2c   : > { %v10913_v29 = vpop.f32.mrb[39].mxu1 }
 0xf30   : > { %v10915_v44 = vpop.f32.mrb[50].mxu0 }
 0xf31   : > { %v10917_v1 = vpop.f32.mrb[51].mxu0 }
 0xf65   : > { %v10919_v24 = vpop.f32.mrb[40].mxu1 }
 0xf66   : > { %11569 = vst [vmem:[#allocation28_spill] sm:$0xff] %v10919_v24  ;;  %v10921_v27 = vpop.f32.mrb[41].mxu1 }
 0xf67   : > { %11570 = vst [vmem:[#allocation29_spill] sm:$0xff] %v10921_v27 }
 0xf69   : > { %v10923_v47 = vpop.f32.mrb[52].mxu0 }
 0xf6a   : > { %11571 = vst [vmem:[#allocation30_spill] sm:$0xff] %v10923_v47  ;;  %v10925_v34 = vpop.f32.mrb[53].mxu0 }
 0xf6b   : > { %11572 = vst [vmem:[#allocation31_spill] sm:$0xff] %v10925_v34 }
 0xf6d   : > { %v8474_v7 = vpop.f32.mrb[42].mxu1 }
 0xf6e   : > { %v4806_v38 = vpop.f32.mrb[43].mxu1  ;;  %v5091_v46 = vsel %vm1103_vm3, %v8474_v7, -inf }
 0xf6f   : > { %5092 = vmax.xlane.f32.xlu0 %v5091_v46  ;;  %v5088_v51 = vsel %vm1103_vm3, %v4806_v38, -inf  ;;  %v10939_v46 = vpop.permute.xlu1 %9321 }
 0xf70   : > { %5089 = vmax.xlane.f32.xlu1 %v5088_v51 }
 0xf71   : > { %v8481_v11 = vpop.f32.mrb[54].mxu0 }
 0xf72   : > { %v4897_v0 = vpop.f32.mrb[55].mxu0  ;;  %v5097_v31 = vsel %vm1103_vm3, %v8481_v11, -inf }
 0xf73   : > { %v5094_v19 = vsel %vm1103_vm3, %v4897_v0, -inf }
 0xf74   : > { %5098 = vmax.xlane.f32.xlu1 %v5097_v31  ;;  %5095 = vmax.xlane.f32.xlu0 %v5094_v19 }
 0xf75   : > { %v8488_v40 = vpop.f32.mrb[44].mxu1 }
 0xf76   : > { %v4988_v58 = vpop.f32.mrb[45].mxu1  ;;  %v5103_v14 = vsel %vm1103_vm3, %v8488_v40, -inf }
 0xf77   : > { %v5100_v37 = vsel %vm1103_vm3, %v4988_v58, -inf }
 0xf78   : > { %5104 = vmax.xlane.f32.xlu1 %v5103_v14  ;;  %5101 = vmax.xlane.f32.xlu0 %v5100_v37 }
 0xf79   : > { %v8495_v33 = vpop.f32.mrb[56].mxu0 }
 0xf7a   : > { %v5079_v39 = vpop.f32.mrb[57].mxu0  ;;  %v5109_v20 = vsel %vm1103_vm3, %v8495_v33, -inf }
 0xf7b   : > { %v5106_v16 = vsel %vm1103_vm3, %v5079_v39, -inf }
 0xf7c   : > { %5110 = vmax.xlane.f32.xlu1 %v5109_v20  ;;  %5107 = vmax.xlane.f32.xlu0 %v5106_v16 }
 0xf8d   : > { %5524 = vrot.lane.b32.xlu1 %v10137_v53, %s9828_s14 }
 0xf92   : > { %9326 = vrot.lane.b32.xlu0 %v10149_v5, %s9827_s29 }
 0xffc   : > { %v5093_v51 = vpop.xlane.xlu0 %5092 }
 0xffd   : > { %v5113_v31 = vsub.f32 %v8474_v7, %v5093_v51  ;;  %v5090_v19 = vpop.xlane.xlu1 %5089 }
 0xffe   : > { %v5112_v14 = vsub.f32 %v4806_v38, %v5090_v19 }
 0xfff   : > { %v5122_v37 = vmul.f32 1.442695, %v5113_v31 }
0x1000   : > { %v5120_v47 = vmul.f32 1.442695, %v5112_v14 }
0x1001   : > { %9576 = vpow2.f32 %v5122_v37  ;;  %v5099_v34 = vpop.xlane.xlu1 %5098  ;;  %v5096_v9 = vpop.xlane.xlu0 %5095 }
0x1002   : > { %9578 = vpow2.f32 %v5120_v47  ;;  %v5115_v20 = vsub.f32 %v8481_v11, %v5099_v34  ;;  %v5114_v16 = vsub.f32 %v4897_v0, %v5096_v9 }
0x1004   : > { %v5126_v45 = vmul.f32 1.442695, %v5115_v20  ;;  %v5124_v57 = vmul.f32 1.442695, %v5114_v16 }
0x1005   : > { %v5105_v9 = vpop.xlane.xlu1 %5104  ;;  %v5102_v34 = vpop.xlane.xlu0 %5101 }
0x1006   : > { %9580 = vpow2.f32 %v5126_v45  ;;  %v5117_v11 = vsub.f32 %v8488_v40, %v5105_v9  ;;  %v5116_v0 = vsub.f32 %v4988_v58, %v5102_v34 }
0x1007   : > { %9582 = vpow2.f32 %v5124_v57 }
0x1008   : > { %v5130_v14 = vmul.f32 1.442695, %v5117_v11  ;;  %v5128_v20 = vmul.f32 1.442695, %v5116_v0 }
0x1009   : > { %v5111_v31 = vpop.xlane.xlu1 %5110  ;;  %v5108_v19 = vpop.xlane.xlu0 %5107 }
0x100a   : > { %v5119_v37 = vsub.f32 %v8495_v33, %v5111_v31  ;;  %v5118_v16 = vsub.f32 %v5079_v39, %v5108_v19  ;;  %9584 = vpow2.f32 %v5130_v14 }
0x100b   : > { %v10941_v24 = vpop.eup %9576  ;;  %9586 = vpow2.f32 %v5128_v20 }
0x100c   : > { %v10943_v27 = vpop.eup %9578  ;;  %v5139_v7 = vsel %vm1103_vm3, %v10941_v24, 0.0 }
0x100d   : > { %5140 = vadd.xlane.f32.xlu1 %v5139_v7  ;;  %v5136_v38 = vsel %vm1103_vm3, %v10943_v27, 0.0  ;;  %v5134_v7 = vmul.f32 1.442695, %v5119_v37  ;;  %v5525_v11 = vpop.permute.xlu1 %5524  ;;  %v9327_v0 = vpop.permute.xlu0 %9326 }
0x100e   : > { %5137 = vadd.xlane.f32.xlu0 %v5136_v38  ;;  %v5132_v38 = vmul.f32 1.442695, %v5118_v16 }
0x100f   : > { %9588 = vpow2.f32 %v5134_v7  ;;  %v9323_v7 = vunpack.i.l.bf16 %v10939_v46 }
0x1010   : > { %v10949_v51 = vpop.eup %9580  ;;  %9590 = vpow2.f32 %v5132_v38 }
0x1011   : > { %v10951_v47 = vpop.eup %9582  ;;  %v5145_v45 = vsel %vm1103_vm3, %v10949_v51, 0.0 }
0x1012   : > { %5146 = vadd.xlane.f32.xlu1 %v5145_v45  ;;  %v5142_v57 = vsel %vm1103_vm3, %v10951_v47, 0.0 }
0x1013   : > { %5143 = vadd.xlane.f32.xlu0 %v5142_v57 }
0x1014   : > { %v10961_v45 = vpop.eup %9584 }
0x1015   : > { %v10963_v57 = vpop.eup %9586  ;;  %v5151_v40 = vsel %vm1103_vm3, %v10961_v45, 0.0 }
0x1016   : > { %v5148_v33 = vsel %vm1103_vm3, %v10963_v57, 0.0 }
0x1019   : > { %v10967_v58 = vpop.eup %9588 }
0x101a   : > { %v10971_v39 = vpop.eup %9590  ;;  %v5157_v9 = vsel %vm1103_vm3, %v10967_v58, 0.0 }
0x101b   : > { %v5154_v34 = vsel %vm1103_vm3, %v10971_v39, 0.0 }
0x1023   : > { %5526 = vrot.lane.b32.xlu1 %v10185_v42, %s9828_s14 }
0x1029   : > { %9331 = vrot.lane.b32.xlu0 %v10161_v15, %s9827_s29 }
0x1047   : > { %5152 = vadd.xlane.f32.xlu1 %v5151_v40 }
0x1048   : > { %5149 = vadd.xlane.f32.xlu0 %v5148_v33 }
0x104b   : > { %5158 = vadd.xlane.f32.xlu1 %v5157_v9 }
0x104c   : > { %5155 = vadd.xlane.f32.xlu0 %v5154_v34 }
0x105c   : > { %9336 = vrot.lane.b32.xlu1 %v10169_v28, %s9827_s29 }
0x1060   : > { %5706 = vrot.lane.b32.xlu1 %v10157_v22, %s9828_s14 }
0x1062   : > { %5615 = vrot.lane.b32.xlu0 %v10187_v43, %s9828_s14 }
0x1064   : > { %5797 = vrot.lane.b32.xlu1 %v10207_v50, %s9828_s14 }
0x1066   : > { %5617 = vrot.lane.b32.xlu0 %v10197_v17, %s9828_s14 }
0x1068   : > { %9346 = vrot.lane.b32.xlu1 %v10153_v8, %s9828_s14 }
0x106a   : > { %5708 = vrot.lane.b32.xlu0 %v10205_v49, %s9828_s14 }
0x106c   : > { %9351 = vrot.lane.b32.xlu1 %v10163_v18, %s9828_s14 }
0x106e   : > { %5799 = vrot.lane.b32.xlu0 %v10218_v55, %s9828_s14 }
0x1070   : > { %9361 = vrot.lane.b32.xlu1 %v10141_v59, %s9829_s21  ;;  %v9324_v59 = vunpack.i.h.bf16 %v10939_v46 }
0x1072   : > { %9341 = vrot.lane.b32.xlu0 %v10145_v62, %s9828_s14  ;;  %v8920_v9 = vpack.c.bf16 %v9324_v59, %v9323_v7 }
0x1076   : > { %9356 = vrot.lane.b32.xlu0 %v10171_v32, %s9828_s14  ;;  %s9831_s14 = smov [#allocation7]  }
0x109a   : > { %v5141_v31 = vpop.xlane.xlu1 %5140 }
0x109b   : > { %9592 = vrcp.f32 %v5141_v31  ;;  %v5138_v19 = vpop.xlane.xlu0 %5137  ;;  %v9329_v31 = vunpack.i.h.bf16 %v9327_v0 }
0x109c   : > { %9594 = vrcp.f32 %v5138_v19  ;;  %v9328_v19 = vunpack.i.l.bf16 %v9327_v0 }
0x109f   : > { %v5147_v14 = vpop.xlane.xlu1 %5146 }
0x10a0   : > { %9596 = vrcp.f32 %v5147_v14  ;;  %v5144_v37 = vpop.xlane.xlu0 %5143 }
0x10a1   : > { %9598 = vrcp.f32 %v5144_v37 }
0x10a3   : > { %v5527_v46 = vpop.permute.xlu1 %5526 }
0x10a4   : > { %v9332_v0 = vpop.permute.xlu0 %9331 }
0x10a5   : > { %v9593_v20 = vpop.eup %9592 }
0x10a6   : > { %v9595_v16 = vpop.eup %9594  ;;  %v5163_v40 = vmul.f32 %v9593_v20, %v10941_v24  ;;  %v8926_v24 = vpack.c.bf16 %v9329_v31, %v9328_v19 }
0x10a7   : > { %v5161_v38 = vmul.f32 %v9595_v16, %v10943_v27 }
0x10a9   : > { %8500 = vmatprep.mubr.msk.f32.mxu1 %vm1103_vm3, %v5161_v38  ;;  %v9334_v38 = vunpack.i.h.bf16 %v9332_v0 }
0x10aa   : > { %v9597_v33 = vpop.eup %9596  ;;  %8501 = vmatmul.mubr.msk.f32.vlgmr.msra.gmra.mrb[46].mxu1 %vm1103_vm3, %v5163_v40  ;;  %v9333_v40 = vunpack.i.l.bf16 %v9332_v0 }
0x10ab   : > { %v9599_v34 = vpop.eup %9598  ;;  %8915 = vmatpush3.bf16.msra.mxu1 %v10904_v4  ;;  %v5167_v14 = vmul.f32 %v9597_v33, %v10949_v51 }
0x10ac   : > { %8922 = vmatprep.subr.msk.bf16.mxu1 %vm10177_vm2, %v8920_v9  ;;  %v5165_v27 = vmul.f32 %v9599_v34, %v10951_v47 }
0x10ae   : > { %8507 = vmatprep.mubr.msk.f32.mxu0 %vm1103_vm3, %v5165_v27  ;;  %v8932_v27 = vpack.c.bf16 %v9334_v38, %v9333_v40 }
0x10af   : > { %8508 = vmatmul.mubr.msk.f32.vlgmr.msra.gmra.mrb[58].mxu0 %vm1103_vm3, %v5167_v14 }
0x10b0   : > { %8919 = vmatpush3.bf16.msra.mxu0 %v10908_v30 }
0x10b1   : > { %8928 = vmatprep.subr.msk.bf16.mxu0 %vm10177_vm2, %v8926_v24 }
0x10d4   : > { %v5153_v4 = vpop.xlane.xlu1 %5152 }
0x10d5   : > { %9600 = vrcp.f32 %v5153_v4  ;;  %v5150_v51 = vpop.xlane.xlu0 %5149 }
0x10d6   : > { %9602 = vrcp.f32 %v5150_v51 }
0x10d8   : > { %v5159_v37 = vpop.xlane.xlu1 %5158 }
0x10d9   : > { %9604 = vrcp.f32 %v5159_v37  ;;  %v5156_v20 = vpop.xlane.xlu0 %5155 }
0x10da   : > { %9606 = vrcp.f32 %v5156_v20 }
0x10dc   : > { %v9337_v47 = vpop.permute.xlu1 %9336 }
0x10dd   : > { %v5616_v16 = vpop.permute.xlu0 %5615  ;;  %v9339_v4 = vunpack.i.h.bf16 %v9337_v47  ;;  %v9338_v51 = vunpack.i.l.bf16 %v9337_v47 }
0x10df   : > { %v9601_v59 = vpop.eup %9600  ;;  %v8938_v0 = vpack.c.bf16 %v9339_v4, %v9338_v51 }
0x10e0   : > { %v9603_v7 = vpop.eup %9602  ;;  %v5707_v30 = vpop.permute.xlu1 %5706  ;;  %v5171_v33 = vmul.f32 %v9601_v59, %v10961_v45 }
0x10e1   : > { %v5618_v34 = vpop.permute.xlu0 %5617  ;;  %v5169_v31 = vmul.f32 %v9603_v7, %v10963_v57 }
0x10e3   : > { %v9605_v19 = vpop.eup %9604  ;;  %8514 = vmatprep.mubr.msk.f32.mxu1 %vm1103_vm3, %v5169_v31 }
0x10e4   : > { %v9607_v14 = vpop.eup %9606  ;;  %8515 = vmatmul.mubr.msk.f32.vlgmr.msra.gmra.mrb[48].mxu1 %vm1103_vm3, %v5171_v33  ;;  %v5798_v37 = vpop.permute.xlu1 %5797  ;;  %v5175_v20 = vmul.f32 %v9605_v19, %v10967_v58 }
0x10e5   : > { %8925 = vmatpush3.bf16.xpose.msk.msra.mxu1 %vm10177_vm2, %v8920_v9  ;;  %8528 = vmatprep.mubr.msk.f32.mxu1 %vm744_vm1, %v5525_v11  ;;  %v5709_v45 = vpop.permute.xlu0 %5708  ;;  %v5173_v57 = vmul.f32 %v9607_v14, %v10971_v39 }
0x10e6   : > { %8934 = vmatprep.subr.msk.bf16.mxu1 %vm10177_vm2, %v8932_v27 }
0x10e7   : > { %8521 = vmatprep.mubr.msk.f32.mxu0 %vm1103_vm3, %v5173_v57 }
0x10e8   : > { %8522 = vmatmul.mubr.msk.f32.vlgmr.msra.gmra.mrb[60].mxu0 %vm1103_vm3, %v5175_v20  ;;  %v9347_v47 = vpop.permute.xlu1 %9346 }
0x10e9   : > { %8931 = vmatpush3.bf16.xpose.msk.msra.mxu0 %vm10177_vm2, %v8926_v24  ;;  %8535 = vmatprep.mubr.msk.f32.mxu0 %vm744_vm1, %v5616_v16  ;;  %v5800_v58 = vpop.permute.xlu0 %5799  ;;  %v9349_v11 = vunpack.i.h.bf16 %v9347_v47  ;;  %v9348_v39 = vunpack.i.l.bf16 %v9347_v47 }
0x10ea   : > { %8940 = vmatprep.subr.msk.bf16.mxu0 %vm10177_vm2, %v8938_v0 }
0x10eb   : > { %v8948_v16 = vpack.c.bf16 %v9349_v11, %v9348_v39 }
0x10ec   : > { %8529 = vmatmul.mubr.msk.f32.vlgmr.msra.gmra.mrb[50].mxu1 %vm744_vm1, %v5527_v46  ;;  %v9352_v9 = vpop.permute.xlu1 %9351 }
0x10ed   : > { %8937 = vmatpush3.bf16.xpose.msk.msra.mxu1 %vm10177_vm2, %v8932_v27  ;;  %8542 = vmatprep.mubr.msk.f32.mxu1 %vm744_vm1, %v5707_v30  ;;  %v9342_v59 = vpop.permute.xlu0 %9341  ;;  %v9354_v24 = vunpack.i.h.bf16 %v9352_v9  ;;  %v9353_v40 = vunpack.i.l.bf16 %v9352_v9 }
0x10ee   : > { %v9344_v7 = vunpack.i.h.bf16 %v9342_v59  ;;  %v9343_v38 = vunpack.i.l.bf16 %v9342_v59 }
0x10ef   : > { %v11044_v19 = vpack.c.bf16 %v9354_v24, %v9353_v40 }
0x10f0   : > { %8536 = vmatmul.mubr.msk.f32.vlgmr.msra.gmra.mrb[62].mxu0 %vm744_vm1, %v5618_v34  ;;  %v8944_v33 = vpack.c.bf16 %v9344_v7, %v9343_v38 }
0x10f1   : > { %8943 = vmatpush3.bf16.xpose.msk.msra.mxu0 %vm10177_vm2, %v8938_v0  ;;  %8549 = vmatprep.mubr.msk.f32.mxu0 %vm744_vm1, %v5798_v37  ;;  %v9357_v46 = vpop.permute.xlu0 %9356 }
0x10f2   : > { %8949 = vmatprep.subr.bf16.mxu0 %v8948_v16  ;;  %8945 = vmatprep.subr.bf16.mxu1 %v8944_v33  ;;  %v9359_v31 = vunpack.i.h.bf16 %v9357_v46  ;;  %v9358_v30 = vunpack.i.l.bf16 %v9357_v46 }
0x10f4   : > { %8543 = vmatmul.mubr.msk.f32.vlgmr.msra.gmra.mrb[52].mxu1 %vm744_vm1, %v5709_v45  ;;  %v11048_v34 = vpack.c.bf16 %v9359_v31, %v9358_v30 }
0x10f5   : > { %8947 = vmatpush3.bf16.msra.mxu1 %v8944_v33 }
0x10f6   : > { %8953 = vmatprep.subr.bf16.mxu1 %v11044_v19 }
0x10f8   : > { %8550 = vmatmul.mubr.msk.f32.vlgmr.msra.gmra.mrb[64].mxu0 %vm744_vm1, %v5800_v58 }
0x10f9   : > { %8951 = vmatpush3.bf16.msra.mxu0 %v8948_v16 }
0x10fa   : > { %8957 = vmatprep.subr.bf16.mxu0 %v11048_v34 }
0x117d   : > { %v11051_v14 = vpop.f32.mrb[46].mxu1 }
0x117e   : > { %v11053_v27 = vpop.f32.mrb[47].mxu1 }
0x1182   : > { %v11055_v4 = vpop.f32.mrb[58].mxu0 }
0x1183   : > { %v11057_v51 = vpop.f32.mrb[59].mxu0 }
0x11b7   : > { %v11059_v37 = vpop.f32.mrb[48].mxu1 }
0x11b8   : > { %11573 = vst [vmem:[#allocation32_spill] sm:$0xff] %v11059_v37  ;;  %v11061_v20 = vpop.f32.mrb[49].mxu1 }
0x11b9   : > { %11574 = vst [vmem:[#allocation33_spill] sm:$0xff] %v11061_v20 }
0x11bb   : > { %v11063_v45 = vpop.f32.mrb[60].mxu0 }
0x11bc   : > { %11575 = vst [vmem:[#allocation34_spill] sm:$0xff] %v11063_v45  ;;  %v11065_v57 = vpop.f32.mrb[61].mxu0 }
0x11bd   : > { %11576 = vst [vmem:[#allocation35_spill] sm:$0xff] %v11065_v57 }
0x11bf   : > { %v8530_v0 = vpop.f32.mrb[50].mxu1 }
0x11c0   : > { %v5606_v47 = vpop.f32.mrb[51].mxu1  ;;  %v5891_v58 = vsel %vm1103_vm3, %v8530_v0, -inf }
0x11c1   : > { %5892 = vmax.xlane.f32.xlu0 %v5891_v58  ;;  %v5888_v11 = vsel %vm1103_vm3, %v5606_v47, -inf  ;;  %v11079_v58 = vpop.permute.xlu1 %9361 }
0x11c2   : > { %5889 = vmax.xlane.f32.xlu1 %v5888_v11 }
0x11c3   : > { %v8537_v39 = vpop.f32.mrb[62].mxu0 }
0x11c4   : > { %v5697_v9 = vpop.f32.mrb[63].mxu0  ;;  %v5897_v59 = vsel %vm1103_vm3, %v8537_v39, -inf }
0x11c5   : > { %v5894_v7 = vsel %vm1103_vm3, %v5697_v9, -inf }
0x11c6   : > { %5898 = vmax.xlane.f32.xlu1 %v5897_v59  ;;  %5895 = vmax.xlane.f32.xlu0 %v5894_v7 }
0x11c7   : > { %v8544_v38 = vpop.f32.mrb[52].mxu1 }
0x11c8   : > { %v5788_v24 = vpop.f32.mrb[53].mxu1  ;;  %v5903_v40 = vsel %vm1103_vm3, %v8544_v38, -inf }
0x11c9   : > { %v5900_v16 = vsel %vm1103_vm3, %v5788_v24, -inf }
0x11ca   : > { %5904 = vmax.xlane.f32.xlu1 %v5903_v40  ;;  %5901 = vmax.xlane.f32.xlu0 %v5900_v16 }
0x11cb   : > { %v8551_v33 = vpop.f32.mrb[64].mxu0 }
0x11cc   : > { %v5879_v46 = vpop.f32.mrb[65].mxu0  ;;  %v5909_v31 = vsel %vm1103_vm3, %v8551_v33, -inf }
0x11cd   : > { %v5906_v30 = vsel %vm1103_vm3, %v5879_v46, -inf }
0x11ce   : > { %5910 = vmax.xlane.f32.xlu1 %v5909_v31  ;;  %5907 = vmax.xlane.f32.xlu0 %v5906_v30 }
0x11df   : > { %9371 = vrot.lane.b32.xlu1 %v10161_v15, %s9829_s21 }
0x11e4   : > { %9366 = vrot.lane.b32.xlu0 %v10149_v5, %s9829_s21 }
0x124e   : > { %v5893_v11 = vpop.xlane.xlu0 %5892 }
0x124f   : > { %v5913_v59 = vsub.f32 %v8530_v0, %v5893_v11  ;;  %v5890_v7 = vpop.xlane.xlu1 %5889 }
0x1250   : > { %v5912_v40 = vsub.f32 %v5606_v47, %v5890_v7 }
0x1251   : > { %v5922_v16 = vmul.f32 1.442695, %v5913_v59 }
0x1252   : > { %v5920_v45 = vmul.f32 1.442695, %v5912_v40 }
0x1253   : > { %9608 = vpow2.f32 %v5922_v16  ;;  %v5899_v57 = vpop.xlane.xlu1 %5898  ;;  %v5896_v37 = vpop.xlane.xlu0 %5895 }
0x1254   : > { %9610 = vpow2.f32 %v5920_v45  ;;  %v5915_v31 = vsub.f32 %v8537_v39, %v5899_v57  ;;  %v5914_v30 = vsub.f32 %v5697_v9, %v5896_v37 }
0x1256   : > { %v5926_v20 = vmul.f32 1.442695, %v5915_v31  ;;  %v5924_v21 = vmul.f32 1.442695, %v5914_v30 }
0x1257   : > { %v5902_v57 = vpop.xlane.xlu0 %5901 }
0x1258   : > { %9612 = vpow2.f32 %v5926_v20  ;;  %v5905_v20 = vpop.xlane.xlu1 %5904  ;;  %v5916_v9 = vsub.f32 %v5788_v24, %v5902_v57 }
0x1259   : > { %9614 = vpow2.f32 %v5924_v21  ;;  %v5917_v39 = vsub.f32 %v8544_v38, %v5905_v20 }
0x125a   : > { %v5928_v31 = vmul.f32 1.442695, %v5916_v9 }
0x125b   : > { %v5908_v7 = vpop.xlane.xlu0 %5907  ;;  %v5930_v40 = vmul.f32 1.442695, %v5917_v39 }
0x125c   : > { %v5911_v59 = vpop.xlane.xlu1 %5910  ;;  %v5918_v30 = vsub.f32 %v5879_v46, %v5908_v7 }
0x125d   : > { %v11081_v15 = vpop.eup %9608  ;;  %v5919_v16 = vsub.f32 %v8551_v33, %v5911_v59  ;;  %9616 = vpow2.f32 %v5930_v40  ;;  %v9363_v59 = vunpack.i.l.bf16 %v11079_v58 }
0x125e   : > { %v11083_v5 = vpop.eup %9610  ;;  %v5939_v0 = vsel %vm1103_vm3, %v11081_v15, 0.0  ;;  %9618 = vpow2.f32 %v5928_v31 }
0x125f   : > { %5940 = vadd.xlane.f32.xlu1 %v5939_v0  ;;  %v5936_v47 = vsel %vm1103_vm3, %v11083_v5, 0.0  ;;  %v5934_v0 = vmul.f32 1.442695, %v5919_v16 }
0x1260   : > { %5937 = vadd.xlane.f32.xlu0 %v5936_v47  ;;  %v5932_v47 = vmul.f32 1.442695, %v5918_v30  ;;  %v9372_v20 = vpop.permute.xlu1 %9371 }
0x1261   : > { %9620 = vpow2.f32 %v5934_v0 }
0x1262   : > { %v11089_v11 = vpop.eup %9612  ;;  %9622 = vpow2.f32 %v5932_v47 }
0x1263   : > { %v11091_v45 = vpop.eup %9614  ;;  %v5945_v37 = vsel %vm1103_vm3, %v11089_v11, 0.0 }
0x1264   : > { %5946 = vadd.xlane.f32.xlu1 %v5945_v37  ;;  %v5942_v21 = vsel %vm1103_vm3, %v11091_v45, 0.0 }
0x1265   : > { %5943 = vadd.xlane.f32.xlu0 %v5942_v21 }
0x1275   : > { %6326 = vrot.lane.b32.xlu1 %v10185_v42, %s9830_s23  ;;  %v11101_v42 = vpop.eup %9616 }
0x1276   : > { %v11103_v37 = vpop.eup %9618 }
0x1277   : > { %v11107_v38 = vpop.eup %9620  ;;  %v5948_v24 = vsel %vm1103_vm3, %v11103_v37, 0.0 }
0x1278   : > { %v11111_v33 = vpop.eup %9622  ;;  %v5957_v46 = vsel %vm1103_vm3, %v11107_v38, 0.0 }
0x1279   : > { %v5954_v21 = vsel %vm1103_vm3, %v11111_v33, 0.0 }
0x127b   : > { %6324 = vrot.lane.b32.xlu0 %v10137_v53, %s9830_s23  ;;  %v5951_v53 = vsel %vm1103_vm3, %v11101_v42, 0.0 }
0x1299   : > { %5952 = vadd.xlane.f32.xlu1 %v5951_v53 }
0x129a   : > { %5949 = vadd.xlane.f32.xlu0 %v5948_v24 }
0x129d   : > { %5958 = vadd.xlane.f32.xlu1 %v5957_v46 }
0x129e   : > { %5955 = vadd.xlane.f32.xlu0 %v5954_v21  ;;  %v9374_v21 = vunpack.i.h.bf16 %v9372_v20 }
0x12ae   : > { %6415 = vrot.lane.b32.xlu1 %v10187_v43, %s9830_s23  ;;  %v9367_v43 = vpop.permute.xlu0 %9366 }
0x12af   : > { %v9369_v31 = vunpack.i.h.bf16 %v9367_v43  ;;  %v9368_v30 = vunpack.i.l.bf16 %v9367_v43  ;;  %v9373_v43 = vunpack.i.l.bf16 %v9372_v20 }
0x12b2   : > { %6506 = vrot.lane.b32.xlu1 %v10157_v22, %s9830_s23 }
0x12b4   : > { %9376 = vrot.lane.b32.xlu0 %v10169_v28, %s9829_s21 }
0x12b6   : > { %6597 = vrot.lane.b32.xlu1 %v10207_v50, %s9830_s23 }
0x12b8   : > { %6417 = vrot.lane.b32.xlu0 %v10197_v17, %s9830_s23  ;;  %v9364_v17 = vunpack.i.h.bf16 %v11079_v58 }
0x12ba   : > { %v8960_v40 = vpack.c.bf16 %v9364_v17, %v9363_v59 }
0x12bc   : > { %6508 = vrot.lane.b32.xlu0 %v10205_v49, %s9830_s23 }
0x12c0   : > { %6599 = vrot.lane.b32.xlu0 %v10218_v55, %s9830_s23 }
0x12ec   : > { %v5941_v57 = vpop.xlane.xlu1 %5940 }
0x12ed   : > { %9624 = vrcp.f32 %v5941_v57  ;;  %v5938_v22 = vpop.xlane.xlu0 %5937 }
0x12ee   : > { %9626 = vrcp.f32 %v5938_v22 }
0x12f1   : > { %v5947_v39 = vpop.xlane.xlu1 %5946 }
0x12f2   : > { %9628 = vrcp.f32 %v5947_v39  ;;  %v5944_v28 = vpop.xlane.xlu0 %5943 }
0x12f3   : > { %9630 = vrcp.f32 %v5944_v28 }
0x12f6   : > { %v6325_v47 = vpop.permute.xlu0 %6324 }
0x12f7   : > { %v9625_v50 = vpop.eup %9624 }
0x12f8   : > { %v9627_v9 = vpop.eup %9626  ;;  %v5963_v55 = vmul.f32 %v9625_v50, %v11081_v15  ;;  %v8966_v15 = vpack.c.bf16 %v9369_v31, %v9368_v30  ;;  %v8972_v50 = vpack.c.bf16 %v9374_v21, %v9373_v43 }
0x12f9   : > { %v5961_v49 = vmul.f32 %v9627_v9, %v11083_v5  ;;  %v6327_v5 = vpop.permute.xlu1 %6326 }
0x12fb   : > { %8556 = vmatprep.mubr.msk.f32.mxu1 %vm1103_vm3, %v5961_v49 }
0x12fc   : > { %v9629_v7 = vpop.eup %9628  ;;  %8557 = vmatmul.mubr.msk.f32.vlgmr.msra.gmra.mrb[54].mxu1 %vm1103_vm3, %v5963_v55 }
0x12fd   : > { %v9631_v16 = vpop.eup %9630  ;;  %v5967_v0 = vmul.f32 %v9629_v7, %v11089_v11  ;;  %8955 = vmatpush3.bf16.msra.mxu1 %v11044_v19 }
0x12fe   : > { %8962 = vmatprep.subr.msk.bf16.mxu1 %vm10177_vm2, %v8960_v40  ;;  %v5965_v58 = vmul.f32 %v9631_v16, %v11091_v45 }
0x1300   : > { %8563 = vmatprep.mubr.msk.f32.mxu0 %vm1103_vm3, %v5965_v58 }
0x1301   : > { %8564 = vmatmul.mubr.msk.f32.vlgmr.msra.gmra.mrb[66].mxu0 %vm1103_vm3, %v5967_v0 }
0x1302   : > { %8959 = vmatpush3.bf16.msra.mxu0 %v11048_v34 }
0x1303   : > { %8968 = vmatprep.subr.msk.bf16.mxu0 %vm10177_vm2, %v8966_v15 }
0x1326   : > { %v5953_v11 = vpop.xlane.xlu1 %5952 }
0x1327   : > { %9632 = vrcp.f32 %v5953_v11  ;;  %v5950_v19 = vpop.xlane.xlu0 %5949 }
0x1328   : > { %9634 = vrcp.f32 %v5950_v19 }
0x132a   : > { %v5959_v53 = vpop.xlane.xlu1 %5958 }
0x132b   : > { %9636 = vrcp.f32 %v5959_v53  ;;  %v5956_v24 = vpop.xlane.xlu0 %5955 }
0x132c   : > { %9638 = vrcp.f32 %v5956_v24 }
0x132e   : > { %v6416_v17 = vpop.permute.xlu1 %6415 }
0x132f   : > { %v9377_v34 = vpop.permute.xlu0 %9376 }
0x1330   : > { %v9379_v59 = vunpack.i.h.bf16 %v9377_v34  ;;  %v9378_v49 = vunpack.i.l.bf16 %v9377_v34 }
0x1331   : > { %v9633_v45 = vpop.eup %9632 }
0x1332   : > { %v9635_v46 = vpop.eup %9634  ;;  %v5971_v57 = vmul.f32 %v9633_v45, %v11101_v42 }
0x1333   : > { %v5969_v22 = vmul.f32 %v9635_v46, %v11103_v37  ;;  %v8978_v37 = vpack.c.bf16 %v9379_v59, %v9378_v49  ;;  %v6418_v20 = vpop.permute.xlu0 %6417 }
0x1335   : > { %v9637_v39 = vpop.eup %9636  ;;  %8570 = vmatprep.mubr.msk.f32.mxu1 %vm1103_vm3, %v5969_v22 }
0x1336   : > { %v9639_v28 = vpop.eup %9638  ;;  %v5975_v9 = vmul.f32 %v9637_v39, %v11107_v38  ;;  %8571 = vmatmul.mubr.msk.f32.vlgmr.msra.gmra.mrb[56].mxu1 %vm1103_vm3, %v5971_v57  ;;  %v6507_v38 = vpop.permute.xlu1 %6506 }
0x1337   : > { %8965 = vmatpush3.bf16.xpose.msk.msra.mxu1 %vm10177_vm2, %v8960_v40  ;;  %8584 = vmatprep.mubr.msk.f32.mxu1 %vm744_vm1, %v6325_v47  ;;  %v5973_v42 = vmul.f32 %v9639_v28, %v11111_v33  ;;  %v6509_v55 = vpop.permute.xlu0 %6508 }
0x1338   : > { %8974 = vmatprep.subr.msk.bf16.mxu1 %vm10177_vm2, %v8972_v50 }
0x1339   : > { %8577 = vmatprep.mubr.msk.f32.mxu0 %vm1103_vm3, %v5973_v42 }
0x133a   : > { %8578 = vmatmul.mubr.msk.f32.vlgmr.msra.gmra.mrb[68].mxu0 %vm1103_vm3, %v5975_v9  ;;  %v6598_v33 = vpop.permute.xlu1 %6597 }
0x133b   : > { %8971 = vmatpush3.bf16.xpose.msk.msra.mxu0 %vm10177_vm2, %v8966_v15  ;;  %8591 = vmatprep.mubr.msk.f32.mxu0 %vm744_vm1, %v6416_v17  ;;  %v6600_v7 = vpop.permute.xlu0 %6599 }
0x133c   : > { %8980 = vmatprep.subr.msk.bf16.mxu0 %vm10177_vm2, %v8978_v37 }
0x133e   : > { %8585 = vmatmul.mubr.msk.f32.vlgmr.msra.gmra.mrb[58].mxu1 %vm744_vm1, %v6327_v5 }
0x133f   : > { %8977 = vmatpush3.bf16.xpose.msk.msra.mxu1 %vm10177_vm2, %v8972_v50  ;;  %8598 = vmatprep.mubr.msk.f32.mxu1 %vm744_vm1, %v6507_v38 }
0x1342   : > { %8592 = vmatmul.mubr.msk.f32.vlgmr.msra.gmra.mrb[70].mxu0 %vm744_vm1, %v6418_v20 }
0x1343   : > { %8983 = vmatpush3.bf16.xpose.msk.msra.mxu0 %vm10177_vm2, %v8978_v37  ;;  %8605 = vmatprep.mubr.msk.f32.mxu0 %vm744_vm1, %v6598_v33 }
0x1346   : > { %8599 = vmatmul.mubr.msk.f32.vlgmr.msra.gmra.mrb[60].mxu1 %vm744_vm1, %v6509_v55 }
0x134a   : > { %8606 = vmatmul.mubr.msk.f32.vlgmr.msra.gmra.mrb[72].mxu0 %vm744_vm1, %v6600_v7 }
0x13cf   : > { %v11175_v40 = vpop.f32.mrb[54].mxu1 }
0x13d0   : > { %v11177_v16 = vpop.f32.mrb[55].mxu1 }
0x13d4   : > { %v11179_v31 = vpop.f32.mrb[66].mxu0 }
0x13d5   : > { %v11181_v30 = vpop.f32.mrb[67].mxu0 }
0x1409   : > { %v11183_v0 = vpop.f32.mrb[56].mxu1 }
0x140a   : > { %v11185_v58 = vpop.f32.mrb[57].mxu1 }
0x140d   : > { %v11187_v35 = vpop.f32.mrb[68].mxu0 }
0x140e   : > { %v11189_v15 = vpop.f32.mrb[69].mxu0 }
0x1411   : > { %v8586_v5 = vpop.f32.mrb[58].mxu1 }
0x1412   : > { %v6406_v47 = vpop.f32.mrb[59].mxu1  ;;  %v6691_v11 = vsel %vm1103_vm3, %v8586_v5, -inf }
0x1413   : > { %6692 = vmax.xlane.f32.xlu0 %v6691_v11  ;;  %v6688_v19 = vsel %vm1103_vm3, %v6406_v47, -inf }
0x1414   : > { %6689 = vmax.xlane.f32.xlu1 %v6688_v19 }
0x1415   : > { %v8593_v53 = vpop.f32.mrb[70].mxu0 }
0x1416   : > { %v6497_v24 = vpop.f32.mrb[71].mxu0  ;;  %v6697_v45 = vsel %vm1103_vm3, %v8593_v53, -inf }
0x1417   : > { %v6694_v46 = vsel %vm1103_vm3, %v6497_v24, -inf }
0x1418   : > { %6698 = vmax.xlane.f32.xlu1 %v6697_v45  ;;  %6695 = vmax.xlane.f32.xlu0 %v6694_v46 }
0x1419   : > { %v8600_v21 = vpop.f32.mrb[60].mxu1 }
0x141a   : > { %v6588_v43 = vpop.f32.mrb[61].mxu1  ;;  %v6703_v57 = vsel %vm1103_vm3, %v8600_v21, -inf }
0x141b   : > { %v6700_v34 = vsel %vm1103_vm3, %v6588_v43, -inf }
0x141c   : > { %6704 = vmax.xlane.f32.xlu1 %v6703_v57  ;;  %6701 = vmax.xlane.f32.xlu0 %v6700_v34 }
0x141d   : > { %v8607_v22 = vpop.f32.mrb[72].mxu0 }
0x141e   : > { %v6679_v39 = vpop.f32.mrb[73].mxu0  ;;  %v6709_v28 = vsel %vm1103_vm3, %v8607_v22, -inf }
0x141f   : > { %v6706_v50 = vsel %vm1103_vm3, %v6679_v39, -inf }
0x1420   : > { %6710 = vmax.xlane.f32.xlu1 %v6709_v28  ;;  %6707 = vmax.xlane.f32.xlu0 %v6706_v50 }
0x1431   : > { %9386 = vrot.lane.b32.xlu1 %v10153_v8, %s9830_s23 }
0x1436   : > { %9381 = vrot.lane.b32.xlu0 %v10145_v62, %s9830_s23 }
0x14a0   : > { %v6693_v9 = vpop.xlane.xlu0 %6692 }
0x14a1   : > { %v6713_v17 = vsub.f32 %v8586_v5, %v6693_v9  ;;  %v6690_v59 = vpop.xlane.xlu1 %6689 }
0x14a2   : > { %v6712_v49 = vsub.f32 %v6406_v47, %v6690_v59 }
0x14a3   : > { %v6722_v42 = vmul.f32 1.442695, %v6713_v17 }
0x14a4   : > { %v6720_v37 = vmul.f32 1.442695, %v6712_v49 }
0x14a5   : > { %9640 = vpow2.f32 %v6722_v42  ;;  %v6699_v38 = vpop.xlane.xlu1 %6698  ;;  %v6696_v20 = vpop.xlane.xlu0 %6695 }
0x14a6   : > { %9642 = vpow2.f32 %v6720_v37  ;;  %v6715_v33 = vsub.f32 %v8593_v53, %v6699_v38  ;;  %v6714_v55 = vsub.f32 %v6497_v24, %v6696_v20 }
0x14a8   : > { %v6726_v7 = vmul.f32 1.442695, %v6715_v33  ;;  %v6724_v11 = vmul.f32 1.442695, %v6714_v55 }
0x14a9   : > { %v6705_v19 = vpop.xlane.xlu1 %6704  ;;  %v6702_v45 = vpop.xlane.xlu0 %6701 }
0x14aa   : > { %9644 = vpow2.f32 %v6726_v7  ;;  %v6717_v8 = vsub.f32 %v8600_v21, %v6705_v19  ;;  %v6716_v46 = vsub.f32 %v6588_v43, %v6702_v45 }
0x14ab   : > { %9646 = vpow2.f32 %v6724_v11 }
0x14ac   : > { %v6730_v62 = vmul.f32 1.442695, %v6717_v8  ;;  %v6728_v5 = vmul.f32 1.442695, %v6716_v46 }
0x14ad   : > { %v6711_v57 = vpop.xlane.xlu1 %6710  ;;  %v6708_v47 = vpop.xlane.xlu0 %6707 }
0x14ae   : > { %9648 = vpow2.f32 %v6730_v62  ;;  %v6719_v34 = vsub.f32 %v8607_v22, %v6711_v57  ;;  %v6718_v28 = vsub.f32 %v6679_v39, %v6708_v47 }
0x14af   : > { %v11203_v50 = vpop.eup %9640  ;;  %9650 = vpow2.f32 %v6728_v5 }
0x14b0   : > { %v11205_v53 = vpop.eup %9642  ;;  %v6734_v24 = vmul.f32 1.442695, %v6719_v34  ;;  %v6732_v9 = vmul.f32 1.442695, %v6718_v28  ;;  %v6739_v17 = vsel %vm1103_vm3, %v11203_v50, 0.0 }
0x14b1   : > { %6740 = vadd.xlane.f32.xlu1 %v6739_v17  ;;  %v9387_v21 = vpop.permute.xlu1 %9386  ;;  %v9382_v43 = vpop.permute.xlu0 %9381  ;;  %v6736_v59 = vsel %vm1103_vm3, %v11205_v53, 0.0 }
0x14b2   : > { %9652 = vpow2.f32 %v6734_v24  ;;  %v9389_v49 = vunpack.i.h.bf16 %v9387_v21  ;;  %v9388_v22 = vunpack.i.l.bf16 %v9387_v21  ;;  %v9384_v39 = vunpack.i.h.bf16 %v9382_v43  ;;  %6737 = vadd.xlane.f32.xlu0 %v6736_v59  ;;  %v11592_v21 = vld [vmem:[#allocation14_spill] sm:$0xff] }
0x14b3   : > { %9654 = vpow2.f32 %v6732_v9  ;;  %v9383_v42 = vunpack.i.l.bf16 %v9382_v43 }
0x14b4   : > { %v11211_v37 = vpop.eup %9644  ;;  %v8988_v38 = vpack.c.bf16 %v9389_v49, %v9388_v22  ;;  %v11593_v22 = vld [vmem:[#allocation13_spill] sm:$0xff] }
0x14b5   : > { %v11213_v20 = vpop.eup %9646  ;;  %v8984_v33 = vpack.c.bf16 %v9384_v39, %v9383_v42  ;;  %v6745_v55 = vsel %vm1103_vm3, %v11211_v37, 0.0 }
0x14b6   : > { %6746 = vadd.xlane.f32.xlu1 %v6745_v55  ;;  %8989 = vmatprep.subr.bf16.mxu0 %v8988_v38  ;;  %v6742_v7 = vsel %vm1103_vm3, %v11213_v20, 0.0 }
0x14b7   : > { %6743 = vadd.xlane.f32.xlu0 %v6742_v7  ;;  %8985 = vmatprep.subr.bf16.mxu1 %v8984_v33 }
0x14b8   : > { %v11219_v11 = vpop.eup %9648  ;;  %8987 = vmatpush3.bf16.msra.mxu1 %v8984_v33  ;;  %8991 = vmatpush3.bf16.msra.mxu0 %v8988_v38 }
0x14b9   : > { %v11221_v19 = vpop.eup %9650  ;;  %v6751_v45 = vsel %vm1103_vm3, %v11219_v11, 0.0 }
0x14ba   : > { %6752 = vadd.xlane.f32.xlu1 %v6751_v45  ;;  %v6748_v8 = vsel %vm1103_vm3, %v11221_v19, 0.0 }
0x14bb   : > { %6749 = vadd.xlane.f32.xlu0 %v6748_v8 }
0x14bc   : > { %v11227_v46 = vpop.eup %9652 }
0x14bd   : > { %v11229_v62 = vpop.eup %9654  ;;  %v6757_v5 = vsel %vm1103_vm3, %v11227_v46, 0.0 }
0x14be   : > { %6758 = vadd.xlane.f32.xlu1 %v6757_v5  ;;  %v6754_v57 = vsel %vm1103_vm3, %v11229_v62, 0.0 }
0x14bf   : > { %6755 = vadd.xlane.f32.xlu0 %v6754_v57 }
0x14cf   : > { %9391 = vrot.lane.b32.xlu1 %v10163_v18, %s9830_s23  ;;  %v11577_v18 = vld [vmem:[#allocation25_spill] sm:$0xff] }
0x14d3   : > { %7132 = vrot.lane.b32.xlu1 %v10493_v3, %s9829_s21  ;;  %v11580_v3 = vld [vmem:[#allocation22_spill] sm:$0xff] }
0x14d5   : > { %9396 = vrot.lane.b32.xlu0 %v10171_v32, %s9830_s23  ;;  %v11578_v32 = vld [vmem:[#allocation29_spill] sm:$0xff] }
0x14d7   : > { %7164 = vrot.lane.b32.xlu1 %v10633_v6, %s9827_s29  ;;  %v11586_v6 = vld [vmem:[#allocation27_spill] sm:$0xff] }
0x14d9   : > { %7134 = vrot.lane.b32.xlu0 %v10491_v52, %s9829_s21  ;;  %v11579_v52 = vld [vmem:[#allocation28_spill] sm:$0xff] }
0x14db   : > { %7196 = vrot.lane.b32.xlu1 %v10773_v48, %s9825_s18 }
0x14dd   : > { %7166 = vrot.lane.b32.xlu0 %v10631_v25, %s9827_s29  ;;  %v11585_v25 = vld [vmem:[#allocation23_spill] sm:$0xff] }
0x14df   : > { %7228 = vrot.lane.b32.xlu1 %v10913_v29, %s9823_s12 }
0x14e1   : > { %7198 = vrot.lane.b32.xlu0 %v10771_v54, %s9825_s18  ;;  %v11591_v54 = vld [vmem:[#allocation34_spill] sm:$0xff] }
0x14e3   : > { %7230 = vrot.lane.b32.xlu1 %v10911_v10, %s9823_s12 }
0x14e5   : > { %7136 = vrot.lane.b32.xlu0 %v10497_v56, %s9829_s21  ;;  %v11582_v56 = vld [vmem:[#allocation33_spill] sm:$0xff] }
0x14e7   : > { %7138 = vrot.lane.b32.xlu1 %v10495_v23, %s9829_s21  ;;  %v11581_v23 = vld [vmem:[#allocation21_spill] sm:$0xff] }
0x14e9   : > { %7260 = vrot.lane.b32.xlu0 %v11053_v27, %s9821_s26 }
0x14eb   : > { %7262 = vrot.lane.b32.xlu1 %v11051_v14, %s9821_s26 }
0x14ed   : > { %7168 = vrot.lane.b32.xlu0 %v10637_v36, %s9827_s29  ;;  %v11588_v36 = vld [vmem:[#allocation31_spill] sm:$0xff] }
0x14ef   : > { %7170 = vrot.lane.b32.xlu1 %v10635_v26, %s9827_s29  ;;  %v11587_v26 = vld [vmem:[#allocation26_spill] sm:$0xff] }
0x14f1   : > { %7292 = vrot.lane.b32.xlu0 %v11177_v16, %s9819_s22 }
0x14f3   : > { %7294 = vrot.lane.b32.xlu1 %v11175_v40, %s9819_s22 }
0x14f5   : > { %7200 = vrot.lane.b32.xlu0 %v10777_v12, %s9825_s18 }
0x14f7   : > { %7202 = vrot.lane.b32.xlu1 %v10775_v2, %s9825_s18 }
0x14f9   : > { %7232 = vrot.lane.b32.xlu0 %v10917_v1, %s9823_s12 }
0x14fb   : > { %7234 = vrot.lane.b32.xlu1 %v10915_v44, %s9823_s12 }
0x14fd   : > { %7140 = vrot.lane.b32.xlu0 %v10501_v63, %s9829_s21  ;;  %v11584_v63 = vld [vmem:[#allocation24_spill] sm:$0xff] }
0x14ff   : > { %7142 = vrot.lane.b32.xlu1 %v10499_v60, %s9829_s21  ;;  %v11583_v60 = vld [vmem:[#allocation32_spill] sm:$0xff] }
0x1501   : > { %7264 = vrot.lane.b32.xlu0 %v11057_v51, %s9821_s26 }
0x1503   : > { %7266 = vrot.lane.b32.xlu1 %v11055_v4, %s9821_s26 }
0x1505   : > { %7172 = vrot.lane.b32.xlu0 %v10641_v13, %s9827_s29  ;;  %v11590_v13 = vld [vmem:[#allocation30_spill] sm:$0xff] }
0x1507   : > { %7174 = vrot.lane.b32.xlu1 %v10639_v41, %s9827_s29  ;;  %v11589_v41 = vld [vmem:[#allocation35_spill] sm:$0xff] }
0x1509   : > { %7296 = vrot.lane.b32.xlu0 %v11181_v30, %s9819_s22 }
0x150b   : > { %7298 = vrot.lane.b32.xlu1 %v11179_v31, %s9819_s22 }
0x150d   : > { %7204 = vrot.lane.b32.xlu0 %v10781_v61, %s9825_s18 }
0x150f   : > { %7206 = vrot.lane.b32.xlu1 %v11577_v18, %s9825_s18 }
0x1511   : > { %7236 = vrot.lane.b32.xlu0 %v11578_v32, %s9823_s12 }
0x1513   : > { %7238 = vrot.lane.b32.xlu1 %v11579_v52, %s9823_s12  ;;  %v11594_v52 = vld [vmem:[#allocation16_spill] sm:$0xff] }
0x1515   : > { %7144 = vrot.lane.b32.xlu0 %v11580_v3, %s9829_s21 }
0x1517   : > { %7146 = vrot.lane.b32.xlu1 %v11581_v23, %s9829_s21 }
0x1519   : > { %7268 = vrot.lane.b32.xlu0 %v11582_v56, %s9821_s26 }
0x151b   : > { %7270 = vrot.lane.b32.xlu1 %v11583_v60, %s9821_s26 }
0x151d   : > { %7176 = vrot.lane.b32.xlu0 %v11584_v63, %s9827_s29 }
0x151f   : > { %7178 = vrot.lane.b32.xlu1 %v11585_v25, %s9827_s29  ;;  %v11595_v25 = vld [vmem:[#allocation15_spill] sm:$0xff] }
0x1521   : > { %7300 = vrot.lane.b32.xlu0 %v11185_v58, %s9819_s22 }
0x1523   : > { %7302 = vrot.lane.b32.xlu1 %v11183_v0, %s9819_s22 }
0x1525   : > { %7208 = vrot.lane.b32.xlu0 %v11586_v6, %s9825_s18 }
0x1527   : > { %7210 = vrot.lane.b32.xlu1 %v11587_v26, %s9825_s18 }
0x1529   : > { %7240 = vrot.lane.b32.xlu0 %v11588_v36, %s9823_s12 }
0x152b   : > { %7272 = vrot.lane.b32.xlu1 %v11589_v41, %s9821_s26 }
0x152d   : > { %7242 = vrot.lane.b32.xlu0 %v11590_v13, %s9823_s12 }
0x152f   : > { %7304 = vrot.lane.b32.xlu1 %v11189_v15, %s9819_s22 }
0x1531   : > { %7274 = vrot.lane.b32.xlu0 %v11591_v54, %s9821_s26 }
0x153e   : > { %v6741_v48 = vpop.xlane.xlu1 %6740 }
0x153f   : > { %9656 = vrcp.f32 %v6741_v48  ;;  %v6738_v2 = vpop.xlane.xlu0 %6737 }
0x1540   : > { %9658 = vrcp.f32 %v6738_v2 }
0x1543   : > { %v6747_v12 = vpop.xlane.xlu1 %6746 }
0x1544   : > { %9660 = vrcp.f32 %v6747_v12  ;;  %v6744_v61 = vpop.xlane.xlu0 %6743 }
0x1545   : > { %9662 = vrcp.f32 %v6744_v61 }
0x1547   : > { %v6753_v10 = vpop.xlane.xlu1 %6752 }
0x1548   : > { %9664 = vrcp.f32 %v6753_v10  ;;  %v6750_v29 = vpop.xlane.xlu0 %6749 }
0x1549   : > { %v9657_v44 = vpop.eup %9656  ;;  %9666 = vrcp.f32 %v6750_v29  ;;  %v7409_v29 = vld [vmem:[#allocation5] sm:$0xff] }
0x154a   : > { %v9659_v1 = vpop.eup %9658  ;;  %v6763_v4 = vmul.f32 %v9657_v44, %v11203_v50  ;;  %v7410_v44 = vld [vmem:[#allocation5 + $0x8] sm:$0xff] }
0x154b   : > { %v6759_v14 = vpop.xlane.xlu1 %6758  ;;  %v6761_v27 = vmul.f32 %v9659_v1, %v11205_v53  ;;  %v7411_v1 = vld [vmem:[#allocation5 + $0x10] sm:$0xff] }
0x154c   : > { %9668 = vrcp.f32 %v6759_v14  ;;  %v6756_v51 = vpop.xlane.xlu0 %6755  ;;  %v9000_v14 = vpack.c.bf16 %v7410_v44, %v7409_v29  ;;  %v11596_v29 = vld [vmem:[#allocation18_spill] sm:$0xff] }
0x154d   : > { %9670 = vrcp.f32 %v6756_v51  ;;  %8612 = vmatprep.mubr.msk.f32.mxu1 %vm1103_vm3, %v6761_v27  ;;  %v7412_v27 = vld [vmem:[#allocation5 + $0x18] sm:$0xff]  ;;  %v7413_v51 = vld [vmem:[#allocation5 + $0x20] sm:$0xff] }
0x154e   : > { %v9661_v40 = vpop.eup %9660  ;;  %8613 = vmatmul.mubr.msk.f32.vlgmr.msra.gmra.mrb[62].mxu1 %vm1103_vm3, %v6763_v4  ;;  %v9004_v4 = vpack.c.bf16 %v7412_v27, %v7411_v1  ;;  %v11597_v27 = vld [vmem:[#allocation17_spill] sm:$0xff] }
0x154f   : > { %v9663_v16 = vpop.eup %9662  ;;  %v6767_v31 = vmul.f32 %v9661_v40, %v11211_v37  ;;  %v9392_v30 = vpop.permute.xlu1 %9391  ;;  %v7414_v40 = vld [vmem:[#allocation5 + $0x28] sm:$0xff] }
0x1550   : > { %v9394_v0 = vunpack.i.h.bf16 %v9392_v30  ;;  %v9393_v58 = vunpack.i.l.bf16 %v9392_v30  ;;  %v9397_v15 = vpop.permute.xlu0 %9396  ;;  %v6765_v47 = vmul.f32 %v9663_v16, %v11213_v20  ;;  %v9008_v16 = vpack.c.bf16 %v7414_v40, %v7413_v51  ;;  %v7416_v30 = vld [vmem:[#allocation5 + $0x38] sm:$0xff] }
0x1551   : > { %v9399_v34 = vunpack.i.h.bf16 %v9397_v15  ;;  %v9398_v28 = vunpack.i.l.bf16 %v9397_v15 }
0x1552   : > { %v9665_v50 = vpop.eup %9664  ;;  %v8992_v53 = vpack.c.bf16 %v9394_v0, %v9393_v58  ;;  %8619 = vmatprep.mubr.msk.f32.mxu0 %vm1103_vm3, %v6765_v47 }
0x1553   : > { %v9667_v24 = vpop.eup %9666  ;;  %v8996_v9 = vpack.c.bf16 %v9399_v34, %v9398_v28  ;;  %8620 = vmatmul.mubr.msk.f32.vlgmr.msra.gmra.mrb[74].mxu0 %vm1103_vm3, %v6767_v31  ;;  %v7133_v17 = vpop.permute.xlu1 %7132  ;;  %v6771_v37 = vmul.f32 %v9665_v50, %v11219_v11  ;;  %v7415_v31 = vld [vmem:[#allocation5 + $0x30] sm:$0xff] }
0x1554   : > { %v7348_v43 = vsel %vm744_vm1, %v11592_v21, %v7133_v17  ;;  %v7135_v59 = vpop.permute.xlu0 %7134  ;;  %8993 = vmatprep.subr.bf16.mxu1 %v8992_v53  ;;  %v6769_v49 = vmul.f32 %v9667_v24, %v11221_v19  ;;  %v9012_v0 = vpack.c.bf16 %v7416_v30, %v7415_v31 }
0x1555   : > { %v7349_v39 = vsel %vm744_vm1, %v11593_v22, %v7135_v59  ;;  %8997 = vmatprep.subr.bf16.mxu0 %v8996_v9  ;;  %8995 = vmatpush3.bf16.msra.mxu1 %v8992_v53 }
0x1556   : > { %v9669_v42 = vpop.eup %9668  ;;  %8626 = vmatprep.mubr.msk.f32.mxu1 %vm1103_vm3, %v6769_v49  ;;  %8999 = vmatpush3.bf16.msra.mxu0 %v8996_v9 }
0x1557   : > { %v9671_v38 = vpop.eup %9670  ;;  %v6775_v20 = vmul.f32 %v9669_v42, %v11227_v46  ;;  %v7165_v33 = vpop.permute.xlu1 %7164  ;;  %9001 = vmatprep.subr.bf16.mxu1 %v9000_v14 }
0x1558   : > { %v7356_v55 = vsel %vm1103_vm3, %v7348_v43, %v7165_v33  ;;  %v7167_v7 = vpop.permute.xlu0 %7166  ;;  %8627 = vmatmul.mubr.msk.f32.vlgmr.msra.gmra.mrb[64].mxu1 %vm1103_vm3, %v6771_v37  ;;  %v6773_v19 = vmul.f32 %v9671_v38, %v11229_v62 }
0x1559   : > { %v7357_v45 = vsel %vm1103_vm3, %v7349_v39, %v7167_v7  ;;  %9003 = vmatpush3.bf16.msra.mxu1 %v9000_v14 }
0x155a   : > { %8633 = vmatprep.mubr.msk.f32.mxu0 %vm1103_vm3, %v6773_v19  ;;  %9005 = vmatprep.subr.bf16.mxu1 %v9004_v4 }
0x155b   : > { %8634 = vmatmul.mubr.msk.f32.vlgmr.msra.gmra.mrb[76].mxu0 %vm1103_vm3, %v6775_v20  ;;  %v7197_v11 = vpop.permute.xlu1 %7196 }
0x155c   : > { %v7365_v8 = vsel %vm7364_vm4, %v7356_v55, %v7197_v11  ;;  %v7199_v5 = vpop.permute.xlu0 %7198 }
0x155d   : > { %v7366_v46 = vsel %vm7364_vm4, %v7357_v45, %v7199_v5  ;;  %9007 = vmatpush3.bf16.msra.mxu1 %v9004_v4 }
0x155e   : > { %9009 = vmatprep.subr.bf16.mxu1 %v9008_v16 }
0x155f   : > { %v7229_v57 = vpop.permute.xlu1 %7228 }
0x1560   : > { %v7374_v18 = vsel %vm7373_vm5, %v7365_v8, %v7229_v57  ;;  %v7137_v32 = vpop.permute.xlu0 %7136 }
0x1561   : > { %v7350_v62 = vsel %vm744_vm1, %v11594_v52, %v7137_v32  ;;  %9011 = vmatpush3.bf16.msra.mxu1 %v9008_v16 }
0x1562   : > { %9013 = vmatprep.subr.bf16.mxu1 %v9012_v0 }
0x1563   : > { %v7231_v3 = vpop.permute.xlu1 %7230 }
0x1564   : > { %v7375_v23 = vsel %vm7373_vm5, %v7366_v46, %v7231_v3  ;;  %v7261_v56 = vpop.permute.xlu0 %7260 }
0x1565   : > { %v7383_v60 = vsel %vm7382_vm6, %v7374_v18, %v7261_v56  ;;  %9015 = vmatpush3.bf16.msra.mxu1 %v9012_v0 }
0x1567   : > { %v7139_v63 = vpop.permute.xlu1 %7138 }
0x1568   : > { %v7351_v6 = vsel %vm744_vm1, %v11595_v25, %v7139_v63  ;;  %v7169_v26 = vpop.permute.xlu0 %7168 }
0x1569   : > { %v7358_v36 = vsel %vm1103_vm3, %v7350_v62, %v7169_v26 }
0x156b   : > { %v7263_v41 = vpop.permute.xlu1 %7262 }
0x156c   : > { %v11366_v13 = vsel %vm7382_vm6, %v7375_v23, %v7263_v41  ;;  %v7293_v54 = vpop.permute.xlu0 %7292 }
0x156d   : > { %v11369_v48 = vsel %vm7391_vm7, %v7383_v60, %v7293_v54 }
0x156f   : > { %v7171_v2 = vpop.permute.xlu1 %7170 }
0x1570   : > { %v11372_v12 = vsel %vm1103_vm3, %v7351_v6, %v7171_v2  ;;  %v7201_v61 = vpop.permute.xlu0 %7200 }
0x1571   : > { %v11375_v10 = vsel %vm7364_vm4, %v7358_v36, %v7201_v61 }
0x1573   : > { %v7295_v9 = vpop.permute.xlu1 %7294 }
0x1574   : > { %v7233_v21 = vpop.permute.xlu0 %7232  ;;  %v7393_v6 = vsel %vm7391_vm7, %v11366_v13, %v7295_v9 }
0x1575   : > { %v7376_v41 = vsel %vm7373_vm5, %v11375_v10, %v7233_v21  ;;  %v11599_v21 = vld [vmem:[#allocation19_spill] sm:$0xff] }
0x1577   : > { %v7203_v17 = vpop.permute.xlu1 %7202 }
0x1578   : > { %v7141_v59 = vpop.permute.xlu0 %7140  ;;  %v7368_v54 = vsel %vm7364_vm4, %v11372_v12, %v7203_v17 }
0x157b   : > { %v7235_v43 = vpop.permute.xlu1 %7234 }
0x157c   : > { %v7265_v22 = vpop.permute.xlu0 %7264  ;;  %v7377_v2 = vsel %vm7373_vm5, %v7368_v54, %v7235_v43 }
0x157d   : > { %v7385_v61 = vsel %vm7382_vm6, %v7376_v41, %v7265_v22 }
0x157f   : > { %v7143_v49 = vpop.permute.xlu1 %7142 }
0x1580   : > { %v7173_v42 = vpop.permute.xlu0 %7172  ;;  %v7353_v10 = vsel %vm744_vm1, %v11597_v27, %v7143_v49 }
0x1583   : > { %v7267_v39 = vpop.permute.xlu1 %7266 }
0x1584   : > { %v7297_v38 = vpop.permute.xlu0 %7296  ;;  %v7386_v44 = vsel %vm7382_vm6, %v7377_v2, %v7267_v39 }
0x1585   : > { %v7394_v1 = vsel %vm7391_vm7, %v7385_v61, %v7297_v38 }
0x1587   : > { %v7175_v37 = vpop.permute.xlu1 %7174 }
0x1588   : > { %v7205_v33 = vpop.permute.xlu0 %7204  ;;  %v7361_v40 = vsel %vm1103_vm3, %v7353_v10, %v7175_v37 }
0x158b   : > { %v7299_v20 = vpop.permute.xlu1 %7298 }
0x158c   : > { %v7237_v7 = vpop.permute.xlu0 %7236  ;;  %v7395_v4 = vsel %vm7391_vm7, %v7386_v44, %v7299_v20  ;;  %v9677_v44 = vld [vmem:[%s10007_s25 + $0x20] sm:$0xff] }
0x158f   : > { %v7207_v55 = vpop.permute.xlu1 %7206 }
0x1590   : > { %v7145_v45 = vpop.permute.xlu0 %7144  ;;  %v7370_v0 = vsel %vm7364_vm4, %v7361_v40, %v7207_v55  ;;  %v9679_v40 = vld [vmem:[%s10007_s25 + $0x30] sm:$0xff] }
0x1593   : > { %v7239_v19 = vpop.permute.xlu1 %7238 }
0x1594   : > { %v7269_v11 = vpop.permute.xlu0 %7268 }
0x1598   : > { %v7177_v5 = vpop.permute.xlu0 %7176 }
0x159c   : > { %v7301_v57 = vpop.permute.xlu0 %7300 }
0x15a0   : > { %v7209_v32 = vpop.permute.xlu0 %7208 }
0x15a4   : > { %v7241_v62 = vpop.permute.xlu0 %7240 }
0x15a8   : > { %v7243_v23 = vpop.permute.xlu0 %7242 }
0x15ac   : > { %v7275_v60 = vpop.permute.xlu0 %7274 }
0x1621   : > { %v8614_v58 = vpop.f32.mrb[62].mxu1 }
0x1622   : > { %7326 = vrot.lane.b32.xlu1 %v8614_v58, %s9817_s20  ;;  %v6854_v15 = vpop.f32.mrb[63].mxu1  ;;  %v11598_v58 = vld [vmem:[#allocation20_spill] sm:$0xff] }
0x1623   : > { %7324 = vrot.lane.b32.xlu0 %v6854_v15, %s9817_s20  ;;  %v7354_v15 = vsel %vm744_vm1, %v11598_v58, %v7145_v45 }
0x1626   : > { %v8621_v47 = vpop.f32.mrb[74].mxu0 }
0x1627   : > { %v6941_v34 = vpop.f32.mrb[75].mxu0  ;;  %7330 = vrot.lane.b32.xlu1 %v8621_v47, %s9817_s20  ;;  %v7379_v47 = vsel %vm7373_vm5, %v7370_v0, %v7239_v19 }
0x1628   : > { %7328 = vrot.lane.b32.xlu0 %v6941_v34, %s9817_s20 }
0x162b   : > { %v8628_v28 = vpop.f32.mrb[64].mxu1 }
0x162c   : > { %7334 = vrot.lane.b32.xlu1 %v8628_v28, %s9817_s20  ;;  %v7028_v50 = vpop.f32.mrb[65].mxu1  ;;  %v7362_v28 = vsel %vm1103_vm3, %v7354_v15, %v7177_v5  ;;  %v7897_v5 = vld [vmem:[%s11535_s7] ss:$0 sm:$0xff] }
0x162d   : > { %7332 = vrot.lane.b32.xlu0 %v7028_v50, %s9817_s20  ;;  %v7371_v9 = vsel %vm7364_vm4, %v7362_v28, %v7209_v32 }
0x162e   : > { %v8635_v53 = vpop.f32.mrb[76].mxu0  ;;  %v7380_v49 = vsel %vm7373_vm5, %v7371_v9, %v7241_v62 }
0x162f   : > { %v7115_v24 = vpop.f32.mrb[77].mxu0 }
0x1630   : > { %7336 = vrot.lane.b32.xlu1 %v7115_v24, %s9817_s20 }
0x1631   : > { %7306 = vrot.lane.b32.xlu0 %v11187_v35, %s9819_s22  ;;  %v7147_v35 = vpop.permute.xlu1 %7146 }
0x1632   : > { %v7355_v43 = vsel %vm744_vm1, %v11599_v21, %v7147_v35 }
0x1635   : > { %7338 = vrot.lane.b32.xlu0 %v8635_v53, %s9817_s20  ;;  %v7271_v8 = vpop.permute.xlu1 %7270  ;;  %s347_s20 = sand.u32 1, %s9798_s28  }
0x1636   : > { %v7388_v53 = vsel %vm7382_vm6, %v7379_v47, %v7271_v8  ;;  %s7688_s24 = sshll.u32 %s347_s20, 6  ;;  %s11486_s9 = scalar_lea.sflag [#allocation4], %s347_s20 }
0x1637   : > { %s11451_s26 = scalar_lea.vmem [#allocation7], %s7688_s24 }
0x1638   : > { %s7584_s12 = sshll.u32 %s11451_s26, 4  ;;  %s11478_s12 = int_to_ptr.vmem [resolvable:$true] %s7584_s12 }
0x1639   : > { %v7179_v46 = vpop.permute.xlu1 %7178  ;;  %s9736_s29 = scalar_lea.vmem %s11478_s12, 1024 }
0x163a   : > { %v7363_v39 = vsel %vm1103_vm3, %v7355_v43, %v7179_v46  ;;  %p9737_p12 = scmp.ne.s32.totalorder %s11478_s12, %s9736_s29 }
0x163c   : > { %p9738_p2 = pnand %p9737_p12, %p11600_p1 }
0x163d   : > { %v7303_v18 = vpop.permute.xlu1 %7302 }
0x163e   : > { %p9739_p3 = pneg %p9738_p2 }
0x1641   : > { %v7211_v52 = vpop.permute.xlu1 %7210 }
0x1642   : > { %v7372_v38 = vsel %vm7364_vm4, %v7363_v39, %v7211_v52  ;;  %v9672_v52 = vld [vmem:[%s10007_s25 + $0x8] sm:$0xff] }
0x1643   : > { %v7381_v19 = vsel %vm7373_vm5, %v7372_v38, %v7243_v23 }
0x1644   : > { %v7390_v45 = vsel %vm7382_vm6, %v7381_v19, %v7275_v60 }
0x1645   : > { %v7273_v3 = vpop.permute.xlu1 %7272 }
0x1649   : > { %v7305_v56 = vpop.permute.xlu1 %7304 }
0x1694   : > { %v7327_v63 = vpop.permute.xlu1 %7326 }
0x1695   : > { %v7325_v25 = vpop.permute.xlu0 %7324  ;;  %v7402_v36 = vsel %vm7400_vm8, %v7393_v6, %v7327_v63  ;;  %v9674_v6 = vld [vmem:[%s10007_s25 + $0x18] sm:$0xff] }
0x1696   : > { %v7401_v26 = vsel %vm7400_vm8, %v11369_v48, %v7325_v25  ;;  %v7352_v48 = vsel %vm744_vm1, %v11596_v29, %v7141_v59  ;;  %v7397_v59 = vsel %vm7391_vm7, %v7388_v53, %v7303_v18  ;;  %v9676_v29 = vld [vmem:[%s10007_s25 + $0x28] sm:$0xff] }
0x1697   : > { %8652 = vmatprep.mubr.msk.f32.mxu1 %vm381_vm0, %v7401_v26  ;;  %v7360_v12 = vsel %vm1103_vm3, %v7352_v48, %v7173_v42  ;;  %v7389_v42 = vsel %vm7382_vm6, %v7380_v49, %v7273_v3  ;;  %v9673_v3 = vld [vmem:[%s10007_s25] sm:$0xff] }
0x1698   : > { %8653 = vmatmul.mubr.msk.f32.vlgmr.msra.gmra.mrb[66].mxu1 %vm381_vm0, %v7402_v36  ;;  %v7369_v16 = vsel %vm7364_vm4, %v7360_v12, %v7205_v33  ;;  %v7398_v20 = vsel %vm7391_vm7, %v7389_v42, %v7305_v56  ;;  %v9675_v36 = vld [vmem:[%s10007_s25 + $0x10] sm:$0xff] }
0x1699   : > { %v7331_v13 = vpop.permute.xlu1 %7330  ;;  %v7378_v30 = vsel %vm7373_vm5, %v7369_v16, %v7237_v7 }
0x169a   : > { %v7329_v14 = vpop.permute.xlu0 %7328  ;;  %v7404_v31 = vsel %vm7400_vm8, %v7395_v4, %v7331_v13  ;;  %v7387_v34 = vsel %vm7382_vm6, %v7378_v30, %v7269_v11  ;;  %v9678_v4 = vld [vmem:[%s10007_s25 + $0x38] sm:$0xff]  ;;  %s9740_s25 = sshll.u32 %s9831_s14, 4  ;;  %s9741_s25 = int_to_ptr.vmem [resolvable:$false] %s9740_s25 }
0x169b   : > { %v7403_v51 = vsel %vm7400_vm8, %v7394_v1, %v7329_v14  ;;  %v7396_v24 = vsel %vm7391_vm7, %v7387_v34, %v7301_v57  ;;  %s9742_s23 = scalar_lea.vmem %s9741_s25, 2048  ;;  %p9743_p4 = scmp.lt.s32.totalorder %s11478_s12, %s9741_s25 }
0x169c   : > { %8655 = vmatprep.mubr.msk.f32.mxu1 %vm381_vm0, %v7403_v51  ;;  %p9744_p7 = scmp.lt.s32.totalorder %s9742_s23, %s9736_s29 }
0x169d   : > { %8656 = vmatmul.mubr.msk.f32.gmra.mrb[68].mxu1 %vm381_vm0, %v7404_v31 }
0x169e   : > { %v7335_v50 = vpop.permute.xlu1 %7334  ;;  %p9745_p8 = por %p9744_p7, %p9743_p4 }
0x169f   : > { %v7333_v17 = vpop.permute.xlu0 %7332  ;;  %v7406_v37 = vsel %vm7400_vm8, %v7397_v59, %v7335_v50 }
0x16a0   : > { %v7405_v22 = vsel %vm7400_vm8, %v7396_v24, %v7333_v17  ;;  %p9746_p11 = pnand %p9745_p8, %p9739_p3 }
0x16a1   : > { %8658 = vmatprep.mubr.msk.f32.mxu1 %vm381_vm0, %v7405_v22 }
0x16a2   : > { %v7337_v33 = vpop.permute.xlu1 %7336  ;;  %8659 = vmatmul.mubr.msk.f32.gmra.mrb[70].mxu1 %vm381_vm0, %v7406_v37 }
0x16a3   : > { %v7407_v55 = vsel %vm7400_vm8, %v7398_v20, %v7337_v33  ;;  %v7307_v7 = vpop.permute.xlu0 %7306 }
0x16a4   : > { %8661 = vmatprep.mubr.msk.f32.mxu1 %vm381_vm0, %v7407_v55  ;;  %v7399_v35 = vsel %vm7391_vm7, %v7390_v45, %v7307_v7 }
0x16a7   : > { %v7339_v11 = vpop.permute.xlu0 %7338 }
0x16a8   : > { %v7408_v8 = vsel %vm7400_vm8, %v7399_v35, %v7339_v11 }
0x16a9   : > { %8662 = vmatmul.mubr.msk.f32.gmra.mrb[72].mxu1 %vm381_vm0, %v7408_v8 }
0x176b   : > { %v8654_v46 = vpop.f32.mrb[66].mxu1 }
0x176c   : > { %v7520_v57 = vadd.f32 %v8654_v46, %v7897_v5  ;;  %v7514_v18 = vpop.f32.mrb[67].mxu1 }
0x176d   : > { %v7515_v32 = vadd.f32 %v7897_v5, %v7514_v18 }
0x176e   : > { %v7554_v62 = vadd.f32 %v9672_v52, %v7520_v57 }
0x176f   : > { %v7553_v23 = vadd.f32 %v9673_v3, %v7515_v32 }
0x1770   : > { %7562 = vst.msk [vmem:[%s11451_s26 + $0x8] sm:$0xff] %vm381_vm0, %v7554_v62  ;;  %v8657_v56 = vpop.f32.mrb[68].mxu1 }
0x1771   : > { %7561 = vst.msk [vmem:[%s11451_s26] sm:$0xff] %vm381_vm0, %v7553_v23  ;;  %v7530_v60 = vadd.f32 %v8657_v56, %v7897_v5  ;;  %v7524_v63 = vpop.f32.mrb[69].mxu1 }
0x1772   : > { %v7525_v25 = vadd.f32 %v7897_v5, %v7524_v63 }
0x1773   : > { %v7556_v26 = vadd.f32 %v9674_v6, %v7530_v60 }
0x1774   : > { %v7555_v41 = vadd.f32 %v9675_v36, %v7525_v25 }
0x1775   : > { %7564 = vst.msk [vmem:[%s11451_s26 + $0x18] sm:$0xff] %vm381_vm0, %v7556_v26  ;;  %v8660_v54 = vpop.f32.mrb[70].mxu1 }
0x1776   : > { %7563 = vst.msk [vmem:[%s11451_s26 + $0x10] sm:$0xff] %vm381_vm0, %v7555_v41  ;;  %v7540_v2 = vadd.f32 %v8660_v54, %v7897_v5  ;;  %v7534_v61 = vpop.f32.mrb[71].mxu1 }
0x1777   : > { %v7535_v13 = vadd.f32 %v7897_v5, %v7534_v61 }
0x1778   : > { %v7558_v48 = vadd.f32 %v9676_v29, %v7540_v2 }
0x1779   : > { %v7557_v1 = vadd.f32 %v9677_v44, %v7535_v13 }
0x177a   : > { %7566 = vst.msk [vmem:[%s11451_s26 + $0x28] sm:$0xff] %vm381_vm0, %v7558_v48 }
0x177b   : > { %7565 = vst.msk [vmem:[%s11451_s26 + $0x20] sm:$0xff] %vm381_vm0, %v7557_v1 }
0x177c   : > { %v8663_v14 = vpop.f32.mrb[72].mxu1 }
0x177d   : > { %v7550_v27 = vadd.f32 %v8663_v14, %v7897_v5  ;;  %v7544_v10 = vpop.f32.mrb[73].mxu1 }
0x177e   : > { %v7545_v12 = vadd.f32 %v7897_v5, %v7544_v10 }
0x177f   : > { %v7560_v51 = vadd.f32 %v9678_v4, %v7550_v27 }
0x1780   : > { %v7559_v16 = vadd.f32 %v9679_v40, %v7545_v12 }
0x1781   : > { %7568 = vst.msk [vmem:[%s11451_s26 + $0x38] sm:$0xff] %vm381_vm0, %v7560_v51 }
0x1782   : > { %7567 = vst.msk [vmem:[%s11451_s26 + $0x30] sm:$0xff] %vm381_vm0, %v7559_v16 }
0x1783   : > { %9749 = shalt.err (!%p9746_p11)
}
0x1784   : > { %s9750_s20 = scalar_lea.hbm %s11475_s19, 1024  ;;  %s9754_s24 = scalar_lea.hbm %s11536_s8, 2048 }
0x1785   : > { %p9751_p13 = scmp.ne.s32.totalorder %s11475_s19, %s9750_s20  ;;  %p9755_p6 = scmp.lt.u32.totalorder %s11475_s19, %s11536_s8 }
0x1786   : > { %p9756_p9 = scmp.lt.u32.totalorder %s9754_s24, %s9750_s20  ;;  %p9758_p12 = scmp.lt.u32.totalorder %s9750_s20, %s11475_s19 }
0x1787   : > { %p9752_p0 = pnand %p9751_p13, %p11600_p1 }
0x1788   : > { %p9757_p10 = por %p9756_p9, %p9755_p6 }
0x1789   : > { %p9753_p5 = pneg %p9752_p0 }
0x178a   : > { %p9759_p2 = por %p9758_p12, %p9757_p10 }
0x178c   : > { %p9760_p3 = pnand %p9759_p2, %p9753_p5 }
0x178e   : > { %9763 = shalt.err (!%p9760_p3)
}
0x178f   : > { %s9832_s13 = smov 128  }
0x1790   : > { %9024 = dma.vmem_to_hbm [thread:$0]  (%p11600_p1), %s11478_s12, 1024, %s11475_s19, %s11486_s9, %s9832_s13, %s9832_s13, %s9829_s21  }
0x1791 PF: > { %p9041_p4 = scmp.ge.s32.totalorder %s9806_s30, 2  ;;  %s7599_s18 = sand.u32 1, %s9794_s27  }
0x1792   : > { %p11601_p7 = scmp.ne.s32.totalorder %s11544_s16, 0  ;;  %s7600_s29 = scalar_lea.sflag [#allocation4], %s7599_s18 }
0x1794   : > { %p9034_p8 = pnand %p9041_p4, %p11601_p7 }
0x1796   : > { %9789 = dma.done.wait (!%p9034_p8), %s7600_s29, 1024  }
0x1797   : > { %9791 = vsyncadd (!%p9034_p8), %s7600_s29, 4294966272  ;;  %s11602_s14 = sld [smem:[#allocation11_spill]]  ;;  %s11603_s29 = sld [smem:[#allocation12_spill]] }
0x1798   : > { %p20_p11 = scmp.ge.s32.totalorder %s9903_s11, 4   ;;  %s11604_s27 = smov %s9798_s28 }
0x1799   : > { %s11606_s30 = smov %s9903_s11 }
0x179a   :  { %22 = sbr.rel (!%p20_p11) target bundleno = 5 (0x5), region = 99 }
0x179d   : > { %s11605_s28 = smov %s11602_s14 }
0x17a1   :  { %7605 = vsyncpa [#allocation3], 1 }
0x17a2   :  { %7607 = vsyncpa [#allocation3 + $0x1], 1 }
0x17a3   :  { %7608 = vsyncpa [#allocation6], 1 }
0x17a4   :  { %7609 = vsyncpa [#allocation4], 1 }
0x17a5   :  { %7611 = vsyncpa [#allocation4 + $0x1], 1 }

</bundles_post_ra>
